<compile_context>
chip_gen: v7x
topology: tpu7x:2x2x1
jax: 0.10.0
libtpu: 0.0.40
codegen_flags: <defaults>
</compile_context>

<pallas_src>
import functools
import math

import jax
import jax.numpy as jnp
from jax import lax
from jax.experimental import pallas as pl
from jax.experimental.pallas import tpu as pltpu

_LANES = 128
_INNER_ROWS = 16          # (16, 128) working chunk = 2 f32 vregs per value
_MAX_BLOCK_ROWS = 512     # rows per grid step: 256 KiB in + 256 KiB out (f32)


def _cdiv(a, b):
    return -(-a // b)


def _round_up(a, b):
    return _cdiv(a, b) * b


def _noise_schedule_kernel(t_ref,                      # VMEM (block_rows, 128) f32
                           w1_ref, b1_ref,             # SMEM (H,), (H,)  [w1 pre-scaled by 1/T]
                           w2_ref, b2_ref,             # SMEM (H*H,), (H,)
                           w3_ref, b3_ref,             # SMEM (H,), (1,)
                           o_ref,                      # VMEM (block_rows, 128) f32
                           *, hidden_dim, block_rows, inner_rows):
    H = hidden_dim
    n_chunks = block_rows // inner_rows

    # Hoist loop-invariant SMEM scalar reads above the chunk loop.
    w1 = [w1_ref[j] for j in range(H)]
    b1 = [b1_ref[j] for j in range(H)]
    b2 = [b2_ref[k] for k in range(H)]
    w3 = [w3_ref[k] for k in range(H)]
    b3 = b3_ref[0]

    def chunk(c, carry):
        r0 = pl.multiple_of(c * inner_rows, inner_rows)
        x = t_ref[pl.ds(r0, inner_rows), :]            # (16, 128), VPU

        # Layer 1: Linear(1, H) + ReLU — H scalar-broadcast FMAs
        # (1/num_timesteps already folded into w1 on the host).
        h1 = [jnp.maximum(x * w1[j] + b1[j], 0.0) for j in range(H)]

        # Layers 2 + 3 fused: per output channel k, build h2_k and immediately
        # accumulate its layer-3 contribution into one of two partial sums.
        z_even = None
        z_odd = None
        for k in range(H):
            acc = h1[0] * w2_ref[k] + b2[k]            # w2_ref[0*H + k]
            for j in range(1, H):
                acc = acc + h1[j] * w2_ref[j * H + k]
            h2_k = jnp.maximum(acc, 0.0)
            contrib = h2_k * w3[k]
            if (k & 1) == 0:
                z_even = contrib if z_even is None else z_even + contrib
            else:
                z_odd = contrib if z_odd is None else z_odd + contrib
        z = (z_even + z_odd) + b3

        # Sigmoid lowers to the EUP logistic — free slot next to the VALU.
        o_ref[pl.ds(r0, inner_rows), :] = jax.nn.sigmoid(z)
        return carry

    lax.fori_loop(0, n_chunks, chunk, 0)


def learned_noise_schedule(t, num_timesteps, params):
    """t: (B, 1) numeric. num_timesteps: python int/float. Returns (B, 1) f32."""
    w1, b1, w2, b2, w3, b3 = params
    H = w2.shape[0]
    B = t.shape[0]

    # Fold 1/num_timesteps into the layer-1 weight (numerically equivalent,
    # removes one full-chunk VALU multiply per element).
    w1_scaled = w1.astype(jnp.float32) / float(num_timesteps)
    w2_flat = jnp.reshape(w2.astype(jnp.float32), (H * H,))

    n_rows = max(1, _cdiv(B, _LANES))
    block_rows = min(_MAX_BLOCK_ROWS, _round_up(n_rows, _INNER_ROWS))
    n_tiles = _cdiv(n_rows, block_rows)
    rows_pad = n_tiles * block_rows
    b_pad = rows_pad * _LANES

    t_flat = jnp.ravel(t).astype(jnp.float32)
    t_lanes = jnp.pad(t_flat, (0, b_pad - B)).reshape(rows_pad, _LANES)

    kernel = functools.partial(_noise_schedule_kernel, hidden_dim=H,
                               block_rows=block_rows, inner_rows=_INNER_ROWS)
    smem = pl.BlockSpec(memory_space=pltpu.MemorySpace.SMEM)
    tile_spec = pl.BlockSpec((block_rows, _LANES), lambda i: (i, 0))

    out = pl.pallas_call(
        kernel,
        out_shape=jax.ShapeDtypeStruct((rows_pad, _LANES), jnp.float32),
        grid=(n_tiles,),
        in_specs=[tile_spec, smem, smem, smem, smem, smem, smem],
        out_specs=tile_spec,
        compiler_params=pltpu.CompilerParams(
            dimension_semantics=("parallel",)),
    )(t_lanes, w1_scaled, b1.astype(jnp.float32), w2_flat,
      b2.astype(jnp.float32), w3.astype(jnp.float32), b3.astype(jnp.float32))

    return out.reshape(b_pad, 1)[:B]


def init_params(hidden_dim=16, key=None):
    """Deterministic init mirroring nn.Linear's U(-1/sqrt(fan_in), 1/sqrt(fan_in)).

    Storage layout:
      w1: (H,)   Linear(1, H) weight      b1: (H,)
      w2: (H, H) Linear(H, H) weight as [in, out]   b2: (H,)
      w3: (H,)   Linear(H, 1) weight      b3: (1,)
    """
    if key is None:
        key = jax.random.PRNGKey(0)
    ks = jax.random.split(key, 6)

    def unif(k, shape, fan_in):
        bound = 1.0 / math.sqrt(fan_in)
        return jax.random.uniform(k, shape, jnp.float32, -bound, bound)

    w1 = unif(ks[0], (hidden_dim,), 1)
    b1 = unif(ks[1], (hidden_dim,), 1)
    w2 = unif(ks[2], (hidden_dim, hidden_dim), hidden_dim)
    b2 = unif(ks[3], (hidden_dim,), hidden_dim)
    w3 = unif(ks[4], (hidden_dim,), hidden_dim)
    b3 = unif(ks[5], (1,), hidden_dim)
    return (w1, b1, w2, b2, w3, b3)


def _reference(t, num_timesteps, params):
    w1, b1, w2, b2, w3, b3 = params
    x = t.astype(jnp.float32) / float(num_timesteps)                   # (B, 1)
    h1 = jnp.maximum(x * w1[None, :] + b1[None, :], 0.0)               # (B, H)
    h2 = jnp.maximum(h1 @ w2 + b2[None, :], 0.0)                       # (B, H)
    z = h2 @ w3[:, None] + b3[None, :]                                 # (B, 1)
    return jax.nn.sigmoid(z)


if __name__ == "__main__":
    key = jax.random.PRNGKey(0)
    hidden_dim = 16
    num_timesteps = 1000

    params = init_params(hidden_dim, key)

    # Small shape matching the module's forward signature: t of shape (B, 1).
    B = 8
    t = jax.random.randint(jax.random.fold_in(key, 1), (B, 1), 0,
                           num_timesteps).astype(jnp.float32)
    out = jax.block_until_ready(learned_noise_schedule(t, num_timesteps, params))
    ref = _reference(t, num_timesteps, params)
    assert out.shape == (B, 1) and out.dtype == jnp.float32
    assert jnp.allclose(out, ref, atol=1e-5, rtol=1e-5), \
        float(jnp.max(jnp.abs(out - ref)))

    # Second, slightly larger batch to exercise the multi-chunk fori_loop path.
    B2 = 2500
    t2 = jax.random.randint(jax.random.fold_in(key, 2), (B2, 1), 0,
                            num_timesteps).astype(jnp.float32)
    out2 = jax.block_until_ready(learned_noise_schedule(t2, num_timesteps, params))
    ref2 = _reference(t2, num_timesteps, params)
    assert out2.shape == (B2, 1)
    assert jnp.allclose(out2, ref2, atol=1e-5, rtol=1e-5), \
        float(jnp.max(jnp.abs(out2 - ref2)))

    print("KERNEL_OK")
</pallas_src>

<mosaic_0001>
module attributes {stable_mosaic.version = 11 : i64} {
  func.func @_noise_schedule_kernel(%arg0: i32, %arg1: memref<16x128xf32, #tpu.memory_space<vmem>>, %arg2: memref<16xf32, #tpu.memory_space<smem>>, %arg3: memref<16xf32, #tpu.memory_space<smem>>, %arg4: memref<256xf32, #tpu.memory_space<smem>>, %arg5: memref<16xf32, #tpu.memory_space<smem>>, %arg6: memref<16xf32, #tpu.memory_space<smem>>, %arg7: memref<1xf32, #tpu.memory_space<smem>>, %arg8: memref<16x128xf32, #tpu.memory_space<vmem>>) attributes {dimension_semantics = [#tpu.dimension_semantics<parallel>], iteration_bounds = array<i64: 1>, scalar_prefetch = 0 : i64, scratch_operands = 0 : i64, tpu.core_type = #tpu.core_type<tc>, window_params = [{transform_indices = @transform_0, window_bounds = array<i64: 16, 128>}, {transform_indices = @transform_1, window_bounds = array<i64: 16>}, {transform_indices = @transform_2, window_bounds = array<i64: 16>}, {transform_indices = @transform_3, window_bounds = array<i64: 256>}, {transform_indices = @transform_4, window_bounds = array<i64: 16>}, {transform_indices = @transform_5, window_bounds = array<i64: 16>}, {transform_indices = @transform_6, window_bounds = array<i64: 1>}, {transform_indices = @transform_7, window_bounds = array<i64: 16, 128>}]} {
    %c0 = arith.constant 0 : index
    %0 = memref.load %arg2[%c0] : memref<16xf32, #tpu.memory_space<smem>>
    %c1 = arith.constant 1 : index
    %1 = memref.load %arg2[%c1] : memref<16xf32, #tpu.memory_space<smem>>
    %c2 = arith.constant 2 : index
    %2 = memref.load %arg2[%c2] : memref<16xf32, #tpu.memory_space<smem>>
    %c3 = arith.constant 3 : index
    %3 = memref.load %arg2[%c3] : memref<16xf32, #tpu.memory_space<smem>>
    %c4 = arith.constant 4 : index
    %4 = memref.load %arg2[%c4] : memref<16xf32, #tpu.memory_space<smem>>
    %c5 = arith.constant 5 : index
    %5 = memref.load %arg2[%c5] : memref<16xf32, #tpu.memory_space<smem>>
    %c6 = arith.constant 6 : index
    %6 = memref.load %arg2[%c6] : memref<16xf32, #tpu.memory_space<smem>>
    %c7 = arith.constant 7 : index
    %7 = memref.load %arg2[%c7] : memref<16xf32, #tpu.memory_space<smem>>
    %c8 = arith.constant 8 : index
    %8 = memref.load %arg2[%c8] : memref<16xf32, #tpu.memory_space<smem>>
    %c9 = arith.constant 9 : index
    %9 = memref.load %arg2[%c9] : memref<16xf32, #tpu.memory_space<smem>>
    %c10 = arith.constant 10 : index
    %10 = memref.load %arg2[%c10] : memref<16xf32, #tpu.memory_space<smem>>
    %c11 = arith.constant 11 : index
    %11 = memref.load %arg2[%c11] : memref<16xf32, #tpu.memory_space<smem>>
    %c12 = arith.constant 12 : index
    %12 = memref.load %arg2[%c12] : memref<16xf32, #tpu.memory_space<smem>>
    %c13 = arith.constant 13 : index
    %13 = memref.load %arg2[%c13] : memref<16xf32, #tpu.memory_space<smem>>
    %c14 = arith.constant 14 : index
    %14 = memref.load %arg2[%c14] : memref<16xf32, #tpu.memory_space<smem>>
    %c15 = arith.constant 15 : index
    %15 = memref.load %arg2[%c15] : memref<16xf32, #tpu.memory_space<smem>>
    %c0_0 = arith.constant 0 : index
    %16 = memref.load %arg3[%c0_0] : memref<16xf32, #tpu.memory_space<smem>>
    %c1_1 = arith.constant 1 : index
    %17 = memref.load %arg3[%c1_1] : memref<16xf32, #tpu.memory_space<smem>>
    %c2_2 = arith.constant 2 : index
    %18 = memref.load %arg3[%c2_2] : memref<16xf32, #tpu.memory_space<smem>>
    %c3_3 = arith.constant 3 : index
    %19 = memref.load %arg3[%c3_3] : memref<16xf32, #tpu.memory_space<smem>>
    %c4_4 = arith.constant 4 : index
    %20 = memref.load %arg3[%c4_4] : memref<16xf32, #tpu.memory_space<smem>>
    %c5_5 = arith.constant 5 : index
    %21 = memref.load %arg3[%c5_5] : memref<16xf32, #tpu.memory_space<smem>>
    %c6_6 = arith.constant 6 : index
    %22 = memref.load %arg3[%c6_6] : memref<16xf32, #tpu.memory_space<smem>>
    %c7_7 = arith.constant 7 : index
    %23 = memref.load %arg3[%c7_7] : memref<16xf32, #tpu.memory_space<smem>>
    %c8_8 = arith.constant 8 : index
    %24 = memref.load %arg3[%c8_8] : memref<16xf32, #tpu.memory_space<smem>>
    %c9_9 = arith.constant 9 : index
    %25 = memref.load %arg3[%c9_9] : memref<16xf32, #tpu.memory_space<smem>>
    %c10_10 = arith.constant 10 : index
    %26 = memref.load %arg3[%c10_10] : memref<16xf32, #tpu.memory_space<smem>>
    %c11_11 = arith.constant 11 : index
    %27 = memref.load %arg3[%c11_11] : memref<16xf32, #tpu.memory_space<smem>>
    %c12_12 = arith.constant 12 : index
    %28 = memref.load %arg3[%c12_12] : memref<16xf32, #tpu.memory_space<smem>>
    %c13_13 = arith.constant 13 : index
    %29 = memref.load %arg3[%c13_13] : memref<16xf32, #tpu.memory_space<smem>>
    %c14_14 = arith.constant 14 : index
    %30 = memref.load %arg3[%c14_14] : memref<16xf32, #tpu.memory_space<smem>>
    %c15_15 = arith.constant 15 : index
    %31 = memref.load %arg3[%c15_15] : memref<16xf32, #tpu.memory_space<smem>>
    %c0_16 = arith.constant 0 : index
    %32 = memref.load %arg5[%c0_16] : memref<16xf32, #tpu.memory_space<smem>>
    %c1_17 = arith.constant 1 : index
    %33 = memref.load %arg5[%c1_17] : memref<16xf32, #tpu.memory_space<smem>>
    %c2_18 = arith.constant 2 : index
    %34 = memref.load %arg5[%c2_18] : memref<16xf32, #tpu.memory_space<smem>>
    %c3_19 = arith.constant 3 : index
    %35 = memref.load %arg5[%c3_19] : memref<16xf32, #tpu.memory_space<smem>>
    %c4_20 = arith.constant 4 : index
    %36 = memref.load %arg5[%c4_20] : memref<16xf32, #tpu.memory_space<smem>>
    %c5_21 = arith.constant 5 : index
    %37 = memref.load %arg5[%c5_21] : memref<16xf32, #tpu.memory_space<smem>>
    %c6_22 = arith.constant 6 : index
    %38 = memref.load %arg5[%c6_22] : memref<16xf32, #tpu.memory_space<smem>>
    %c7_23 = arith.constant 7 : index
    %39 = memref.load %arg5[%c7_23] : memref<16xf32, #tpu.memory_space<smem>>
    %c8_24 = arith.constant 8 : index
    %40 = memref.load %arg5[%c8_24] : memref<16xf32, #tpu.memory_space<smem>>
    %c9_25 = arith.constant 9 : index
    %41 = memref.load %arg5[%c9_25] : memref<16xf32, #tpu.memory_space<smem>>
    %c10_26 = arith.constant 10 : index
    %42 = memref.load %arg5[%c10_26] : memref<16xf32, #tpu.memory_space<smem>>
    %c11_27 = arith.constant 11 : index
    %43 = memref.load %arg5[%c11_27] : memref<16xf32, #tpu.memory_space<smem>>
    %c12_28 = arith.constant 12 : index
    %44 = memref.load %arg5[%c12_28] : memref<16xf32, #tpu.memory_space<smem>>
    %c13_29 = arith.constant 13 : index
    %45 = memref.load %arg5[%c13_29] : memref<16xf32, #tpu.memory_space<smem>>
    %c14_30 = arith.constant 14 : index
    %46 = memref.load %arg5[%c14_30] : memref<16xf32, #tpu.memory_space<smem>>
    %c15_31 = arith.constant 15 : index
    %47 = memref.load %arg5[%c15_31] : memref<16xf32, #tpu.memory_space<smem>>
    %c0_32 = arith.constant 0 : index
    %48 = memref.load %arg6[%c0_32] : memref<16xf32, #tpu.memory_space<smem>>
    %c1_33 = arith.constant 1 : index
    %49 = memref.load %arg6[%c1_33] : memref<16xf32, #tpu.memory_space<smem>>
    %c2_34 = arith.constant 2 : index
    %50 = memref.load %arg6[%c2_34] : memref<16xf32, #tpu.memory_space<smem>>
    %c3_35 = arith.constant 3 : index
    %51 = memref.load %arg6[%c3_35] : memref<16xf32, #tpu.memory_space<smem>>
    %c4_36 = arith.constant 4 : index
    %52 = memref.load %arg6[%c4_36] : memref<16xf32, #tpu.memory_space<smem>>
    %c5_37 = arith.constant 5 : index
    %53 = memref.load %arg6[%c5_37] : memref<16xf32, #tpu.memory_space<smem>>
    %c6_38 = arith.constant 6 : index
    %54 = memref.load %arg6[%c6_38] : memref<16xf32, #tpu.memory_space<smem>>
    %c7_39 = arith.constant 7 : index
    %55 = memref.load %arg6[%c7_39] : memref<16xf32, #tpu.memory_space<smem>>
    %c8_40 = arith.constant 8 : index
    %56 = memref.load %arg6[%c8_40] : memref<16xf32, #tpu.memory_space<smem>>
    %c9_41 = arith.constant 9 : index
    %57 = memref.load %arg6[%c9_41] : memref<16xf32, #tpu.memory_space<smem>>
    %c10_42 = arith.constant 10 : index
    %58 = memref.load %arg6[%c10_42] : memref<16xf32, #tpu.memory_space<smem>>
    %c11_43 = arith.constant 11 : index
    %59 = memref.load %arg6[%c11_43] : memref<16xf32, #tpu.memory_space<smem>>
    %c12_44 = arith.constant 12 : index
    %60 = memref.load %arg6[%c12_44] : memref<16xf32, #tpu.memory_space<smem>>
    %c13_45 = arith.constant 13 : index
    %61 = memref.load %arg6[%c13_45] : memref<16xf32, #tpu.memory_space<smem>>
    %c14_46 = arith.constant 14 : index
    %62 = memref.load %arg6[%c14_46] : memref<16xf32, #tpu.memory_space<smem>>
    %c15_47 = arith.constant 15 : index
    %63 = memref.load %arg6[%c15_47] : memref<16xf32, #tpu.memory_space<smem>>
    %c0_48 = arith.constant 0 : index
    %64 = memref.load %arg7[%c0_48] : memref<1xf32, #tpu.memory_space<smem>>
    %c0_i32 = arith.constant 0 : i32
    %c16_i32 = arith.constant 16 : i32
    %65 = arith.muli %c0_i32, %c16_i32 : i32
    %66 = tpu.assume_multiple %65, 16 : i32
    %67 = arith.index_cast %66 : i32 to index
    %c0_49 = arith.constant 0 : index
    %68 = vector.load %arg1[%67, %c0_49] : memref<16x128xf32, #tpu.memory_space<vmem>>, vector<16x128xf32>
    %69 = vector.broadcast %0 : f32 to vector<16x128xf32>
    %70 = arith.mulf %68, %69 : vector<16x128xf32>
    %71 = vector.broadcast %16 : f32 to vector<16x128xf32>
    %72 = arith.addf %70, %71 : vector<16x128xf32>
    %cst = arith.constant 0.000000e+00 : f32
    %73 = vector.broadcast %cst : f32 to vector<16x128xf32>
    %74 = arith.maximumf %72, %73 : vector<16x128xf32>
    %75 = vector.broadcast %1 : f32 to vector<16x128xf32>
    %76 = arith.mulf %68, %75 : vector<16x128xf32>
    %77 = vector.broadcast %17 : f32 to vector<16x128xf32>
    %78 = arith.addf %76, %77 : vector<16x128xf32>
    %cst_50 = arith.constant 0.000000e+00 : f32
    %79 = vector.broadcast %cst_50 : f32 to vector<16x128xf32>
    %80 = arith.maximumf %78, %79 : vector<16x128xf32>
    %81 = vector.broadcast %2 : f32 to vector<16x128xf32>
    %82 = arith.mulf %68, %81 : vector<16x128xf32>
    %83 = vector.broadcast %18 : f32 to vector<16x128xf32>
    %84 = arith.addf %82, %83 : vector<16x128xf32>
    %cst_51 = arith.constant 0.000000e+00 : f32
    %85 = vector.broadcast %cst_51 : f32 to vector<16x128xf32>
    %86 = arith.maximumf %84, %85 : vector<16x128xf32>
    %87 = vector.broadcast %3 : f32 to vector<16x128xf32>
    %88 = arith.mulf %68, %87 : vector<16x128xf32>
    %89 = vector.broadcast %19 : f32 to vector<16x128xf32>
    %90 = arith.addf %88, %89 : vector<16x128xf32>
    %cst_52 = arith.constant 0.000000e+00 : f32
    %91 = vector.broadcast %cst_52 : f32 to vector<16x128xf32>
    %92 = arith.maximumf %90, %91 : vector<16x128xf32>
    %93 = vector.broadcast %4 : f32 to vector<16x128xf32>
    %94 = arith.mulf %68, %93 : vector<16x128xf32>
    %95 = vector.broadcast %20 : f32 to vector<16x128xf32>
    %96 = arith.addf %94, %95 : vector<16x128xf32>
    %cst_53 = arith.constant 0.000000e+00 : f32
    %97 = vector.broadcast %cst_53 : f32 to vector<16x128xf32>
    %98 = arith.maximumf %96, %97 : vector<16x128xf32>
    %99 = vector.broadcast %5 : f32 to vector<16x128xf32>
    %100 = arith.mulf %68, %99 : vector<16x128xf32>
    %101 = vector.broadcast %21 : f32 to vector<16x128xf32>
    %102 = arith.addf %100, %101 : vector<16x128xf32>
    %cst_54 = arith.constant 0.000000e+00 : f32
    %103 = vector.broadcast %cst_54 : f32 to vector<16x128xf32>
    %104 = arith.maximumf %102, %103 : vector<16x128xf32>
    %105 = vector.broadcast %6 : f32 to vector<16x128xf32>
    %106 = arith.mulf %68, %105 : vector<16x128xf32>
    %107 = vector.broadcast %22 : f32 to vector<16x128xf32>
    %108 = arith.addf %106, %107 : vector<16x128xf32>
    %cst_55 = arith.constant 0.000000e+00 : f32
    %109 = vector.broadcast %cst_55 : f32 to vector<16x128xf32>
    %110 = arith.maximumf %108, %109 : vector<16x128xf32>
    %111 = vector.broadcast %7 : f32 to vector<16x128xf32>
    %112 = arith.mulf %68, %111 : vector<16x128xf32>
    %113 = vector.broadcast %23 : f32 to vector<16x128xf32>
    %114 = arith.addf %112, %113 : vector<16x128xf32>
    %cst_56 = arith.constant 0.000000e+00 : f32
    %115 = vector.broadcast %cst_56 : f32 to vector<16x128xf32>
    %116 = arith.maximumf %114, %115 : vector<16x128xf32>
    %117 = vector.broadcast %8 : f32 to vector<16x128xf32>
    %118 = arith.mulf %68, %117 : vector<16x128xf32>
    %119 = vector.broadcast %24 : f32 to vector<16x128xf32>
    %120 = arith.addf %118, %119 : vector<16x128xf32>
    %cst_57 = arith.constant 0.000000e+00 : f32
    %121 = vector.broadcast %cst_57 : f32 to vector<16x128xf32>
    %122 = arith.maximumf %120, %121 : vector<16x128xf32>
    %123 = vector.broadcast %9 : f32 to vector<16x128xf32>
    %124 = arith.mulf %68, %123 : vector<16x128xf32>
    %125 = vector.broadcast %25 : f32 to vector<16x128xf32>
    %126 = arith.addf %124, %125 : vector<16x128xf32>
    %cst_58 = arith.constant 0.000000e+00 : f32
    %127 = vector.broadcast %cst_58 : f32 to vector<16x128xf32>
    %128 = arith.maximumf %126, %127 : vector<16x128xf32>
    %129 = vector.broadcast %10 : f32 to vector<16x128xf32>
    %130 = arith.mulf %68, %129 : vector<16x128xf32>
    %131 = vector.broadcast %26 : f32 to vector<16x128xf32>
    %132 = arith.addf %130, %131 : vector<16x128xf32>
    %cst_59 = arith.constant 0.000000e+00 : f32
    %133 = vector.broadcast %cst_59 : f32 to vector<16x128xf32>
    %134 = arith.maximumf %132, %133 : vector<16x128xf32>
    %135 = vector.broadcast %11 : f32 to vector<16x128xf32>
    %136 = arith.mulf %68, %135 : vector<16x128xf32>
    %137 = vector.broadcast %27 : f32 to vector<16x128xf32>
    %138 = arith.addf %136, %137 : vector<16x128xf32>
    %cst_60 = arith.constant 0.000000e+00 : f32
    %139 = vector.broadcast %cst_60 : f32 to vector<16x128xf32>
    %140 = arith.maximumf %138, %139 : vector<16x128xf32>
    %141 = vector.broadcast %12 : f32 to vector<16x128xf32>
    %142 = arith.mulf %68, %141 : vector<16x128xf32>
    %143 = vector.broadcast %28 : f32 to vector<16x128xf32>
    %144 = arith.addf %142, %143 : vector<16x128xf32>
    %cst_61 = arith.constant 0.000000e+00 : f32
    %145 = vector.broadcast %cst_61 : f32 to vector<16x128xf32>
    %146 = arith.maximumf %144, %145 : vector<16x128xf32>
    %147 = vector.broadcast %13 : f32 to vector<16x128xf32>
    %148 = arith.mulf %68, %147 : vector<16x128xf32>
    %149 = vector.broadcast %29 : f32 to vector<16x128xf32>
    %150 = arith.addf %148, %149 : vector<16x128xf32>
    %cst_62 = arith.constant 0.000000e+00 : f32
    %151 = vector.broadcast %cst_62 : f32 to vector<16x128xf32>
    %152 = arith.maximumf %150, %151 : vector<16x128xf32>
    %153 = vector.broadcast %14 : f32 to vector<16x128xf32>
    %154 = arith.mulf %68, %153 : vector<16x128xf32>
    %155 = vector.broadcast %30 : f32 to vector<16x128xf32>
    %156 = arith.addf %154, %155 : vector<16x128xf32>
    %cst_63 = arith.constant 0.000000e+00 : f32
    %157 = vector.broadcast %cst_63 : f32 to vector<16x128xf32>
    %158 = arith.maximumf %156, %157 : vector<16x128xf32>
    %159 = vector.broadcast %15 : f32 to vector<16x128xf32>
    %160 = arith.mulf %68, %159 : vector<16x128xf32>
    %161 = vector.broadcast %31 : f32 to vector<16x128xf32>
    %162 = arith.addf %160, %161 : vector<16x128xf32>
    %cst_64 = arith.constant 0.000000e+00 : f32
    %163 = vector.broadcast %cst_64 : f32 to vector<16x128xf32>
    %164 = arith.maximumf %162, %163 : vector<16x128xf32>
    %c0_65 = arith.constant 0 : index
    %165 = memref.load %arg4[%c0_65] : memref<256xf32, #tpu.memory_space<smem>>
    %166 = vector.broadcast %165 : f32 to vector<16x128xf32>
    %167 = arith.mulf %74, %166 : vector<16x128xf32>
    %168 = vector.broadcast %32 : f32 to vector<16x128xf32>
    %169 = arith.addf %167, %168 : vector<16x128xf32>
    %c16 = arith.constant 16 : index
    %170 = memref.load %arg4[%c16] : memref<256xf32, #tpu.memory_space<smem>>
    %171 = vector.broadcast %170 : f32 to vector<16x128xf32>
    %172 = arith.mulf %80, %171 : vector<16x128xf32>
    %173 = arith.addf %169, %172 : vector<16x128xf32>
    %c32 = arith.constant 32 : index
    %174 = memref.load %arg4[%c32] : memref<256xf32, #tpu.memory_space<smem>>
    %175 = vector.broadcast %174 : f32 to vector<16x128xf32>
    %176 = arith.mulf %86, %175 : vector<16x128xf32>
    %177 = arith.addf %173, %176 : vector<16x128xf32>
    %c48 = arith.constant 48 : index
    %178 = memref.load %arg4[%c48] : memref<256xf32, #tpu.memory_space<smem>>
    %179 = vector.broadcast %178 : f32 to vector<16x128xf32>
    %180 = arith.mulf %92, %179 : vector<16x128xf32>
    %181 = arith.addf %177, %180 : vector<16x128xf32>
    %c64 = arith.constant 64 : index
    %182 = memref.load %arg4[%c64] : memref<256xf32, #tpu.memory_space<smem>>
    %183 = vector.broadcast %182 : f32 to vector<16x128xf32>
    %184 = arith.mulf %98, %183 : vector<16x128xf32>
    %185 = arith.addf %181, %184 : vector<16x128xf32>
    %c80 = arith.constant 80 : index
    %186 = memref.load %arg4[%c80] : memref<256xf32, #tpu.memory_space<smem>>
    %187 = vector.broadcast %186 : f32 to vector<16x128xf32>
    %188 = arith.mulf %104, %187 : vector<16x128xf32>
    %189 = arith.addf %185, %188 : vector<16x128xf32>
    %c96 = arith.constant 96 : index
    %190 = memref.load %arg4[%c96] : memref<256xf32, #tpu.memory_space<smem>>
    %191 = vector.broadcast %190 : f32 to vector<16x128xf32>
    %192 = arith.mulf %110, %191 : vector<16x128xf32>
    %193 = arith.addf %189, %192 : vector<16x128xf32>
    %c112 = arith.constant 112 : index
    %194 = memref.load %arg4[%c112] : memref<256xf32, #tpu.memory_space<smem>>
    %195 = vector.broadcast %194 : f32 to vector<16x128xf32>
    %196 = arith.mulf %116, %195 : vector<16x128xf32>
    %197 = arith.addf %193, %196 : vector<16x128xf32>
    %c128 = arith.constant 128 : index
    %198 = memref.load %arg4[%c128] : memref<256xf32, #tpu.memory_space<smem>>
    %199 = vector.broadcast %198 : f32 to vector<16x128xf32>
    %200 = arith.mulf %122, %199 : vector<16x128xf32>
    %201 = arith.addf %197, %200 : vector<16x128xf32>
    %c144 = arith.constant 144 : index
    %202 = memref.load %arg4[%c144] : memref<256xf32, #tpu.memory_space<smem>>
    %203 = vector.broadcast %202 : f32 to vector<16x128xf32>
    %204 = arith.mulf %128, %203 : vector<16x128xf32>
    %205 = arith.addf %201, %204 : vector<16x128xf32>
    %c160 = arith.constant 160 : index
    %206 = memref.load %arg4[%c160] : memref<256xf32, #tpu.memory_space<smem>>
    %207 = vector.broadcast %206 : f32 to vector<16x128xf32>
    %208 = arith.mulf %134, %207 : vector<16x128xf32>
    %209 = arith.addf %205, %208 : vector<16x128xf32>
    %c176 = arith.constant 176 : index
    %210 = memref.load %arg4[%c176] : memref<256xf32, #tpu.memory_space<smem>>
    %211 = vector.broadcast %210 : f32 to vector<16x128xf32>
    %212 = arith.mulf %140, %211 : vector<16x128xf32>
    %213 = arith.addf %209, %212 : vector<16x128xf32>
    %c192 = arith.constant 192 : index
    %214 = memref.load %arg4[%c192] : memref<256xf32, #tpu.memory_space<smem>>
    %215 = vector.broadcast %214 : f32 to vector<16x128xf32>
    %216 = arith.mulf %146, %215 : vector<16x128xf32>
    %217 = arith.addf %213, %216 : vector<16x128xf32>
    %c208 = arith.constant 208 : index
    %218 = memref.load %arg4[%c208] : memref<256xf32, #tpu.memory_space<smem>>
    %219 = vector.broadcast %218 : f32 to vector<16x128xf32>
    %220 = arith.mulf %152, %219 : vector<16x128xf32>
    %221 = arith.addf %217, %220 : vector<16x128xf32>
    %c224 = arith.constant 224 : index
    %222 = memref.load %arg4[%c224] : memref<256xf32, #tpu.memory_space<smem>>
    %223 = vector.broadcast %222 : f32 to vector<16x128xf32>
    %224 = arith.mulf %158, %223 : vector<16x128xf32>
    %225 = arith.addf %221, %224 : vector<16x128xf32>
    %c240 = arith.constant 240 : index
    %226 = memref.load %arg4[%c240] : memref<256xf32, #tpu.memory_space<smem>>
    %227 = vector.broadcast %226 : f32 to vector<16x128xf32>
    %228 = arith.mulf %164, %227 : vector<16x128xf32>
    %229 = arith.addf %225, %228 : vector<16x128xf32>
    %cst_66 = arith.constant 0.000000e+00 : f32
    %230 = vector.broadcast %cst_66 : f32 to vector<16x128xf32>
    %231 = arith.maximumf %229, %230 : vector<16x128xf32>
    %232 = vector.broadcast %48 : f32 to vector<16x128xf32>
    %233 = arith.mulf %231, %232 : vector<16x128xf32>
    %c1_67 = arith.constant 1 : index
    %234 = memref.load %arg4[%c1_67] : memref<256xf32, #tpu.memory_space<smem>>
    %235 = vector.broadcast %234 : f32 to vector<16x128xf32>
    %236 = arith.mulf %74, %235 : vector<16x128xf32>
    %237 = vector.broadcast %33 : f32 to vector<16x128xf32>
    %238 = arith.addf %236, %237 : vector<16x128xf32>
    %c17 = arith.constant 17 : index
    %239 = memref.load %arg4[%c17] : memref<256xf32, #tpu.memory_space<smem>>
    %240 = vector.broadcast %239 : f32 to vector<16x128xf32>
    %241 = arith.mulf %80, %240 : vector<16x128xf32>
    %242 = arith.addf %238, %241 : vector<16x128xf32>
    %c33 = arith.constant 33 : index
    %243 = memref.load %arg4[%c33] : memref<256xf32, #tpu.memory_space<smem>>
    %244 = vector.broadcast %243 : f32 to vector<16x128xf32>
    %245 = arith.mulf %86, %244 : vector<16x128xf32>
    %246 = arith.addf %242, %245 : vector<16x128xf32>
    %c49 = arith.constant 49 : index
    %247 = memref.load %arg4[%c49] : memref<256xf32, #tpu.memory_space<smem>>
    %248 = vector.broadcast %247 : f32 to vector<16x128xf32>
    %249 = arith.mulf %92, %248 : vector<16x128xf32>
    %250 = arith.addf %246, %249 : vector<16x128xf32>
    %c65 = arith.constant 65 : index
    %251 = memref.load %arg4[%c65] : memref<256xf32, #tpu.memory_space<smem>>
    %252 = vector.broadcast %251 : f32 to vector<16x128xf32>
    %253 = arith.mulf %98, %252 : vector<16x128xf32>
    %254 = arith.addf %250, %253 : vector<16x128xf32>
    %c81 = arith.constant 81 : index
    %255 = memref.load %arg4[%c81] : memref<256xf32, #tpu.memory_space<smem>>
    %256 = vector.broadcast %255 : f32 to vector<16x128xf32>
    %257 = arith.mulf %104, %256 : vector<16x128xf32>
    %258 = arith.addf %254, %257 : vector<16x128xf32>
    %c97 = arith.constant 97 : index
    %259 = memref.load %arg4[%c97] : memref<256xf32, #tpu.memory_space<smem>>
    %260 = vector.broadcast %259 : f32 to vector<16x128xf32>
    %261 = arith.mulf %110, %260 : vector<16x128xf32>
    %262 = arith.addf %258, %261 : vector<16x128xf32>
    %c113 = arith.constant 113 : index
    %263 = memref.load %arg4[%c113] : memref<256xf32, #tpu.memory_space<smem>>
    %264 = vector.broadcast %263 : f32 to vector<16x128xf32>
    %265 = arith.mulf %116, %264 : vector<16x128xf32>
    %266 = arith.addf %262, %265 : vector<16x128xf32>
    %c129 = arith.constant 129 : index
    %267 = memref.load %arg4[%c129] : memref<256xf32, #tpu.memory_space<smem>>
    %268 = vector.broadcast %267 : f32 to vector<16x128xf32>
    %269 = arith.mulf %122, %268 : vector<16x128xf32>
    %270 = arith.addf %266, %269 : vector<16x128xf32>
    %c145 = arith.constant 145 : index
    %271 = memref.load %arg4[%c145] : memref<256xf32, #tpu.memory_space<smem>>
    %272 = vector.broadcast %271 : f32 to vector<16x128xf32>
    %273 = arith.mulf %128, %272 : vector<16x128xf32>
    %274 = arith.addf %270, %273 : vector<16x128xf32>
    %c161 = arith.constant 161 : index
    %275 = memref.load %arg4[%c161] : memref<256xf32, #tpu.memory_space<smem>>
    %276 = vector.broadcast %275 : f32 to vector<16x128xf32>
    %277 = arith.mulf %134, %276 : vector<16x128xf32>
    %278 = arith.addf %274, %277 : vector<16x128xf32>
    %c177 = arith.constant 177 : index
    %279 = memref.load %arg4[%c177] : memref<256xf32, #tpu.memory_space<smem>>
    %280 = vector.broadcast %279 : f32 to vector<16x128xf32>
    %281 = arith.mulf %140, %280 : vector<16x128xf32>
    %282 = arith.addf %278, %281 : vector<16x128xf32>
    %c193 = arith.constant 193 : index
    %283 = memref.load %arg4[%c193] : memref<256xf32, #tpu.memory_space<smem>>
    %284 = vector.broadcast %283 : f32 to vector<16x128xf32>
    %285 = arith.mulf %146, %284 : vector<16x128xf32>
    %286 = arith.addf %282, %285 : vector<16x128xf32>
    %c209 = arith.constant 209 : index
    %287 = memref.load %arg4[%c209] : memref<256xf32, #tpu.memory_space<smem>>
    %288 = vector.broadcast %287 : f32 to vector<16x128xf32>
    %289 = arith.mulf %152, %288 : vector<16x128xf32>
    %290 = arith.addf %286, %289 : vector<16x128xf32>
    %c225 = arith.constant 225 : index
    %291 = memref.load %arg4[%c225] : memref<256xf32, #tpu.memory_space<smem>>
    %292 = vector.broadcast %291 : f32 to vector<16x128xf32>
    %293 = arith.mulf %158, %292 : vector<16x128xf32>
    %294 = arith.addf %290, %293 : vector<16x128xf32>
    %c241 = arith.constant 241 : index
    %295 = memref.load %arg4[%c241] : memref<256xf32, #tpu.memory_space<smem>>
    %296 = vector.broadcast %295 : f32 to vector<16x128xf32>
    %297 = arith.mulf %164, %296 : vector<16x128xf32>
    %298 = arith.addf %294, %297 : vector<16x128xf32>
    %cst_68 = arith.constant 0.000000e+00 : f32
    %299 = vector.broadcast %cst_68 : f32 to vector<16x128xf32>
    %300 = arith.maximumf %298, %299 : vector<16x128xf32>
    %301 = vector.broadcast %49 : f32 to vector<16x128xf32>
    %302 = arith.mulf %300, %301 : vector<16x128xf32>
    %c2_69 = arith.constant 2 : index
    %303 = memref.load %arg4[%c2_69] : memref<256xf32, #tpu.memory_space<smem>>
    %304 = vector.broadcast %303 : f32 to vector<16x128xf32>
    %305 = arith.mulf %74, %304 : vector<16x128xf32>
    %306 = vector.broadcast %34 : f32 to vector<16x128xf32>
    %307 = arith.addf %305, %306 : vector<16x128xf32>
    %c18 = arith.constant 18 : index
    %308 = memref.load %arg4[%c18] : memref<256xf32, #tpu.memory_space<smem>>
    %309 = vector.broadcast %308 : f32 to vector<16x128xf32>
    %310 = arith.mulf %80, %309 : vector<16x128xf32>
    %311 = arith.addf %307, %310 : vector<16x128xf32>
    %c34 = arith.constant 34 : index
    %312 = memref.load %arg4[%c34] : memref<256xf32, #tpu.memory_space<smem>>
    %313 = vector.broadcast %312 : f32 to vector<16x128xf32>
    %314 = arith.mulf %86, %313 : vector<16x128xf32>
    %315 = arith.addf %311, %314 : vector<16x128xf32>
    %c50 = arith.constant 50 : index
    %316 = memref.load %arg4[%c50] : memref<256xf32, #tpu.memory_space<smem>>
    %317 = vector.broadcast %316 : f32 to vector<16x128xf32>
    %318 = arith.mulf %92, %317 : vector<16x128xf32>
    %319 = arith.addf %315, %318 : vector<16x128xf32>
    %c66 = arith.constant 66 : index
    %320 = memref.load %arg4[%c66] : memref<256xf32, #tpu.memory_space<smem>>
    %321 = vector.broadcast %320 : f32 to vector<16x128xf32>
    %322 = arith.mulf %98, %321 : vector<16x128xf32>
    %323 = arith.addf %319, %322 : vector<16x128xf32>
    %c82 = arith.constant 82 : index
    %324 = memref.load %arg4[%c82] : memref<256xf32, #tpu.memory_space<smem>>
    %325 = vector.broadcast %324 : f32 to vector<16x128xf32>
    %326 = arith.mulf %104, %325 : vector<16x128xf32>
    %327 = arith.addf %323, %326 : vector<16x128xf32>
    %c98 = arith.constant 98 : index
    %328 = memref.load %arg4[%c98] : memref<256xf32, #tpu.memory_space<smem>>
    %329 = vector.broadcast %328 : f32 to vector<16x128xf32>
    %330 = arith.mulf %110, %329 : vector<16x128xf32>
    %331 = arith.addf %327, %330 : vector<16x128xf32>
    %c114 = arith.constant 114 : index
    %332 = memref.load %arg4[%c114] : memref<256xf32, #tpu.memory_space<smem>>
    %333 = vector.broadcast %332 : f32 to vector<16x128xf32>
    %334 = arith.mulf %116, %333 : vector<16x128xf32>
    %335 = arith.addf %331, %334 : vector<16x128xf32>
    %c130 = arith.constant 130 : index
    %336 = memref.load %arg4[%c130] : memref<256xf32, #tpu.memory_space<smem>>
    %337 = vector.broadcast %336 : f32 to vector<16x128xf32>
    %338 = arith.mulf %122, %337 : vector<16x128xf32>
    %339 = arith.addf %335, %338 : vector<16x128xf32>
    %c146 = arith.constant 146 : index
    %340 = memref.load %arg4[%c146] : memref<256xf32, #tpu.memory_space<smem>>
    %341 = vector.broadcast %340 : f32 to vector<16x128xf32>
    %342 = arith.mulf %128, %341 : vector<16x128xf32>
    %343 = arith.addf %339, %342 : vector<16x128xf32>
    %c162 = arith.constant 162 : index
    %344 = memref.load %arg4[%c162] : memref<256xf32, #tpu.memory_space<smem>>
    %345 = vector.broadcast %344 : f32 to vector<16x128xf32>
    %346 = arith.mulf %134, %345 : vector<16x128xf32>
    %347 = arith.addf %343, %346 : vector<16x128xf32>
    %c178 = arith.constant 178 : index
    %348 = memref.load %arg4[%c178] : memref<256xf32, #tpu.memory_space<smem>>
    %349 = vector.broadcast %348 : f32 to vector<16x128xf32>
    %350 = arith.mulf %140, %349 : vector<16x128xf32>
    %351 = arith.addf %347, %350 : vector<16x128xf32>
    %c194 = arith.constant 194 : index
    %352 = memref.load %arg4[%c194] : memref<256xf32, #tpu.memory_space<smem>>
    %353 = vector.broadcast %352 : f32 to vector<16x128xf32>
    %354 = arith.mulf %146, %353 : vector<16x128xf32>
    %355 = arith.addf %351, %354 : vector<16x128xf32>
    %c210 = arith.constant 210 : index
    %356 = memref.load %arg4[%c210] : memref<256xf32, #tpu.memory_space<smem>>
    %357 = vector.broadcast %356 : f32 to vector<16x128xf32>
    %358 = arith.mulf %152, %357 : vector<16x128xf32>
    %359 = arith.addf %355, %358 : vector<16x128xf32>
    %c226 = arith.constant 226 : index
    %360 = memref.load %arg4[%c226] : memref<256xf32, #tpu.memory_space<smem>>
    %361 = vector.broadcast %360 : f32 to vector<16x128xf32>
    %362 = arith.mulf %158, %361 : vector<16x128xf32>
    %363 = arith.addf %359, %362 : vector<16x128xf32>
    %c242 = arith.constant 242 : index
    %364 = memref.load %arg4[%c242] : memref<256xf32, #tpu.memory_space<smem>>
    %365 = vector.broadcast %364 : f32 to vector<16x128xf32>
    %366 = arith.mulf %164, %365 : vector<16x128xf32>
    %367 = arith.addf %363, %366 : vector<16x128xf32>
    %cst_70 = arith.constant 0.000000e+00 : f32
    %368 = vector.broadcast %cst_70 : f32 to vector<16x128xf32>
    %369 = arith.maximumf %367, %368 : vector<16x128xf32>
    %370 = vector.broadcast %50 : f32 to vector<16x128xf32>
    %371 = arith.mulf %369, %370 : vector<16x128xf32>
    %372 = arith.addf %233, %371 : vector<16x128xf32>
    %c3_71 = arith.constant 3 : index
    %373 = memref.load %arg4[%c3_71] : memref<256xf32, #tpu.memory_space<smem>>
    %374 = vector.broadcast %373 : f32 to vector<16x128xf32>
    %375 = arith.mulf %74, %374 : vector<16x128xf32>
    %376 = vector.broadcast %35 : f32 to vector<16x128xf32>
    %377 = arith.addf %375, %376 : vector<16x128xf32>
    %c19 = arith.constant 19 : index
    %378 = memref.load %arg4[%c19] : memref<256xf32, #tpu.memory_space<smem>>
    %379 = vector.broadcast %378 : f32 to vector<16x128xf32>
    %380 = arith.mulf %80, %379 : vector<16x128xf32>
    %381 = arith.addf %377, %380 : vector<16x128xf32>
    %c35 = arith.constant 35 : index
    %382 = memref.load %arg4[%c35] : memref<256xf32, #tpu.memory_space<smem>>
    %383 = vector.broadcast %382 : f32 to vector<16x128xf32>
    %384 = arith.mulf %86, %383 : vector<16x128xf32>
    %385 = arith.addf %381, %384 : vector<16x128xf32>
    %c51 = arith.constant 51 : index
    %386 = memref.load %arg4[%c51] : memref<256xf32, #tpu.memory_space<smem>>
    %387 = vector.broadcast %386 : f32 to vector<16x128xf32>
    %388 = arith.mulf %92, %387 : vector<16x128xf32>
    %389 = arith.addf %385, %388 : vector<16x128xf32>
    %c67 = arith.constant 67 : index
    %390 = memref.load %arg4[%c67] : memref<256xf32, #tpu.memory_space<smem>>
    %391 = vector.broadcast %390 : f32 to vector<16x128xf32>
    %392 = arith.mulf %98, %391 : vector<16x128xf32>
    %393 = arith.addf %389, %392 : vector<16x128xf32>
    %c83 = arith.constant 83 : index
    %394 = memref.load %arg4[%c83] : memref<256xf32, #tpu.memory_space<smem>>
    %395 = vector.broadcast %394 : f32 to vector<16x128xf32>
    %396 = arith.mulf %104, %395 : vector<16x128xf32>
    %397 = arith.addf %393, %396 : vector<16x128xf32>
    %c99 = arith.constant 99 : index
    %398 = memref.load %arg4[%c99] : memref<256xf32, #tpu.memory_space<smem>>
    %399 = vector.broadcast %398 : f32 to vector<16x128xf32>
    %400 = arith.mulf %110, %399 : vector<16x128xf32>
    %401 = arith.addf %397, %400 : vector<16x128xf32>
    %c115 = arith.constant 115 : index
    %402 = memref.load %arg4[%c115] : memref<256xf32, #tpu.memory_space<smem>>
    %403 = vector.broadcast %402 : f32 to vector<16x128xf32>
    %404 = arith.mulf %116, %403 : vector<16x128xf32>
    %405 = arith.addf %401, %404 : vector<16x128xf32>
    %c131 = arith.constant 131 : index
    %406 = memref.load %arg4[%c131] : memref<256xf32, #tpu.memory_space<smem>>
    %407 = vector.broadcast %406 : f32 to vector<16x128xf32>
    %408 = arith.mulf %122, %407 : vector<16x128xf32>
    %409 = arith.addf %405, %408 : vector<16x128xf32>
    %c147 = arith.constant 147 : index
    %410 = memref.load %arg4[%c147] : memref<256xf32, #tpu.memory_space<smem>>
    %411 = vector.broadcast %410 : f32 to vector<16x128xf32>
    %412 = arith.mulf %128, %411 : vector<16x128xf32>
    %413 = arith.addf %409, %412 : vector<16x128xf32>
    %c163 = arith.constant 163 : index
    %414 = memref.load %arg4[%c163] : memref<256xf32, #tpu.memory_space<smem>>
    %415 = vector.broadcast %414 : f32 to vector<16x128xf32>
    %416 = arith.mulf %134, %415 : vector<16x128xf32>
    %417 = arith.addf %413, %416 : vector<16x128xf32>
    %c179 = arith.constant 179 : index
    %418 = memref.load %arg4[%c179] : memref<256xf32, #tpu.memory_space<smem>>
    %419 = vector.broadcast %418 : f32 to vector<16x128xf32>
    %420 = arith.mulf %140, %419 : vector<16x128xf32>
    %421 = arith.addf %417, %420 : vector<16x128xf32>
    %c195 = arith.constant 195 : index
    %422 = memref.load %arg4[%c195] : memref<256xf32, #tpu.memory_space<smem>>
    %423 = vector.broadcast %422 : f32 to vector<16x128xf32>
    %424 = arith.mulf %146, %423 : vector<16x128xf32>
    %425 = arith.addf %421, %424 : vector<16x128xf32>
    %c211 = arith.constant 211 : index
    %426 = memref.load %arg4[%c211] : memref<256xf32, #tpu.memory_space<smem>>
    %427 = vector.broadcast %426 : f32 to vector<16x128xf32>
    %428 = arith.mulf %152, %427 : vector<16x128xf32>
    %429 = arith.addf %425, %428 : vector<16x128xf32>
    %c227 = arith.constant 227 : index
    %430 = memref.load %arg4[%c227] : memref<256xf32, #tpu.memory_space<smem>>
    %431 = vector.broadcast %430 : f32 to vector<16x128xf32>
    %432 = arith.mulf %158, %431 : vector<16x128xf32>
    %433 = arith.addf %429, %432 : vector<16x128xf32>
    %c243 = arith.constant 243 : index
    %434 = memref.load %arg4[%c243] : memref<256xf32, #tpu.memory_space<smem>>
    %435 = vector.broadcast %434 : f32 to vector<16x128xf32>
    %436 = arith.mulf %164, %435 : vector<16x128xf32>
    %437 = arith.addf %433, %436 : vector<16x128xf32>
    %cst_72 = arith.constant 0.000000e+00 : f32
    %438 = vector.broadcast %cst_72 : f32 to vector<16x128xf32>
    %439 = arith.maximumf %437, %438 : vector<16x128xf32>
    %440 = vector.broadcast %51 : f32 to vector<16x128xf32>
    %441 = arith.mulf %439, %440 : vector<16x128xf32>
    %442 = arith.addf %302, %441 : vector<16x128xf32>
    %c4_73 = arith.constant 4 : index
    %443 = memref.load %arg4[%c4_73] : memref<256xf32, #tpu.memory_space<smem>>
    %444 = vector.broadcast %443 : f32 to vector<16x128xf32>
    %445 = arith.mulf %74, %444 : vector<16x128xf32>
    %446 = vector.broadcast %36 : f32 to vector<16x128xf32>
    %447 = arith.addf %445, %446 : vector<16x128xf32>
    %c20 = arith.constant 20 : index
    %448 = memref.load %arg4[%c20] : memref<256xf32, #tpu.memory_space<smem>>
    %449 = vector.broadcast %448 : f32 to vector<16x128xf32>
    %450 = arith.mulf %80, %449 : vector<16x128xf32>
    %451 = arith.addf %447, %450 : vector<16x128xf32>
    %c36 = arith.constant 36 : index
    %452 = memref.load %arg4[%c36] : memref<256xf32, #tpu.memory_space<smem>>
    %453 = vector.broadcast %452 : f32 to vector<16x128xf32>
    %454 = arith.mulf %86, %453 : vector<16x128xf32>
    %455 = arith.addf %451, %454 : vector<16x128xf32>
    %c52 = arith.constant 52 : index
    %456 = memref.load %arg4[%c52] : memref<256xf32, #tpu.memory_space<smem>>
    %457 = vector.broadcast %456 : f32 to vector<16x128xf32>
    %458 = arith.mulf %92, %457 : vector<16x128xf32>
    %459 = arith.addf %455, %458 : vector<16x128xf32>
    %c68 = arith.constant 68 : index
    %460 = memref.load %arg4[%c68] : memref<256xf32, #tpu.memory_space<smem>>
    %461 = vector.broadcast %460 : f32 to vector<16x128xf32>
    %462 = arith.mulf %98, %461 : vector<16x128xf32>
    %463 = arith.addf %459, %462 : vector<16x128xf32>
    %c84 = arith.constant 84 : index
    %464 = memref.load %arg4[%c84] : memref<256xf32, #tpu.memory_space<smem>>
    %465 = vector.broadcast %464 : f32 to vector<16x128xf32>
    %466 = arith.mulf %104, %465 : vector<16x128xf32>
    %467 = arith.addf %463, %466 : vector<16x128xf32>
    %c100 = arith.constant 100 : index
    %468 = memref.load %arg4[%c100] : memref<256xf32, #tpu.memory_space<smem>>
    %469 = vector.broadcast %468 : f32 to vector<16x128xf32>
    %470 = arith.mulf %110, %469 : vector<16x128xf32>
    %471 = arith.addf %467, %470 : vector<16x128xf32>
    %c116 = arith.constant 116 : index
    %472 = memref.load %arg4[%c116] : memref<256xf32, #tpu.memory_space<smem>>
    %473 = vector.broadcast %472 : f32 to vector<16x128xf32>
    %474 = arith.mulf %116, %473 : vector<16x128xf32>
    %475 = arith.addf %471, %474 : vector<16x128xf32>
    %c132 = arith.constant 132 : index
    %476 = memref.load %arg4[%c132] : memref<256xf32, #tpu.memory_space<smem>>
    %477 = vector.broadcast %476 : f32 to vector<16x128xf32>
    %478 = arith.mulf %122, %477 : vector<16x128xf32>
    %479 = arith.addf %475, %478 : vector<16x128xf32>
    %c148 = arith.constant 148 : index
    %480 = memref.load %arg4[%c148] : memref<256xf32, #tpu.memory_space<smem>>
    %481 = vector.broadcast %480 : f32 to vector<16x128xf32>
    %482 = arith.mulf %128, %481 : vector<16x128xf32>
    %483 = arith.addf %479, %482 : vector<16x128xf32>
    %c164 = arith.constant 164 : index
    %484 = memref.load %arg4[%c164] : memref<256xf32, #tpu.memory_space<smem>>
    %485 = vector.broadcast %484 : f32 to vector<16x128xf32>
    %486 = arith.mulf %134, %485 : vector<16x128xf32>
    %487 = arith.addf %483, %486 : vector<16x128xf32>
    %c180 = arith.constant 180 : index
    %488 = memref.load %arg4[%c180] : memref<256xf32, #tpu.memory_space<smem>>
    %489 = vector.broadcast %488 : f32 to vector<16x128xf32>
    %490 = arith.mulf %140, %489 : vector<16x128xf32>
    %491 = arith.addf %487, %490 : vector<16x128xf32>
    %c196 = arith.constant 196 : index
    %492 = memref.load %arg4[%c196] : memref<256xf32, #tpu.memory_space<smem>>
    %493 = vector.broadcast %492 : f32 to vector<16x128xf32>
    %494 = arith.mulf %146, %493 : vector<16x128xf32>
    %495 = arith.addf %491, %494 : vector<16x128xf32>
    %c212 = arith.constant 212 : index
    %496 = memref.load %arg4[%c212] : memref<256xf32, #tpu.memory_space<smem>>
    %497 = vector.broadcast %496 : f32 to vector<16x128xf32>
    %498 = arith.mulf %152, %497 : vector<16x128xf32>
    %499 = arith.addf %495, %498 : vector<16x128xf32>
    %c228 = arith.constant 228 : index
    %500 = memref.load %arg4[%c228] : memref<256xf32, #tpu.memory_space<smem>>
    %501 = vector.broadcast %500 : f32 to vector<16x128xf32>
    %502 = arith.mulf %158, %501 : vector<16x128xf32>
    %503 = arith.addf %499, %502 : vector<16x128xf32>
    %c244 = arith.constant 244 : index
    %504 = memref.load %arg4[%c244] : memref<256xf32, #tpu.memory_space<smem>>
    %505 = vector.broadcast %504 : f32 to vector<16x128xf32>
    %506 = arith.mulf %164, %505 : vector<16x128xf32>
    %507 = arith.addf %503, %506 : vector<16x128xf32>
    %cst_74 = arith.constant 0.000000e+00 : f32
    %508 = vector.broadcast %cst_74 : f32 to vector<16x128xf32>
    %509 = arith.maximumf %507, %508 : vector<16x128xf32>
    %510 = vector.broadcast %52 : f32 to vector<16x128xf32>
    %511 = arith.mulf %509, %510 : vector<16x128xf32>
    %512 = arith.addf %372, %511 : vector<16x128xf32>
    %c5_75 = arith.constant 5 : index
    %513 = memref.load %arg4[%c5_75] : memref<256xf32, #tpu.memory_space<smem>>
    %514 = vector.broadcast %513 : f32 to vector<16x128xf32>
    %515 = arith.mulf %74, %514 : vector<16x128xf32>
    %516 = vector.broadcast %37 : f32 to vector<16x128xf32>
    %517 = arith.addf %515, %516 : vector<16x128xf32>
    %c21 = arith.constant 21 : index
    %518 = memref.load %arg4[%c21] : memref<256xf32, #tpu.memory_space<smem>>
    %519 = vector.broadcast %518 : f32 to vector<16x128xf32>
    %520 = arith.mulf %80, %519 : vector<16x128xf32>
    %521 = arith.addf %517, %520 : vector<16x128xf32>
    %c37 = arith.constant 37 : index
    %522 = memref.load %arg4[%c37] : memref<256xf32, #tpu.memory_space<smem>>
    %523 = vector.broadcast %522 : f32 to vector<16x128xf32>
    %524 = arith.mulf %86, %523 : vector<16x128xf32>
    %525 = arith.addf %521, %524 : vector<16x128xf32>
    %c53 = arith.constant 53 : index
    %526 = memref.load %arg4[%c53] : memref<256xf32, #tpu.memory_space<smem>>
    %527 = vector.broadcast %526 : f32 to vector<16x128xf32>
    %528 = arith.mulf %92, %527 : vector<16x128xf32>
    %529 = arith.addf %525, %528 : vector<16x128xf32>
    %c69 = arith.constant 69 : index
    %530 = memref.load %arg4[%c69] : memref<256xf32, #tpu.memory_space<smem>>
    %531 = vector.broadcast %530 : f32 to vector<16x128xf32>
    %532 = arith.mulf %98, %531 : vector<16x128xf32>
    %533 = arith.addf %529, %532 : vector<16x128xf32>
    %c85 = arith.constant 85 : index
    %534 = memref.load %arg4[%c85] : memref<256xf32, #tpu.memory_space<smem>>
    %535 = vector.broadcast %534 : f32 to vector<16x128xf32>
    %536 = arith.mulf %104, %535 : vector<16x128xf32>
    %537 = arith.addf %533, %536 : vector<16x128xf32>
    %c101 = arith.constant 101 : index
    %538 = memref.load %arg4[%c101] : memref<256xf32, #tpu.memory_space<smem>>
    %539 = vector.broadcast %538 : f32 to vector<16x128xf32>
    %540 = arith.mulf %110, %539 : vector<16x128xf32>
    %541 = arith.addf %537, %540 : vector<16x128xf32>
    %c117 = arith.constant 117 : index
    %542 = memref.load %arg4[%c117] : memref<256xf32, #tpu.memory_space<smem>>
    %543 = vector.broadcast %542 : f32 to vector<16x128xf32>
    %544 = arith.mulf %116, %543 : vector<16x128xf32>
    %545 = arith.addf %541, %544 : vector<16x128xf32>
    %c133 = arith.constant 133 : index
    %546 = memref.load %arg4[%c133] : memref<256xf32, #tpu.memory_space<smem>>
    %547 = vector.broadcast %546 : f32 to vector<16x128xf32>
    %548 = arith.mulf %122, %547 : vector<16x128xf32>
    %549 = arith.addf %545, %548 : vector<16x128xf32>
    %c149 = arith.constant 149 : index
    %550 = memref.load %arg4[%c149] : memref<256xf32, #tpu.memory_space<smem>>
    %551 = vector.broadcast %550 : f32 to vector<16x128xf32>
    %552 = arith.mulf %128, %551 : vector<16x128xf32>
    %553 = arith.addf %549, %552 : vector<16x128xf32>
    %c165 = arith.constant 165 : index
    %554 = memref.load %arg4[%c165] : memref<256xf32, #tpu.memory_space<smem>>
    %555 = vector.broadcast %554 : f32 to vector<16x128xf32>
    %556 = arith.mulf %134, %555 : vector<16x128xf32>
    %557 = arith.addf %553, %556 : vector<16x128xf32>
    %c181 = arith.constant 181 : index
    %558 = memref.load %arg4[%c181] : memref<256xf32, #tpu.memory_space<smem>>
    %559 = vector.broadcast %558 : f32 to vector<16x128xf32>
    %560 = arith.mulf %140, %559 : vector<16x128xf32>
    %561 = arith.addf %557, %560 : vector<16x128xf32>
    %c197 = arith.constant 197 : index
    %562 = memref.load %arg4[%c197] : memref<256xf32, #tpu.memory_space<smem>>
    %563 = vector.broadcast %562 : f32 to vector<16x128xf32>
    %564 = arith.mulf %146, %563 : vector<16x128xf32>
    %565 = arith.addf %561, %564 : vector<16x128xf32>
    %c213 = arith.constant 213 : index
    %566 = memref.load %arg4[%c213] : memref<256xf32, #tpu.memory_space<smem>>
    %567 = vector.broadcast %566 : f32 to vector<16x128xf32>
    %568 = arith.mulf %152, %567 : vector<16x128xf32>
    %569 = arith.addf %565, %568 : vector<16x128xf32>
    %c229 = arith.constant 229 : index
    %570 = memref.load %arg4[%c229] : memref<256xf32, #tpu.memory_space<smem>>
    %571 = vector.broadcast %570 : f32 to vector<16x128xf32>
    %572 = arith.mulf %158, %571 : vector<16x128xf32>
    %573 = arith.addf %569, %572 : vector<16x128xf32>
    %c245 = arith.constant 245 : index
    %574 = memref.load %arg4[%c245] : memref<256xf32, #tpu.memory_space<smem>>
    %575 = vector.broadcast %574 : f32 to vector<16x128xf32>
    %576 = arith.mulf %164, %575 : vector<16x128xf32>
    %577 = arith.addf %573, %576 : vector<16x128xf32>
    %cst_76 = arith.constant 0.000000e+00 : f32
    %578 = vector.broadcast %cst_76 : f32 to vector<16x128xf32>
    %579 = arith.maximumf %577, %578 : vector<16x128xf32>
    %580 = vector.broadcast %53 : f32 to vector<16x128xf32>
    %581 = arith.mulf %579, %580 : vector<16x128xf32>
    %582 = arith.addf %442, %581 : vector<16x128xf32>
    %c6_77 = arith.constant 6 : index
    %583 = memref.load %arg4[%c6_77] : memref<256xf32, #tpu.memory_space<smem>>
    %584 = vector.broadcast %583 : f32 to vector<16x128xf32>
    %585 = arith.mulf %74, %584 : vector<16x128xf32>
    %586 = vector.broadcast %38 : f32 to vector<16x128xf32>
    %587 = arith.addf %585, %586 : vector<16x128xf32>
    %c22 = arith.constant 22 : index
    %588 = memref.load %arg4[%c22] : memref<256xf32, #tpu.memory_space<smem>>
    %589 = vector.broadcast %588 : f32 to vector<16x128xf32>
    %590 = arith.mulf %80, %589 : vector<16x128xf32>
    %591 = arith.addf %587, %590 : vector<16x128xf32>
    %c38 = arith.constant 38 : index
    %592 = memref.load %arg4[%c38] : memref<256xf32, #tpu.memory_space<smem>>
    %593 = vector.broadcast %592 : f32 to vector<16x128xf32>
    %594 = arith.mulf %86, %593 : vector<16x128xf32>
    %595 = arith.addf %591, %594 : vector<16x128xf32>
    %c54 = arith.constant 54 : index
    %596 = memref.load %arg4[%c54] : memref<256xf32, #tpu.memory_space<smem>>
    %597 = vector.broadcast %596 : f32 to vector<16x128xf32>
    %598 = arith.mulf %92, %597 : vector<16x128xf32>
    %599 = arith.addf %595, %598 : vector<16x128xf32>
    %c70 = arith.constant 70 : index
    %600 = memref.load %arg4[%c70] : memref<256xf32, #tpu.memory_space<smem>>
    %601 = vector.broadcast %600 : f32 to vector<16x128xf32>
    %602 = arith.mulf %98, %601 : vector<16x128xf32>
    %603 = arith.addf %599, %602 : vector<16x128xf32>
    %c86 = arith.constant 86 : index
    %604 = memref.load %arg4[%c86] : memref<256xf32, #tpu.memory_space<smem>>
    %605 = vector.broadcast %604 : f32 to vector<16x128xf32>
    %606 = arith.mulf %104, %605 : vector<16x128xf32>
    %607 = arith.addf %603, %606 : vector<16x128xf32>
    %c102 = arith.constant 102 : index
    %608 = memref.load %arg4[%c102] : memref<256xf32, #tpu.memory_space<smem>>
    %609 = vector.broadcast %608 : f32 to vector<16x128xf32>
    %610 = arith.mulf %110, %609 : vector<16x128xf32>
    %611 = arith.addf %607, %610 : vector<16x128xf32>
    %c118 = arith.constant 118 : index
    %612 = memref.load %arg4[%c118] : memref<256xf32, #tpu.memory_space<smem>>
    %613 = vector.broadcast %612 : f32 to vector<16x128xf32>
    %614 = arith.mulf %116, %613 : vector<16x128xf32>
    %615 = arith.addf %611, %614 : vector<16x128xf32>
    %c134 = arith.constant 134 : index
    %616 = memref.load %arg4[%c134] : memref<256xf32, #tpu.memory_space<smem>>
    %617 = vector.broadcast %616 : f32 to vector<16x128xf32>
    %618 = arith.mulf %122, %617 : vector<16x128xf32>
    %619 = arith.addf %615, %618 : vector<16x128xf32>
    %c150 = arith.constant 150 : index
    %620 = memref.load %arg4[%c150] : memref<256xf32, #tpu.memory_space<smem>>
    %621 = vector.broadcast %620 : f32 to vector<16x128xf32>
    %622 = arith.mulf %128, %621 : vector<16x128xf32>
    %623 = arith.addf %619, %622 : vector<16x128xf32>
    %c166 = arith.constant 166 : index
    %624 = memref.load %arg4[%c166] : memref<256xf32, #tpu.memory_space<smem>>
    %625 = vector.broadcast %624 : f32 to vector<16x128xf32>
    %626 = arith.mulf %134, %625 : vector<16x128xf32>
    %627 = arith.addf %623, %626 : vector<16x128xf32>
    %c182 = arith.constant 182 : index
    %628 = memref.load %arg4[%c182] : memref<256xf32, #tpu.memory_space<smem>>
    %629 = vector.broadcast %628 : f32 to vector<16x128xf32>
    %630 = arith.mulf %140, %629 : vector<16x128xf32>
    %631 = arith.addf %627, %630 : vector<16x128xf32>
    %c198 = arith.constant 198 : index
    %632 = memref.load %arg4[%c198] : memref<256xf32, #tpu.memory_space<smem>>
    %633 = vector.broadcast %632 : f32 to vector<16x128xf32>
    %634 = arith.mulf %146, %633 : vector<16x128xf32>
    %635 = arith.addf %631, %634 : vector<16x128xf32>
    %c214 = arith.constant 214 : index
    %636 = memref.load %arg4[%c214] : memref<256xf32, #tpu.memory_space<smem>>
    %637 = vector.broadcast %636 : f32 to vector<16x128xf32>
    %638 = arith.mulf %152, %637 : vector<16x128xf32>
    %639 = arith.addf %635, %638 : vector<16x128xf32>
    %c230 = arith.constant 230 : index
    %640 = memref.load %arg4[%c230] : memref<256xf32, #tpu.memory_space<smem>>
    %641 = vector.broadcast %640 : f32 to vector<16x128xf32>
    %642 = arith.mulf %158, %641 : vector<16x128xf32>
    %643 = arith.addf %639, %642 : vector<16x128xf32>
    %c246 = arith.constant 246 : index
    %644 = memref.load %arg4[%c246] : memref<256xf32, #tpu.memory_space<smem>>
    %645 = vector.broadcast %644 : f32 to vector<16x128xf32>
    %646 = arith.mulf %164, %645 : vector<16x128xf32>
    %647 = arith.addf %643, %646 : vector<16x128xf32>
    %cst_78 = arith.constant 0.000000e+00 : f32
    %648 = vector.broadcast %cst_78 : f32 to vector<16x128xf32>
    %649 = arith.maximumf %647, %648 : vector<16x128xf32>
    %650 = vector.broadcast %54 : f32 to vector<16x128xf32>
    %651 = arith.mulf %649, %650 : vector<16x128xf32>
    %652 = arith.addf %512, %651 : vector<16x128xf32>
    %c7_79 = arith.constant 7 : index
    %653 = memref.load %arg4[%c7_79] : memref<256xf32, #tpu.memory_space<smem>>
    %654 = vector.broadcast %653 : f32 to vector<16x128xf32>
    %655 = arith.mulf %74, %654 : vector<16x128xf32>
    %656 = vector.broadcast %39 : f32 to vector<16x128xf32>
    %657 = arith.addf %655, %656 : vector<16x128xf32>
    %c23 = arith.constant 23 : index
    %658 = memref.load %arg4[%c23] : memref<256xf32, #tpu.memory_space<smem>>
    %659 = vector.broadcast %658 : f32 to vector<16x128xf32>
    %660 = arith.mulf %80, %659 : vector<16x128xf32>
    %661 = arith.addf %657, %660 : vector<16x128xf32>
    %c39 = arith.constant 39 : index
    %662 = memref.load %arg4[%c39] : memref<256xf32, #tpu.memory_space<smem>>
    %663 = vector.broadcast %662 : f32 to vector<16x128xf32>
    %664 = arith.mulf %86, %663 : vector<16x128xf32>
    %665 = arith.addf %661, %664 : vector<16x128xf32>
    %c55 = arith.constant 55 : index
    %666 = memref.load %arg4[%c55] : memref<256xf32, #tpu.memory_space<smem>>
    %667 = vector.broadcast %666 : f32 to vector<16x128xf32>
    %668 = arith.mulf %92, %667 : vector<16x128xf32>
    %669 = arith.addf %665, %668 : vector<16x128xf32>
    %c71 = arith.constant 71 : index
    %670 = memref.load %arg4[%c71] : memref<256xf32, #tpu.memory_space<smem>>
    %671 = vector.broadcast %670 : f32 to vector<16x128xf32>
    %672 = arith.mulf %98, %671 : vector<16x128xf32>
    %673 = arith.addf %669, %672 : vector<16x128xf32>
    %c87 = arith.constant 87 : index
    %674 = memref.load %arg4[%c87] : memref<256xf32, #tpu.memory_space<smem>>
    %675 = vector.broadcast %674 : f32 to vector<16x128xf32>
    %676 = arith.mulf %104, %675 : vector<16x128xf32>
    %677 = arith.addf %673, %676 : vector<16x128xf32>
    %c103 = arith.constant 103 : index
    %678 = memref.load %arg4[%c103] : memref<256xf32, #tpu.memory_space<smem>>
    %679 = vector.broadcast %678 : f32 to vector<16x128xf32>
    %680 = arith.mulf %110, %679 : vector<16x128xf32>
    %681 = arith.addf %677, %680 : vector<16x128xf32>
    %c119 = arith.constant 119 : index
    %682 = memref.load %arg4[%c119] : memref<256xf32, #tpu.memory_space<smem>>
    %683 = vector.broadcast %682 : f32 to vector<16x128xf32>
    %684 = arith.mulf %116, %683 : vector<16x128xf32>
    %685 = arith.addf %681, %684 : vector<16x128xf32>
    %c135 = arith.constant 135 : index
    %686 = memref.load %arg4[%c135] : memref<256xf32, #tpu.memory_space<smem>>
    %687 = vector.broadcast %686 : f32 to vector<16x128xf32>
    %688 = arith.mulf %122, %687 : vector<16x128xf32>
    %689 = arith.addf %685, %688 : vector<16x128xf32>
    %c151 = arith.constant 151 : index
    %690 = memref.load %arg4[%c151] : memref<256xf32, #tpu.memory_space<smem>>
    %691 = vector.broadcast %690 : f32 to vector<16x128xf32>
    %692 = arith.mulf %128, %691 : vector<16x128xf32>
    %693 = arith.addf %689, %692 : vector<16x128xf32>
    %c167 = arith.constant 167 : index
    %694 = memref.load %arg4[%c167] : memref<256xf32, #tpu.memory_space<smem>>
    %695 = vector.broadcast %694 : f32 to vector<16x128xf32>
    %696 = arith.mulf %134, %695 : vector<16x128xf32>
    %697 = arith.addf %693, %696 : vector<16x128xf32>
    %c183 = arith.constant 183 : index
    %698 = memref.load %arg4[%c183] : memref<256xf32, #tpu.memory_space<smem>>
    %699 = vector.broadcast %698 : f32 to vector<16x128xf32>
    %700 = arith.mulf %140, %699 : vector<16x128xf32>
    %701 = arith.addf %697, %700 : vector<16x128xf32>
    %c199 = arith.constant 199 : index
    %702 = memref.load %arg4[%c199] : memref<256xf32, #tpu.memory_space<smem>>
    %703 = vector.broadcast %702 : f32 to vector<16x128xf32>
    %704 = arith.mulf %146, %703 : vector<16x128xf32>
    %705 = arith.addf %701, %704 : vector<16x128xf32>
    %c215 = arith.constant 215 : index
    %706 = memref.load %arg4[%c215] : memref<256xf32, #tpu.memory_space<smem>>
    %707 = vector.broadcast %706 : f32 to vector<16x128xf32>
    %708 = arith.mulf %152, %707 : vector<16x128xf32>
    %709 = arith.addf %705, %708 : vector<16x128xf32>
    %c231 = arith.constant 231 : index
    %710 = memref.load %arg4[%c231] : memref<256xf32, #tpu.memory_space<smem>>
    %711 = vector.broadcast %710 : f32 to vector<16x128xf32>
    %712 = arith.mulf %158, %711 : vector<16x128xf32>
    %713 = arith.addf %709, %712 : vector<16x128xf32>
    %c247 = arith.constant 247 : index
    %714 = memref.load %arg4[%c247] : memref<256xf32, #tpu.memory_space<smem>>
    %715 = vector.broadcast %714 : f32 to vector<16x128xf32>
    %716 = arith.mulf %164, %715 : vector<16x128xf32>
    %717 = arith.addf %713, %716 : vector<16x128xf32>
    %cst_80 = arith.constant 0.000000e+00 : f32
    %718 = vector.broadcast %cst_80 : f32 to vector<16x128xf32>
    %719 = arith.maximumf %717, %718 : vector<16x128xf32>
    %720 = vector.broadcast %55 : f32 to vector<16x128xf32>
    %721 = arith.mulf %719, %720 : vector<16x128xf32>
    %722 = arith.addf %582, %721 : vector<16x128xf32>
    %c8_81 = arith.constant 8 : index
    %723 = memref.load %arg4[%c8_81] : memref<256xf32, #tpu.memory_space<smem>>
    %724 = vector.broadcast %723 : f32 to vector<16x128xf32>
    %725 = arith.mulf %74, %724 : vector<16x128xf32>
    %726 = vector.broadcast %40 : f32 to vector<16x128xf32>
    %727 = arith.addf %725, %726 : vector<16x128xf32>
    %c24 = arith.constant 24 : index
    %728 = memref.load %arg4[%c24] : memref<256xf32, #tpu.memory_space<smem>>
    %729 = vector.broadcast %728 : f32 to vector<16x128xf32>
    %730 = arith.mulf %80, %729 : vector<16x128xf32>
    %731 = arith.addf %727, %730 : vector<16x128xf32>
    %c40 = arith.constant 40 : index
    %732 = memref.load %arg4[%c40] : memref<256xf32, #tpu.memory_space<smem>>
    %733 = vector.broadcast %732 : f32 to vector<16x128xf32>
    %734 = arith.mulf %86, %733 : vector<16x128xf32>
    %735 = arith.addf %731, %734 : vector<16x128xf32>
    %c56 = arith.constant 56 : index
    %736 = memref.load %arg4[%c56] : memref<256xf32, #tpu.memory_space<smem>>
    %737 = vector.broadcast %736 : f32 to vector<16x128xf32>
    %738 = arith.mulf %92, %737 : vector<16x128xf32>
    %739 = arith.addf %735, %738 : vector<16x128xf32>
    %c72 = arith.constant 72 : index
    %740 = memref.load %arg4[%c72] : memref<256xf32, #tpu.memory_space<smem>>
    %741 = vector.broadcast %740 : f32 to vector<16x128xf32>
    %742 = arith.mulf %98, %741 : vector<16x128xf32>
    %743 = arith.addf %739, %742 : vector<16x128xf32>
    %c88 = arith.constant 88 : index
    %744 = memref.load %arg4[%c88] : memref<256xf32, #tpu.memory_space<smem>>
    %745 = vector.broadcast %744 : f32 to vector<16x128xf32>
    %746 = arith.mulf %104, %745 : vector<16x128xf32>
    %747 = arith.addf %743, %746 : vector<16x128xf32>
    %c104 = arith.constant 104 : index
    %748 = memref.load %arg4[%c104] : memref<256xf32, #tpu.memory_space<smem>>
    %749 = vector.broadcast %748 : f32 to vector<16x128xf32>
    %750 = arith.mulf %110, %749 : vector<16x128xf32>
    %751 = arith.addf %747, %750 : vector<16x128xf32>
    %c120 = arith.constant 120 : index
    %752 = memref.load %arg4[%c120] : memref<256xf32, #tpu.memory_space<smem>>
    %753 = vector.broadcast %752 : f32 to vector<16x128xf32>
    %754 = arith.mulf %116, %753 : vector<16x128xf32>
    %755 = arith.addf %751, %754 : vector<16x128xf32>
    %c136 = arith.constant 136 : index
    %756 = memref.load %arg4[%c136] : memref<256xf32, #tpu.memory_space<smem>>
    %757 = vector.broadcast %756 : f32 to vector<16x128xf32>
    %758 = arith.mulf %122, %757 : vector<16x128xf32>
    %759 = arith.addf %755, %758 : vector<16x128xf32>
    %c152 = arith.constant 152 : index
    %760 = memref.load %arg4[%c152] : memref<256xf32, #tpu.memory_space<smem>>
    %761 = vector.broadcast %760 : f32 to vector<16x128xf32>
    %762 = arith.mulf %128, %761 : vector<16x128xf32>
    %763 = arith.addf %759, %762 : vector<16x128xf32>
    %c168 = arith.constant 168 : index
    %764 = memref.load %arg4[%c168] : memref<256xf32, #tpu.memory_space<smem>>
    %765 = vector.broadcast %764 : f32 to vector<16x128xf32>
    %766 = arith.mulf %134, %765 : vector<16x128xf32>
    %767 = arith.addf %763, %766 : vector<16x128xf32>
    %c184 = arith.constant 184 : index
    %768 = memref.load %arg4[%c184] : memref<256xf32, #tpu.memory_space<smem>>
    %769 = vector.broadcast %768 : f32 to vector<16x128xf32>
    %770 = arith.mulf %140, %769 : vector<16x128xf32>
    %771 = arith.addf %767, %770 : vector<16x128xf32>
    %c200 = arith.constant 200 : index
    %772 = memref.load %arg4[%c200] : memref<256xf32, #tpu.memory_space<smem>>
    %773 = vector.broadcast %772 : f32 to vector<16x128xf32>
    %774 = arith.mulf %146, %773 : vector<16x128xf32>
    %775 = arith.addf %771, %774 : vector<16x128xf32>
    %c216 = arith.constant 216 : index
    %776 = memref.load %arg4[%c216] : memref<256xf32, #tpu.memory_space<smem>>
    %777 = vector.broadcast %776 : f32 to vector<16x128xf32>
    %778 = arith.mulf %152, %777 : vector<16x128xf32>
    %779 = arith.addf %775, %778 : vector<16x128xf32>
    %c232 = arith.constant 232 : index
    %780 = memref.load %arg4[%c232] : memref<256xf32, #tpu.memory_space<smem>>
    %781 = vector.broadcast %780 : f32 to vector<16x128xf32>
    %782 = arith.mulf %158, %781 : vector<16x128xf32>
    %783 = arith.addf %779, %782 : vector<16x128xf32>
    %c248 = arith.constant 248 : index
    %784 = memref.load %arg4[%c248] : memref<256xf32, #tpu.memory_space<smem>>
    %785 = vector.broadcast %784 : f32 to vector<16x128xf32>
    %786 = arith.mulf %164, %785 : vector<16x128xf32>
    %787 = arith.addf %783, %786 : vector<16x128xf32>
    %cst_82 = arith.constant 0.000000e+00 : f32
    %788 = vector.broadcast %cst_82 : f32 to vector<16x128xf32>
    %789 = arith.maximumf %787, %788 : vector<16x128xf32>
    %790 = vector.broadcast %56 : f32 to vector<16x128xf32>
    %791 = arith.mulf %789, %790 : vector<16x128xf32>
    %792 = arith.addf %652, %791 : vector<16x128xf32>
    %c9_83 = arith.constant 9 : index
    %793 = memref.load %arg4[%c9_83] : memref<256xf32, #tpu.memory_space<smem>>
    %794 = vector.broadcast %793 : f32 to vector<16x128xf32>
    %795 = arith.mulf %74, %794 : vector<16x128xf32>
    %796 = vector.broadcast %41 : f32 to vector<16x128xf32>
    %797 = arith.addf %795, %796 : vector<16x128xf32>
    %c25 = arith.constant 25 : index
    %798 = memref.load %arg4[%c25] : memref<256xf32, #tpu.memory_space<smem>>
    %799 = vector.broadcast %798 : f32 to vector<16x128xf32>
    %800 = arith.mulf %80, %799 : vector<16x128xf32>
    %801 = arith.addf %797, %800 : vector<16x128xf32>
    %c41 = arith.constant 41 : index
    %802 = memref.load %arg4[%c41] : memref<256xf32, #tpu.memory_space<smem>>
    %803 = vector.broadcast %802 : f32 to vector<16x128xf32>
    %804 = arith.mulf %86, %803 : vector<16x128xf32>
    %805 = arith.addf %801, %804 : vector<16x128xf32>
    %c57 = arith.constant 57 : index
    %806 = memref.load %arg4[%c57] : memref<256xf32, #tpu.memory_space<smem>>
    %807 = vector.broadcast %806 : f32 to vector<16x128xf32>
    %808 = arith.mulf %92, %807 : vector<16x128xf32>
    %809 = arith.addf %805, %808 : vector<16x128xf32>
    %c73 = arith.constant 73 : index
    %810 = memref.load %arg4[%c73] : memref<256xf32, #tpu.memory_space<smem>>
    %811 = vector.broadcast %810 : f32 to vector<16x128xf32>
    %812 = arith.mulf %98, %811 : vector<16x128xf32>
    %813 = arith.addf %809, %812 : vector<16x128xf32>
    %c89 = arith.constant 89 : index
    %814 = memref.load %arg4[%c89] : memref<256xf32, #tpu.memory_space<smem>>
    %815 = vector.broadcast %814 : f32 to vector<16x128xf32>
    %816 = arith.mulf %104, %815 : vector<16x128xf32>
    %817 = arith.addf %813, %816 : vector<16x128xf32>
    %c105 = arith.constant 105 : index
    %818 = memref.load %arg4[%c105] : memref<256xf32, #tpu.memory_space<smem>>
    %819 = vector.broadcast %818 : f32 to vector<16x128xf32>
    %820 = arith.mulf %110, %819 : vector<16x128xf32>
    %821 = arith.addf %817, %820 : vector<16x128xf32>
    %c121 = arith.constant 121 : index
    %822 = memref.load %arg4[%c121] : memref<256xf32, #tpu.memory_space<smem>>
    %823 = vector.broadcast %822 : f32 to vector<16x128xf32>
    %824 = arith.mulf %116, %823 : vector<16x128xf32>
    %825 = arith.addf %821, %824 : vector<16x128xf32>
    %c137 = arith.constant 137 : index
    %826 = memref.load %arg4[%c137] : memref<256xf32, #tpu.memory_space<smem>>
    %827 = vector.broadcast %826 : f32 to vector<16x128xf32>
    %828 = arith.mulf %122, %827 : vector<16x128xf32>
    %829 = arith.addf %825, %828 : vector<16x128xf32>
    %c153 = arith.constant 153 : index
    %830 = memref.load %arg4[%c153] : memref<256xf32, #tpu.memory_space<smem>>
    %831 = vector.broadcast %830 : f32 to vector<16x128xf32>
    %832 = arith.mulf %128, %831 : vector<16x128xf32>
    %833 = arith.addf %829, %832 : vector<16x128xf32>
    %c169 = arith.constant 169 : index
    %834 = memref.load %arg4[%c169] : memref<256xf32, #tpu.memory_space<smem>>
    %835 = vector.broadcast %834 : f32 to vector<16x128xf32>
    %836 = arith.mulf %134, %835 : vector<16x128xf32>
    %837 = arith.addf %833, %836 : vector<16x128xf32>
    %c185 = arith.constant 185 : index
    %838 = memref.load %arg4[%c185] : memref<256xf32, #tpu.memory_space<smem>>
    %839 = vector.broadcast %838 : f32 to vector<16x128xf32>
    %840 = arith.mulf %140, %839 : vector<16x128xf32>
    %841 = arith.addf %837, %840 : vector<16x128xf32>
    %c201 = arith.constant 201 : index
    %842 = memref.load %arg4[%c201] : memref<256xf32, #tpu.memory_space<smem>>
    %843 = vector.broadcast %842 : f32 to vector<16x128xf32>
    %844 = arith.mulf %146, %843 : vector<16x128xf32>
    %845 = arith.addf %841, %844 : vector<16x128xf32>
    %c217 = arith.constant 217 : index
    %846 = memref.load %arg4[%c217] : memref<256xf32, #tpu.memory_space<smem>>
    %847 = vector.broadcast %846 : f32 to vector<16x128xf32>
    %848 = arith.mulf %152, %847 : vector<16x128xf32>
    %849 = arith.addf %845, %848 : vector<16x128xf32>
    %c233 = arith.constant 233 : index
    %850 = memref.load %arg4[%c233] : memref<256xf32, #tpu.memory_space<smem>>
    %851 = vector.broadcast %850 : f32 to vector<16x128xf32>
    %852 = arith.mulf %158, %851 : vector<16x128xf32>
    %853 = arith.addf %849, %852 : vector<16x128xf32>
    %c249 = arith.constant 249 : index
    %854 = memref.load %arg4[%c249] : memref<256xf32, #tpu.memory_space<smem>>
    %855 = vector.broadcast %854 : f32 to vector<16x128xf32>
    %856 = arith.mulf %164, %855 : vector<16x128xf32>
    %857 = arith.addf %853, %856 : vector<16x128xf32>
    %cst_84 = arith.constant 0.000000e+00 : f32
    %858 = vector.broadcast %cst_84 : f32 to vector<16x128xf32>
    %859 = arith.maximumf %857, %858 : vector<16x128xf32>
    %860 = vector.broadcast %57 : f32 to vector<16x128xf32>
    %861 = arith.mulf %859, %860 : vector<16x128xf32>
    %862 = arith.addf %722, %861 : vector<16x128xf32>
    %c10_85 = arith.constant 10 : index
    %863 = memref.load %arg4[%c10_85] : memref<256xf32, #tpu.memory_space<smem>>
    %864 = vector.broadcast %863 : f32 to vector<16x128xf32>
    %865 = arith.mulf %74, %864 : vector<16x128xf32>
    %866 = vector.broadcast %42 : f32 to vector<16x128xf32>
    %867 = arith.addf %865, %866 : vector<16x128xf32>
    %c26 = arith.constant 26 : index
    %868 = memref.load %arg4[%c26] : memref<256xf32, #tpu.memory_space<smem>>
    %869 = vector.broadcast %868 : f32 to vector<16x128xf32>
    %870 = arith.mulf %80, %869 : vector<16x128xf32>
    %871 = arith.addf %867, %870 : vector<16x128xf32>
    %c42 = arith.constant 42 : index
    %872 = memref.load %arg4[%c42] : memref<256xf32, #tpu.memory_space<smem>>
    %873 = vector.broadcast %872 : f32 to vector<16x128xf32>
    %874 = arith.mulf %86, %873 : vector<16x128xf32>
    %875 = arith.addf %871, %874 : vector<16x128xf32>
    %c58 = arith.constant 58 : index
    %876 = memref.load %arg4[%c58] : memref<256xf32, #tpu.memory_space<smem>>
    %877 = vector.broadcast %876 : f32 to vector<16x128xf32>
    %878 = arith.mulf %92, %877 : vector<16x128xf32>
    %879 = arith.addf %875, %878 : vector<16x128xf32>
    %c74 = arith.constant 74 : index
    %880 = memref.load %arg4[%c74] : memref<256xf32, #tpu.memory_space<smem>>
    %881 = vector.broadcast %880 : f32 to vector<16x128xf32>
    %882 = arith.mulf %98, %881 : vector<16x128xf32>
    %883 = arith.addf %879, %882 : vector<16x128xf32>
    %c90 = arith.constant 90 : index
    %884 = memref.load %arg4[%c90] : memref<256xf32, #tpu.memory_space<smem>>
    %885 = vector.broadcast %884 : f32 to vector<16x128xf32>
    %886 = arith.mulf %104, %885 : vector<16x128xf32>
    %887 = arith.addf %883, %886 : vector<16x128xf32>
    %c106 = arith.constant 106 : index
    %888 = memref.load %arg4[%c106] : memref<256xf32, #tpu.memory_space<smem>>
    %889 = vector.broadcast %888 : f32 to vector<16x128xf32>
    %890 = arith.mulf %110, %889 : vector<16x128xf32>
    %891 = arith.addf %887, %890 : vector<16x128xf32>
    %c122 = arith.constant 122 : index
    %892 = memref.load %arg4[%c122] : memref<256xf32, #tpu.memory_space<smem>>
    %893 = vector.broadcast %892 : f32 to vector<16x128xf32>
    %894 = arith.mulf %116, %893 : vector<16x128xf32>
    %895 = arith.addf %891, %894 : vector<16x128xf32>
    %c138 = arith.constant 138 : index
    %896 = memref.load %arg4[%c138] : memref<256xf32, #tpu.memory_space<smem>>
    %897 = vector.broadcast %896 : f32 to vector<16x128xf32>
    %898 = arith.mulf %122, %897 : vector<16x128xf32>
    %899 = arith.addf %895, %898 : vector<16x128xf32>
    %c154 = arith.constant 154 : index
    %900 = memref.load %arg4[%c154] : memref<256xf32, #tpu.memory_space<smem>>
    %901 = vector.broadcast %900 : f32 to vector<16x128xf32>
    %902 = arith.mulf %128, %901 : vector<16x128xf32>
    %903 = arith.addf %899, %902 : vector<16x128xf32>
    %c170 = arith.constant 170 : index
    %904 = memref.load %arg4[%c170] : memref<256xf32, #tpu.memory_space<smem>>
    %905 = vector.broadcast %904 : f32 to vector<16x128xf32>
    %906 = arith.mulf %134, %905 : vector<16x128xf32>
    %907 = arith.addf %903, %906 : vector<16x128xf32>
    %c186 = arith.constant 186 : index
    %908 = memref.load %arg4[%c186] : memref<256xf32, #tpu.memory_space<smem>>
    %909 = vector.broadcast %908 : f32 to vector<16x128xf32>
    %910 = arith.mulf %140, %909 : vector<16x128xf32>
    %911 = arith.addf %907, %910 : vector<16x128xf32>
    %c202 = arith.constant 202 : index
    %912 = memref.load %arg4[%c202] : memref<256xf32, #tpu.memory_space<smem>>
    %913 = vector.broadcast %912 : f32 to vector<16x128xf32>
    %914 = arith.mulf %146, %913 : vector<16x128xf32>
    %915 = arith.addf %911, %914 : vector<16x128xf32>
    %c218 = arith.constant 218 : index
    %916 = memref.load %arg4[%c218] : memref<256xf32, #tpu.memory_space<smem>>
    %917 = vector.broadcast %916 : f32 to vector<16x128xf32>
    %918 = arith.mulf %152, %917 : vector<16x128xf32>
    %919 = arith.addf %915, %918 : vector<16x128xf32>
    %c234 = arith.constant 234 : index
    %920 = memref.load %arg4[%c234] : memref<256xf32, #tpu.memory_space<smem>>
    %921 = vector.broadcast %920 : f32 to vector<16x128xf32>
    %922 = arith.mulf %158, %921 : vector<16x128xf32>
    %923 = arith.addf %919, %922 : vector<16x128xf32>
    %c250 = arith.constant 250 : index
    %924 = memref.load %arg4[%c250] : memref<256xf32, #tpu.memory_space<smem>>
    %925 = vector.broadcast %924 : f32 to vector<16x128xf32>
    %926 = arith.mulf %164, %925 : vector<16x128xf32>
    %927 = arith.addf %923, %926 : vector<16x128xf32>
    %cst_86 = arith.constant 0.000000e+00 : f32
    %928 = vector.broadcast %cst_86 : f32 to vector<16x128xf32>
    %929 = arith.maximumf %927, %928 : vector<16x128xf32>
    %930 = vector.broadcast %58 : f32 to vector<16x128xf32>
    %931 = arith.mulf %929, %930 : vector<16x128xf32>
    %932 = arith.addf %792, %931 : vector<16x128xf32>
    %c11_87 = arith.constant 11 : index
    %933 = memref.load %arg4[%c11_87] : memref<256xf32, #tpu.memory_space<smem>>
    %934 = vector.broadcast %933 : f32 to vector<16x128xf32>
    %935 = arith.mulf %74, %934 : vector<16x128xf32>
    %936 = vector.broadcast %43 : f32 to vector<16x128xf32>
    %937 = arith.addf %935, %936 : vector<16x128xf32>
    %c27 = arith.constant 27 : index
    %938 = memref.load %arg4[%c27] : memref<256xf32, #tpu.memory_space<smem>>
    %939 = vector.broadcast %938 : f32 to vector<16x128xf32>
    %940 = arith.mulf %80, %939 : vector<16x128xf32>
    %941 = arith.addf %937, %940 : vector<16x128xf32>
    %c43 = arith.constant 43 : index
    %942 = memref.load %arg4[%c43] : memref<256xf32, #tpu.memory_space<smem>>
    %943 = vector.broadcast %942 : f32 to vector<16x128xf32>
    %944 = arith.mulf %86, %943 : vector<16x128xf32>
    %945 = arith.addf %941, %944 : vector<16x128xf32>
    %c59 = arith.constant 59 : index
    %946 = memref.load %arg4[%c59] : memref<256xf32, #tpu.memory_space<smem>>
    %947 = vector.broadcast %946 : f32 to vector<16x128xf32>
    %948 = arith.mulf %92, %947 : vector<16x128xf32>
    %949 = arith.addf %945, %948 : vector<16x128xf32>
    %c75 = arith.constant 75 : index
    %950 = memref.load %arg4[%c75] : memref<256xf32, #tpu.memory_space<smem>>
    %951 = vector.broadcast %950 : f32 to vector<16x128xf32>
    %952 = arith.mulf %98, %951 : vector<16x128xf32>
    %953 = arith.addf %949, %952 : vector<16x128xf32>
    %c91 = arith.constant 91 : index
    %954 = memref.load %arg4[%c91] : memref<256xf32, #tpu.memory_space<smem>>
    %955 = vector.broadcast %954 : f32 to vector<16x128xf32>
    %956 = arith.mulf %104, %955 : vector<16x128xf32>
    %957 = arith.addf %953, %956 : vector<16x128xf32>
    %c107 = arith.constant 107 : index
    %958 = memref.load %arg4[%c107] : memref<256xf32, #tpu.memory_space<smem>>
    %959 = vector.broadcast %958 : f32 to vector<16x128xf32>
    %960 = arith.mulf %110, %959 : vector<16x128xf32>
    %961 = arith.addf %957, %960 : vector<16x128xf32>
    %c123 = arith.constant 123 : index
    %962 = memref.load %arg4[%c123] : memref<256xf32, #tpu.memory_space<smem>>
    %963 = vector.broadcast %962 : f32 to vector<16x128xf32>
    %964 = arith.mulf %116, %963 : vector<16x128xf32>
    %965 = arith.addf %961, %964 : vector<16x128xf32>
    %c139 = arith.constant 139 : index
    %966 = memref.load %arg4[%c139] : memref<256xf32, #tpu.memory_space<smem>>
    %967 = vector.broadcast %966 : f32 to vector<16x128xf32>
    %968 = arith.mulf %122, %967 : vector<16x128xf32>
    %969 = arith.addf %965, %968 : vector<16x128xf32>
    %c155 = arith.constant 155 : index
    %970 = memref.load %arg4[%c155] : memref<256xf32, #tpu.memory_space<smem>>
    %971 = vector.broadcast %970 : f32 to vector<16x128xf32>
    %972 = arith.mulf %128, %971 : vector<16x128xf32>
    %973 = arith.addf %969, %972 : vector<16x128xf32>
    %c171 = arith.constant 171 : index
    %974 = memref.load %arg4[%c171] : memref<256xf32, #tpu.memory_space<smem>>
    %975 = vector.broadcast %974 : f32 to vector<16x128xf32>
    %976 = arith.mulf %134, %975 : vector<16x128xf32>
    %977 = arith.addf %973, %976 : vector<16x128xf32>
    %c187 = arith.constant 187 : index
    %978 = memref.load %arg4[%c187] : memref<256xf32, #tpu.memory_space<smem>>
    %979 = vector.broadcast %978 : f32 to vector<16x128xf32>
    %980 = arith.mulf %140, %979 : vector<16x128xf32>
    %981 = arith.addf %977, %980 : vector<16x128xf32>
    %c203 = arith.constant 203 : index
    %982 = memref.load %arg4[%c203] : memref<256xf32, #tpu.memory_space<smem>>
    %983 = vector.broadcast %982 : f32 to vector<16x128xf32>
    %984 = arith.mulf %146, %983 : vector<16x128xf32>
    %985 = arith.addf %981, %984 : vector<16x128xf32>
    %c219 = arith.constant 219 : index
    %986 = memref.load %arg4[%c219] : memref<256xf32, #tpu.memory_space<smem>>
    %987 = vector.broadcast %986 : f32 to vector<16x128xf32>
    %988 = arith.mulf %152, %987 : vector<16x128xf32>
    %989 = arith.addf %985, %988 : vector<16x128xf32>
    %c235 = arith.constant 235 : index
    %990 = memref.load %arg4[%c235] : memref<256xf32, #tpu.memory_space<smem>>
    %991 = vector.broadcast %990 : f32 to vector<16x128xf32>
    %992 = arith.mulf %158, %991 : vector<16x128xf32>
    %993 = arith.addf %989, %992 : vector<16x128xf32>
    %c251 = arith.constant 251 : index
    %994 = memref.load %arg4[%c251] : memref<256xf32, #tpu.memory_space<smem>>
    %995 = vector.broadcast %994 : f32 to vector<16x128xf32>
    %996 = arith.mulf %164, %995 : vector<16x128xf32>
    %997 = arith.addf %993, %996 : vector<16x128xf32>
    %cst_88 = arith.constant 0.000000e+00 : f32
    %998 = vector.broadcast %cst_88 : f32 to vector<16x128xf32>
    %999 = arith.maximumf %997, %998 : vector<16x128xf32>
    %1000 = vector.broadcast %59 : f32 to vector<16x128xf32>
    %1001 = arith.mulf %999, %1000 : vector<16x128xf32>
    %1002 = arith.addf %862, %1001 : vector<16x128xf32>
    %c12_89 = arith.constant 12 : index
    %1003 = memref.load %arg4[%c12_89] : memref<256xf32, #tpu.memory_space<smem>>
    %1004 = vector.broadcast %1003 : f32 to vector<16x128xf32>
    %1005 = arith.mulf %74, %1004 : vector<16x128xf32>
    %1006 = vector.broadcast %44 : f32 to vector<16x128xf32>
    %1007 = arith.addf %1005, %1006 : vector<16x128xf32>
    %c28 = arith.constant 28 : index
    %1008 = memref.load %arg4[%c28] : memref<256xf32, #tpu.memory_space<smem>>
    %1009 = vector.broadcast %1008 : f32 to vector<16x128xf32>
    %1010 = arith.mulf %80, %1009 : vector<16x128xf32>
    %1011 = arith.addf %1007, %1010 : vector<16x128xf32>
    %c44 = arith.constant 44 : index
    %1012 = memref.load %arg4[%c44] : memref<256xf32, #tpu.memory_space<smem>>
    %1013 = vector.broadcast %1012 : f32 to vector<16x128xf32>
    %1014 = arith.mulf %86, %1013 : vector<16x128xf32>
    %1015 = arith.addf %1011, %1014 : vector<16x128xf32>
    %c60 = arith.constant 60 : index
    %1016 = memref.load %arg4[%c60] : memref<256xf32, #tpu.memory_space<smem>>
    %1017 = vector.broadcast %1016 : f32 to vector<16x128xf32>
    %1018 = arith.mulf %92, %1017 : vector<16x128xf32>
    %1019 = arith.addf %1015, %1018 : vector<16x128xf32>
    %c76 = arith.constant 76 : index
    %1020 = memref.load %arg4[%c76] : memref<256xf32, #tpu.memory_space<smem>>
    %1021 = vector.broadcast %1020 : f32 to vector<16x128xf32>
    %1022 = arith.mulf %98, %1021 : vector<16x128xf32>
    %1023 = arith.addf %1019, %1022 : vector<16x128xf32>
    %c92 = arith.constant 92 : index
    %1024 = memref.load %arg4[%c92] : memref<256xf32, #tpu.memory_space<smem>>
    %1025 = vector.broadcast %1024 : f32 to vector<16x128xf32>
    %1026 = arith.mulf %104, %1025 : vector<16x128xf32>
    %1027 = arith.addf %1023, %1026 : vector<16x128xf32>
    %c108 = arith.constant 108 : index
    %1028 = memref.load %arg4[%c108] : memref<256xf32, #tpu.memory_space<smem>>
    %1029 = vector.broadcast %1028 : f32 to vector<16x128xf32>
    %1030 = arith.mulf %110, %1029 : vector<16x128xf32>
    %1031 = arith.addf %1027, %1030 : vector<16x128xf32>
    %c124 = arith.constant 124 : index
    %1032 = memref.load %arg4[%c124] : memref<256xf32, #tpu.memory_space<smem>>
    %1033 = vector.broadcast %1032 : f32 to vector<16x128xf32>
    %1034 = arith.mulf %116, %1033 : vector<16x128xf32>
    %1035 = arith.addf %1031, %1034 : vector<16x128xf32>
    %c140 = arith.constant 140 : index
    %1036 = memref.load %arg4[%c140] : memref<256xf32, #tpu.memory_space<smem>>
    %1037 = vector.broadcast %1036 : f32 to vector<16x128xf32>
    %1038 = arith.mulf %122, %1037 : vector<16x128xf32>
    %1039 = arith.addf %1035, %1038 : vector<16x128xf32>
    %c156 = arith.constant 156 : index
    %1040 = memref.load %arg4[%c156] : memref<256xf32, #tpu.memory_space<smem>>
    %1041 = vector.broadcast %1040 : f32 to vector<16x128xf32>
    %1042 = arith.mulf %128, %1041 : vector<16x128xf32>
    %1043 = arith.addf %1039, %1042 : vector<16x128xf32>
    %c172 = arith.constant 172 : index
    %1044 = memref.load %arg4[%c172] : memref<256xf32, #tpu.memory_space<smem>>
    %1045 = vector.broadcast %1044 : f32 to vector<16x128xf32>
    %1046 = arith.mulf %134, %1045 : vector<16x128xf32>
    %1047 = arith.addf %1043, %1046 : vector<16x128xf32>
    %c188 = arith.constant 188 : index
    %1048 = memref.load %arg4[%c188] : memref<256xf32, #tpu.memory_space<smem>>
    %1049 = vector.broadcast %1048 : f32 to vector<16x128xf32>
    %1050 = arith.mulf %140, %1049 : vector<16x128xf32>
    %1051 = arith.addf %1047, %1050 : vector<16x128xf32>
    %c204 = arith.constant 204 : index
    %1052 = memref.load %arg4[%c204] : memref<256xf32, #tpu.memory_space<smem>>
    %1053 = vector.broadcast %1052 : f32 to vector<16x128xf32>
    %1054 = arith.mulf %146, %1053 : vector<16x128xf32>
    %1055 = arith.addf %1051, %1054 : vector<16x128xf32>
    %c220 = arith.constant 220 : index
    %1056 = memref.load %arg4[%c220] : memref<256xf32, #tpu.memory_space<smem>>
    %1057 = vector.broadcast %1056 : f32 to vector<16x128xf32>
    %1058 = arith.mulf %152, %1057 : vector<16x128xf32>
    %1059 = arith.addf %1055, %1058 : vector<16x128xf32>
    %c236 = arith.constant 236 : index
    %1060 = memref.load %arg4[%c236] : memref<256xf32, #tpu.memory_space<smem>>
    %1061 = vector.broadcast %1060 : f32 to vector<16x128xf32>
    %1062 = arith.mulf %158, %1061 : vector<16x128xf32>
    %1063 = arith.addf %1059, %1062 : vector<16x128xf32>
    %c252 = arith.constant 252 : index
    %1064 = memref.load %arg4[%c252] : memref<256xf32, #tpu.memory_space<smem>>
    %1065 = vector.broadcast %1064 : f32 to vector<16x128xf32>
    %1066 = arith.mulf %164, %1065 : vector<16x128xf32>
    %1067 = arith.addf %1063, %1066 : vector<16x128xf32>
    %cst_90 = arith.constant 0.000000e+00 : f32
    %1068 = vector.broadcast %cst_90 : f32 to vector<16x128xf32>
    %1069 = arith.maximumf %1067, %1068 : vector<16x128xf32>
    %1070 = vector.broadcast %60 : f32 to vector<16x128xf32>
    %1071 = arith.mulf %1069, %1070 : vector<16x128xf32>
    %1072 = arith.addf %932, %1071 : vector<16x128xf32>
    %c13_91 = arith.constant 13 : index
    %1073 = memref.load %arg4[%c13_91] : memref<256xf32, #tpu.memory_space<smem>>
    %1074 = vector.broadcast %1073 : f32 to vector<16x128xf32>
    %1075 = arith.mulf %74, %1074 : vector<16x128xf32>
    %1076 = vector.broadcast %45 : f32 to vector<16x128xf32>
    %1077 = arith.addf %1075, %1076 : vector<16x128xf32>
    %c29 = arith.constant 29 : index
    %1078 = memref.load %arg4[%c29] : memref<256xf32, #tpu.memory_space<smem>>
    %1079 = vector.broadcast %1078 : f32 to vector<16x128xf32>
    %1080 = arith.mulf %80, %1079 : vector<16x128xf32>
    %1081 = arith.addf %1077, %1080 : vector<16x128xf32>
    %c45 = arith.constant 45 : index
    %1082 = memref.load %arg4[%c45] : memref<256xf32, #tpu.memory_space<smem>>
    %1083 = vector.broadcast %1082 : f32 to vector<16x128xf32>
    %1084 = arith.mulf %86, %1083 : vector<16x128xf32>
    %1085 = arith.addf %1081, %1084 : vector<16x128xf32>
    %c61 = arith.constant 61 : index
    %1086 = memref.load %arg4[%c61] : memref<256xf32, #tpu.memory_space<smem>>
    %1087 = vector.broadcast %1086 : f32 to vector<16x128xf32>
    %1088 = arith.mulf %92, %1087 : vector<16x128xf32>
    %1089 = arith.addf %1085, %1088 : vector<16x128xf32>
    %c77 = arith.constant 77 : index
    %1090 = memref.load %arg4[%c77] : memref<256xf32, #tpu.memory_space<smem>>
    %1091 = vector.broadcast %1090 : f32 to vector<16x128xf32>
    %1092 = arith.mulf %98, %1091 : vector<16x128xf32>
    %1093 = arith.addf %1089, %1092 : vector<16x128xf32>
    %c93 = arith.constant 93 : index
    %1094 = memref.load %arg4[%c93] : memref<256xf32, #tpu.memory_space<smem>>
    %1095 = vector.broadcast %1094 : f32 to vector<16x128xf32>
    %1096 = arith.mulf %104, %1095 : vector<16x128xf32>
    %1097 = arith.addf %1093, %1096 : vector<16x128xf32>
    %c109 = arith.constant 109 : index
    %1098 = memref.load %arg4[%c109] : memref<256xf32, #tpu.memory_space<smem>>
    %1099 = vector.broadcast %1098 : f32 to vector<16x128xf32>
    %1100 = arith.mulf %110, %1099 : vector<16x128xf32>
    %1101 = arith.addf %1097, %1100 : vector<16x128xf32>
    %c125 = arith.constant 125 : index
    %1102 = memref.load %arg4[%c125] : memref<256xf32, #tpu.memory_space<smem>>
    %1103 = vector.broadcast %1102 : f32 to vector<16x128xf32>
    %1104 = arith.mulf %116, %1103 : vector<16x128xf32>
    %1105 = arith.addf %1101, %1104 : vector<16x128xf32>
    %c141 = arith.constant 141 : index
    %1106 = memref.load %arg4[%c141] : memref<256xf32, #tpu.memory_space<smem>>
    %1107 = vector.broadcast %1106 : f32 to vector<16x128xf32>
    %1108 = arith.mulf %122, %1107 : vector<16x128xf32>
    %1109 = arith.addf %1105, %1108 : vector<16x128xf32>
    %c157 = arith.constant 157 : index
    %1110 = memref.load %arg4[%c157] : memref<256xf32, #tpu.memory_space<smem>>
    %1111 = vector.broadcast %1110 : f32 to vector<16x128xf32>
    %1112 = arith.mulf %128, %1111 : vector<16x128xf32>
    %1113 = arith.addf %1109, %1112 : vector<16x128xf32>
    %c173 = arith.constant 173 : index
    %1114 = memref.load %arg4[%c173] : memref<256xf32, #tpu.memory_space<smem>>
    %1115 = vector.broadcast %1114 : f32 to vector<16x128xf32>
    %1116 = arith.mulf %134, %1115 : vector<16x128xf32>
    %1117 = arith.addf %1113, %1116 : vector<16x128xf32>
    %c189 = arith.constant 189 : index
    %1118 = memref.load %arg4[%c189] : memref<256xf32, #tpu.memory_space<smem>>
    %1119 = vector.broadcast %1118 : f32 to vector<16x128xf32>
    %1120 = arith.mulf %140, %1119 : vector<16x128xf32>
    %1121 = arith.addf %1117, %1120 : vector<16x128xf32>
    %c205 = arith.constant 205 : index
    %1122 = memref.load %arg4[%c205] : memref<256xf32, #tpu.memory_space<smem>>
    %1123 = vector.broadcast %1122 : f32 to vector<16x128xf32>
    %1124 = arith.mulf %146, %1123 : vector<16x128xf32>
    %1125 = arith.addf %1121, %1124 : vector<16x128xf32>
    %c221 = arith.constant 221 : index
    %1126 = memref.load %arg4[%c221] : memref<256xf32, #tpu.memory_space<smem>>
    %1127 = vector.broadcast %1126 : f32 to vector<16x128xf32>
    %1128 = arith.mulf %152, %1127 : vector<16x128xf32>
    %1129 = arith.addf %1125, %1128 : vector<16x128xf32>
    %c237 = arith.constant 237 : index
    %1130 = memref.load %arg4[%c237] : memref<256xf32, #tpu.memory_space<smem>>
    %1131 = vector.broadcast %1130 : f32 to vector<16x128xf32>
    %1132 = arith.mulf %158, %1131 : vector<16x128xf32>
    %1133 = arith.addf %1129, %1132 : vector<16x128xf32>
    %c253 = arith.constant 253 : index
    %1134 = memref.load %arg4[%c253] : memref<256xf32, #tpu.memory_space<smem>>
    %1135 = vector.broadcast %1134 : f32 to vector<16x128xf32>
    %1136 = arith.mulf %164, %1135 : vector<16x128xf32>
    %1137 = arith.addf %1133, %1136 : vector<16x128xf32>
    %cst_92 = arith.constant 0.000000e+00 : f32
    %1138 = vector.broadcast %cst_92 : f32 to vector<16x128xf32>
    %1139 = arith.maximumf %1137, %1138 : vector<16x128xf32>
    %1140 = vector.broadcast %61 : f32 to vector<16x128xf32>
    %1141 = arith.mulf %1139, %1140 : vector<16x128xf32>
    %1142 = arith.addf %1002, %1141 : vector<16x128xf32>
    %c14_93 = arith.constant 14 : index
    %1143 = memref.load %arg4[%c14_93] : memref<256xf32, #tpu.memory_space<smem>>
    %1144 = vector.broadcast %1143 : f32 to vector<16x128xf32>
    %1145 = arith.mulf %74, %1144 : vector<16x128xf32>
    %1146 = vector.broadcast %46 : f32 to vector<16x128xf32>
    %1147 = arith.addf %1145, %1146 : vector<16x128xf32>
    %c30 = arith.constant 30 : index
    %1148 = memref.load %arg4[%c30] : memref<256xf32, #tpu.memory_space<smem>>
    %1149 = vector.broadcast %1148 : f32 to vector<16x128xf32>
    %1150 = arith.mulf %80, %1149 : vector<16x128xf32>
    %1151 = arith.addf %1147, %1150 : vector<16x128xf32>
    %c46 = arith.constant 46 : index
    %1152 = memref.load %arg4[%c46] : memref<256xf32, #tpu.memory_space<smem>>
    %1153 = vector.broadcast %1152 : f32 to vector<16x128xf32>
    %1154 = arith.mulf %86, %1153 : vector<16x128xf32>
    %1155 = arith.addf %1151, %1154 : vector<16x128xf32>
    %c62 = arith.constant 62 : index
    %1156 = memref.load %arg4[%c62] : memref<256xf32, #tpu.memory_space<smem>>
    %1157 = vector.broadcast %1156 : f32 to vector<16x128xf32>
    %1158 = arith.mulf %92, %1157 : vector<16x128xf32>
    %1159 = arith.addf %1155, %1158 : vector<16x128xf32>
    %c78 = arith.constant 78 : index
    %1160 = memref.load %arg4[%c78] : memref<256xf32, #tpu.memory_space<smem>>
    %1161 = vector.broadcast %1160 : f32 to vector<16x128xf32>
    %1162 = arith.mulf %98, %1161 : vector<16x128xf32>
    %1163 = arith.addf %1159, %1162 : vector<16x128xf32>
    %c94 = arith.constant 94 : index
    %1164 = memref.load %arg4[%c94] : memref<256xf32, #tpu.memory_space<smem>>
    %1165 = vector.broadcast %1164 : f32 to vector<16x128xf32>
    %1166 = arith.mulf %104, %1165 : vector<16x128xf32>
    %1167 = arith.addf %1163, %1166 : vector<16x128xf32>
    %c110 = arith.constant 110 : index
    %1168 = memref.load %arg4[%c110] : memref<256xf32, #tpu.memory_space<smem>>
    %1169 = vector.broadcast %1168 : f32 to vector<16x128xf32>
    %1170 = arith.mulf %110, %1169 : vector<16x128xf32>
    %1171 = arith.addf %1167, %1170 : vector<16x128xf32>
    %c126 = arith.constant 126 : index
    %1172 = memref.load %arg4[%c126] : memref<256xf32, #tpu.memory_space<smem>>
    %1173 = vector.broadcast %1172 : f32 to vector<16x128xf32>
    %1174 = arith.mulf %116, %1173 : vector<16x128xf32>
    %1175 = arith.addf %1171, %1174 : vector<16x128xf32>
    %c142 = arith.constant 142 : index
    %1176 = memref.load %arg4[%c142] : memref<256xf32, #tpu.memory_space<smem>>
    %1177 = vector.broadcast %1176 : f32 to vector<16x128xf32>
    %1178 = arith.mulf %122, %1177 : vector<16x128xf32>
    %1179 = arith.addf %1175, %1178 : vector<16x128xf32>
    %c158 = arith.constant 158 : index
    %1180 = memref.load %arg4[%c158] : memref<256xf32, #tpu.memory_space<smem>>
    %1181 = vector.broadcast %1180 : f32 to vector<16x128xf32>
    %1182 = arith.mulf %128, %1181 : vector<16x128xf32>
    %1183 = arith.addf %1179, %1182 : vector<16x128xf32>
    %c174 = arith.constant 174 : index
    %1184 = memref.load %arg4[%c174] : memref<256xf32, #tpu.memory_space<smem>>
    %1185 = vector.broadcast %1184 : f32 to vector<16x128xf32>
    %1186 = arith.mulf %134, %1185 : vector<16x128xf32>
    %1187 = arith.addf %1183, %1186 : vector<16x128xf32>
    %c190 = arith.constant 190 : index
    %1188 = memref.load %arg4[%c190] : memref<256xf32, #tpu.memory_space<smem>>
    %1189 = vector.broadcast %1188 : f32 to vector<16x128xf32>
    %1190 = arith.mulf %140, %1189 : vector<16x128xf32>
    %1191 = arith.addf %1187, %1190 : vector<16x128xf32>
    %c206 = arith.constant 206 : index
    %1192 = memref.load %arg4[%c206] : memref<256xf32, #tpu.memory_space<smem>>
    %1193 = vector.broadcast %1192 : f32 to vector<16x128xf32>
    %1194 = arith.mulf %146, %1193 : vector<16x128xf32>
    %1195 = arith.addf %1191, %1194 : vector<16x128xf32>
    %c222 = arith.constant 222 : index
    %1196 = memref.load %arg4[%c222] : memref<256xf32, #tpu.memory_space<smem>>
    %1197 = vector.broadcast %1196 : f32 to vector<16x128xf32>
    %1198 = arith.mulf %152, %1197 : vector<16x128xf32>
    %1199 = arith.addf %1195, %1198 : vector<16x128xf32>
    %c238 = arith.constant 238 : index
    %1200 = memref.load %arg4[%c238] : memref<256xf32, #tpu.memory_space<smem>>
    %1201 = vector.broadcast %1200 : f32 to vector<16x128xf32>
    %1202 = arith.mulf %158, %1201 : vector<16x128xf32>
    %1203 = arith.addf %1199, %1202 : vector<16x128xf32>
    %c254 = arith.constant 254 : index
    %1204 = memref.load %arg4[%c254] : memref<256xf32, #tpu.memory_space<smem>>
    %1205 = vector.broadcast %1204 : f32 to vector<16x128xf32>
    %1206 = arith.mulf %164, %1205 : vector<16x128xf32>
    %1207 = arith.addf %1203, %1206 : vector<16x128xf32>
    %cst_94 = arith.constant 0.000000e+00 : f32
    %1208 = vector.broadcast %cst_94 : f32 to vector<16x128xf32>
    %1209 = arith.maximumf %1207, %1208 : vector<16x128xf32>
    %1210 = vector.broadcast %62 : f32 to vector<16x128xf32>
    %1211 = arith.mulf %1209, %1210 : vector<16x128xf32>
    %1212 = arith.addf %1072, %1211 : vector<16x128xf32>
    %c15_95 = arith.constant 15 : index
    %1213 = memref.load %arg4[%c15_95] : memref<256xf32, #tpu.memory_space<smem>>
    %1214 = vector.broadcast %1213 : f32 to vector<16x128xf32>
    %1215 = arith.mulf %74, %1214 : vector<16x128xf32>
    %1216 = vector.broadcast %47 : f32 to vector<16x128xf32>
    %1217 = arith.addf %1215, %1216 : vector<16x128xf32>
    %c31 = arith.constant 31 : index
    %1218 = memref.load %arg4[%c31] : memref<256xf32, #tpu.memory_space<smem>>
    %1219 = vector.broadcast %1218 : f32 to vector<16x128xf32>
    %1220 = arith.mulf %80, %1219 : vector<16x128xf32>
    %1221 = arith.addf %1217, %1220 : vector<16x128xf32>
    %c47 = arith.constant 47 : index
    %1222 = memref.load %arg4[%c47] : memref<256xf32, #tpu.memory_space<smem>>
    %1223 = vector.broadcast %1222 : f32 to vector<16x128xf32>
    %1224 = arith.mulf %86, %1223 : vector<16x128xf32>
    %1225 = arith.addf %1221, %1224 : vector<16x128xf32>
    %c63 = arith.constant 63 : index
    %1226 = memref.load %arg4[%c63] : memref<256xf32, #tpu.memory_space<smem>>
    %1227 = vector.broadcast %1226 : f32 to vector<16x128xf32>
    %1228 = arith.mulf %92, %1227 : vector<16x128xf32>
    %1229 = arith.addf %1225, %1228 : vector<16x128xf32>
    %c79 = arith.constant 79 : index
    %1230 = memref.load %arg4[%c79] : memref<256xf32, #tpu.memory_space<smem>>
    %1231 = vector.broadcast %1230 : f32 to vector<16x128xf32>
    %1232 = arith.mulf %98, %1231 : vector<16x128xf32>
    %1233 = arith.addf %1229, %1232 : vector<16x128xf32>
    %c95 = arith.constant 95 : index
    %1234 = memref.load %arg4[%c95] : memref<256xf32, #tpu.memory_space<smem>>
    %1235 = vector.broadcast %1234 : f32 to vector<16x128xf32>
    %1236 = arith.mulf %104, %1235 : vector<16x128xf32>
    %1237 = arith.addf %1233, %1236 : vector<16x128xf32>
    %c111 = arith.constant 111 : index
    %1238 = memref.load %arg4[%c111] : memref<256xf32, #tpu.memory_space<smem>>
    %1239 = vector.broadcast %1238 : f32 to vector<16x128xf32>
    %1240 = arith.mulf %110, %1239 : vector<16x128xf32>
    %1241 = arith.addf %1237, %1240 : vector<16x128xf32>
    %c127 = arith.constant 127 : index
    %1242 = memref.load %arg4[%c127] : memref<256xf32, #tpu.memory_space<smem>>
    %1243 = vector.broadcast %1242 : f32 to vector<16x128xf32>
    %1244 = arith.mulf %116, %1243 : vector<16x128xf32>
    %1245 = arith.addf %1241, %1244 : vector<16x128xf32>
    %c143 = arith.constant 143 : index
    %1246 = memref.load %arg4[%c143] : memref<256xf32, #tpu.memory_space<smem>>
    %1247 = vector.broadcast %1246 : f32 to vector<16x128xf32>
    %1248 = arith.mulf %122, %1247 : vector<16x128xf32>
    %1249 = arith.addf %1245, %1248 : vector<16x128xf32>
    %c159 = arith.constant 159 : index
    %1250 = memref.load %arg4[%c159] : memref<256xf32, #tpu.memory_space<smem>>
    %1251 = vector.broadcast %1250 : f32 to vector<16x128xf32>
    %1252 = arith.mulf %128, %1251 : vector<16x128xf32>
    %1253 = arith.addf %1249, %1252 : vector<16x128xf32>
    %c175 = arith.constant 175 : index
    %1254 = memref.load %arg4[%c175] : memref<256xf32, #tpu.memory_space<smem>>
    %1255 = vector.broadcast %1254 : f32 to vector<16x128xf32>
    %1256 = arith.mulf %134, %1255 : vector<16x128xf32>
    %1257 = arith.addf %1253, %1256 : vector<16x128xf32>
    %c191 = arith.constant 191 : index
    %1258 = memref.load %arg4[%c191] : memref<256xf32, #tpu.memory_space<smem>>
    %1259 = vector.broadcast %1258 : f32 to vector<16x128xf32>
    %1260 = arith.mulf %140, %1259 : vector<16x128xf32>
    %1261 = arith.addf %1257, %1260 : vector<16x128xf32>
    %c207 = arith.constant 207 : index
    %1262 = memref.load %arg4[%c207] : memref<256xf32, #tpu.memory_space<smem>>
    %1263 = vector.broadcast %1262 : f32 to vector<16x128xf32>
    %1264 = arith.mulf %146, %1263 : vector<16x128xf32>
    %1265 = arith.addf %1261, %1264 : vector<16x128xf32>
    %c223 = arith.constant 223 : index
    %1266 = memref.load %arg4[%c223] : memref<256xf32, #tpu.memory_space<smem>>
    %1267 = vector.broadcast %1266 : f32 to vector<16x128xf32>
    %1268 = arith.mulf %152, %1267 : vector<16x128xf32>
    %1269 = arith.addf %1265, %1268 : vector<16x128xf32>
    %c239 = arith.constant 239 : index
    %1270 = memref.load %arg4[%c239] : memref<256xf32, #tpu.memory_space<smem>>
    %1271 = vector.broadcast %1270 : f32 to vector<16x128xf32>
    %1272 = arith.mulf %158, %1271 : vector<16x128xf32>
    %1273 = arith.addf %1269, %1272 : vector<16x128xf32>
    %c255 = arith.constant 255 : index
    %1274 = memref.load %arg4[%c255] : memref<256xf32, #tpu.memory_space<smem>>
    %1275 = vector.broadcast %1274 : f32 to vector<16x128xf32>
    %1276 = arith.mulf %164, %1275 : vector<16x128xf32>
    %1277 = arith.addf %1273, %1276 : vector<16x128xf32>
    %cst_96 = arith.constant 0.000000e+00 : f32
    %1278 = vector.broadcast %cst_96 : f32 to vector<16x128xf32>
    %1279 = arith.maximumf %1277, %1278 : vector<16x128xf32>
    %1280 = vector.broadcast %63 : f32 to vector<16x128xf32>
    %1281 = arith.mulf %1279, %1280 : vector<16x128xf32>
    %1282 = arith.addf %1142, %1281 : vector<16x128xf32>
    %1283 = arith.addf %1212, %1282 : vector<16x128xf32>
    %1284 = vector.broadcast %64 : f32 to vector<16x128xf32>
    %1285 = arith.addf %1283, %1284 : vector<16x128xf32>
    %1286 = arith.negf %1285 : vector<16x128xf32>
    %1287 = math.exp %1286 : vector<16x128xf32>
    %cst_97 = arith.constant 1.000000e+00 : f32
    %1288 = vector.broadcast %cst_97 : f32 to vector<16x128xf32>
    %1289 = arith.addf %1288, %1287 : vector<16x128xf32>
    %1290 = arith.divf %1288, %1289 : vector<16x128xf32>
    %1291 = arith.index_cast %66 : i32 to index
    %c0_98 = arith.constant 0 : index
    %1292 = vector.load %arg8[%1291, %c0_98] : memref<16x128xf32, #tpu.memory_space<vmem>>, vector<16x128xf32>
    tpu.vector_store %arg8[%1291, %c0_98], %1290 {strides = array<i32>} : memref<16x128xf32, #tpu.memory_space<vmem>>, vector<16x128xf32>,
    %c1_i32 = arith.constant 1 : i32
    return
  }
  func.func @transform_0(%arg0: i32) -> (i32, i32) {
    %c0_i32 = arith.constant 0 : i32
    %c0_i32_0 = arith.constant 0 : i32
    return %arg0, %c0_i32 : i32, i32
  }
  func.func @transform_1(%arg0: i32) -> i32 {
    %c0_i32 = arith.constant 0 : i32
    %c0_i32_0 = arith.constant 0 : i32
    return %c0_i32 : i32
  }
  func.func @transform_2(%arg0: i32) -> i32 {
    %c0_i32 = arith.constant 0 : i32
    %c0_i32_0 = arith.constant 0 : i32
    return %c0_i32 : i32
  }
  func.func @transform_3(%arg0: i32) -> i32 {
    %c0_i32 = arith.constant 0 : i32
    %c0_i32_0 = arith.constant 0 : i32
    return %c0_i32 : i32
  }
  func.func @transform_4(%arg0: i32) -> i32 {
    %c0_i32 = arith.constant 0 : i32
    %c0_i32_0 = arith.constant 0 : i32
    return %c0_i32 : i32
  }
  func.func @transform_5(%arg0: i32) -> i32 {
    %c0_i32 = arith.constant 0 : i32
    %c0_i32_0 = arith.constant 0 : i32
    return %c0_i32 : i32
  }
  func.func @transform_6(%arg0: i32) -> i32 {
    %c0_i32 = arith.constant 0 : i32
    %c0_i32_0 = arith.constant 0 : i32
    return %c0_i32 : i32
  }
  func.func @transform_7(%arg0: i32) -> (i32, i32) {
    %c0_i32 = arith.constant 0 : i32
    %c0_i32_0 = arith.constant 0 : i32
    return %arg0, %c0_i32 : i32, i32
  }
}

</mosaic_0001>

<bundles_post_ra>
// kernel: tpu_custom_call.1
= control target key start
LH: loop header
LB: loop body
LE: loop exit
PB: predicated region body
PF: predicated region fallthrough
CT: control target
= control target key end

     0   :  { %13 = vsyncpa [#allocation4], 0  ;;  %s4393_s0 = inlined_call_operand.hbm [shape: f32[16,128], index: 0, kind: input, shape index: {}]   ;;  %s4394_s1 = inlined_call_operand.vmem [shape: f32[16], index: 1, kind: input, shape index: {}]   ;;  %s4395_s2 = inlined_call_operand.vmem [shape: f32[16], index: 2, kind: input, shape index: {}]   ;;  %s4396_s3 = inlined_call_operand.vmem [shape: f32[256], index: 3, kind: input, shape index: {}]   ;;  %s4397_s4 = inlined_call_operand.vmem [shape: f32[16], index: 4, kind: input, shape index: {}]   ;;  %s4398_s5 = inlined_call_operand.vmem [shape: f32[16], index: 5, kind: input, shape index: {}]   ;;  %s4399_s6 = inlined_call_operand.<no memory space> [shape: f32[1], index: 6, kind: input, shape index: {}]   ;;  %s4400_s7 = inlined_call_operand.hbm [shape: f32[16,128], index: 7, kind: output, shape index: {}]  }
   0x1   :  { %14 = vsyncpa [#allocation6], 0 }
   0x2   :  { %15 = vsyncpa [#allocation9], 0 }
   0x3   :  { %16 = vsyncpa [#allocation12], 0  ;;  %s46_s26 = sshll.u32 %s4395_s2, 4  ;;  %s47_s26 = int_to_ptr.vmem [resolvable:$true] %s46_s26 }
   0x4   :  { %17 = vsyncpa [#allocation5], 0  ;;  %s66_s29 = sshll.u32 %s4397_s4, 4  ;;  %s2329_s30 = scalar_lea.vmem %s47_s26, 16  ;;  %s67_s29 = int_to_ptr.vmem [resolvable:$true] %s66_s29 }
   0x5   :  { %p2330_p0 = scmp.ne.s32.totalorder %s47_s26, %s2329_s30  ;;  %p2334_p1 = scmp.lt.s32.totalorder %s47_s26, %s47_s26 }
   0x6   :  { %p2335_p2 = scmp.lt.s32.totalorder %s2329_s30, %s2329_s30 }
   0x8   :  { %p2336_p3 = por %p2335_p2, %p2334_p1 }
   0xa   :  { %p2337_p4 = pnand %p2336_p3, %p2330_p0 }
   0xc   :  { %2340 = shalt.err (!%p2337_p4)
}
   0xd   :  { %s2443_s8 = smov [#allocation8]   ;;  %s2341_s9 = scalar_lea.vmem %s67_s29, 16 }
   0xe   :  { %49 = dma.vmem_to_smem %s47_s26, 16, %s2443_s8, [#allocation9]  }
   0xf   :  { %p2342_p5 = scmp.ne.s32.totalorder %s67_s29, %s2341_s9  ;;  %p2346_p6 = scmp.lt.s32.totalorder %s67_s29, %s67_s29 }
  0x10   :  { %p2347_p7 = scmp.lt.s32.totalorder %s2341_s9, %s2341_s9 }
  0x12   :  { %p2348_p8 = por %p2347_p7, %p2346_p6 }
  0x14   :  { %p2349_p9 = pnand %p2348_p8, %p2342_p5 }
  0x16   :  { %2352 = shalt.err (!%p2349_p9)
}
  0x17   :  { %s2444_s2 = smov [#allocation11]   ;;  %s2445_s4 = smov [#allocation3]  }
  0x18   :  { %69 = dma.vmem_to_smem %s67_s29, 16, %s2444_s2, [#allocation12]  }
  0x19   :  { %s23_s10 = sshll.u32 %s2445_s4, 4  ;;  %s36_s13 = sshll.u32 %s4394_s1, 4  ;;  %s24_s10 = int_to_ptr.vmem [resolvable:$true] %s23_s10  ;;  %s37_s13 = int_to_ptr.vmem [resolvable:$true] %s36_s13 }
  0x1a   :  { %s2353_s16 = scalar_lea.hbm %s4393_s0, 256 }
  0x1b   :  { %p2354_p10 = scmp.ne.s32.totalorder %s4393_s0, %s2353_s16  ;;  %p2357_p11 = scmp.lt.u32.totalorder %s2353_s16, %s4393_s0 }
  0x1d   :  { %p2359_p12 = pnand %p2357_p11, %p2354_p10 }
  0x1f   :  { %2362 = shalt.err (!%p2359_p12)
}
  0x20   :  { %s2363_s21 = scalar_lea.vmem %s24_s10, 256  ;;  %p2368_p0 = scmp.lt.s32.totalorder %s24_s10, %s24_s10 }
  0x21   :  { %p2364_p13 = scmp.ne.s32.totalorder %s24_s10, %s2363_s21  ;;  %p2369_p1 = scmp.lt.s32.totalorder %s2363_s21, %s2363_s21 }
  0x23   :  { %p2370_p2 = por %p2369_p1, %p2368_p0 }
  0x25   :  { %p2371_p3 = pnand %p2370_p2, %p2364_p13 }
  0x27   :  { %2374 = shalt.err (!%p2371_p3)
}
  0x28   :  { %s2446_s1 = smov 128   ;;  %s2447_s22 = smov 8  }
  0x29   :  { %29 = dma.hbm_to_vmem [thread:$0]  %s4393_s0, 256, %s24_s10, [#allocation4], %s2446_s1, %s2446_s1, %s2447_s22  }
  0x2a   :  { %s2375_s25 = scalar_lea.vmem %s37_s13, 16  ;;  %p2380_p5 = scmp.lt.s32.totalorder %s37_s13, %s37_s13 }
  0x2b   :  { %p2376_p4 = scmp.ne.s32.totalorder %s37_s13, %s2375_s25  ;;  %p2381_p6 = scmp.lt.s32.totalorder %s2375_s25, %s2375_s25 }
  0x2d   :  { %p2382_p7 = por %p2381_p6, %p2380_p5 }
  0x2f   :  { %p2383_p8 = pnand %p2382_p7, %p2376_p4 }
  0x31   :  { %2386 = shalt.err (!%p2383_p8)
}
  0x32   :  { %s2448_s26 = smov [#allocation7]   ;;  %s56_s29 = sshll.u32 %s4396_s3, 4  ;;  %s57_s29 = int_to_ptr.vmem [resolvable:$true] %s56_s29 }
  0x33   :  { %39 = dma.vmem_to_smem %s37_s13, 16, %s2448_s26, [#allocation6]  }
  0x34   :  { %s76_s9 = sshll.u32 %s4398_s5, 4  ;;  %s2387_s0 = scalar_lea.vmem %s57_s29, 32  ;;  %s77_s9 = int_to_ptr.vmem [resolvable:$true] %s76_s9 }
  0x35   :  { %p2388_p9 = scmp.ne.s32.totalorder %s57_s29, %s2387_s0  ;;  %p2392_p10 = scmp.lt.s32.totalorder %s57_s29, %s57_s29 }
  0x36   :  { %p2393_p11 = scmp.lt.s32.totalorder %s2387_s0, %s2387_s0 }
  0x38   :  { %p2394_p12 = por %p2393_p11, %p2392_p10 }
  0x3a   :  { %p2395_p13 = pnand %p2394_p12, %p2388_p9 }
  0x3c   :  { %2398 = shalt.err (!%p2395_p13)
}
  0x3d   :  { %s2449_s2 = smov [#allocation10]   ;;  %s2399_s4 = scalar_lea.vmem %s77_s9, 16 }
  0x3e   :  { %59 = dma.vmem_to_smem %s57_s29, 32, %s2449_s2, [#allocation9]  }
  0x3f   :  { %p2400_p0 = scmp.ne.s32.totalorder %s77_s9, %s2399_s4  ;;  %p2404_p1 = scmp.lt.s32.totalorder %s77_s9, %s77_s9 }
  0x40   :  { %p2405_p2 = scmp.lt.s32.totalorder %s2399_s4, %s2399_s4 }
  0x42   :  { %p2406_p3 = por %p2405_p2, %p2404_p1 }
  0x44   :  { %p2407_p4 = pnand %p2406_p3, %p2400_p0 }
  0x46   :  { %2410 = shalt.err (!%p2407_p4)
}
  0x47   :  { %s2450_s3 = smov [#allocation13]  }
  0x48   :  { %79 = dma.vmem_to_smem %s77_s9, 16, %s2450_s3, [#allocation12]  }
  0x49   :  { %2433 = dma.done.wait [#allocation4], 256  }
  0x4a   :  { %2434 = vsyncadd [#allocation4], 4294967040 }
  0x4b   :  { %2435 = dma.done.wait [#allocation6], 16  }
  0x4c   :  { %2436 = vsyncadd [#allocation6], 4294967280 }
  0x4d   :  { %2437 = dma.done.wait [#allocation9], 48  }
  0x4e   :  { %2438 = vsyncadd [#allocation9], 4294967248 }
  0x4f   :  { %2439 = dma.done.wait [#allocation12], 32  }
  0x50   :  { %2440 = vsyncadd [#allocation12], 4294967264 }
  0x51   :  { %100 = sfence }
  0x52   :  { %s101_s5 = sld [smem:[#allocation7]]  ;;  %s1995_s10 = sld [smem:[#allocation7 + $0x1]]  ;;  %v2540_v0 = vld [vmem:[#allocation3] sm:$0xff]  ;;  %v2542_v1 = vld [vmem:[#allocation3 + $0x8] sm:$0xff] }
  0x53   :  { %s1996_s11 = sld [smem:[#allocation7 + $0x2]]  ;;  %s1997_s12 = sld [smem:[#allocation7 + $0x3]] }
  0x54   :  { %s2522_s13 = sld [smem:[#allocation7 + $0x4]]  ;;  %s2524_s14 = sld [smem:[#allocation7 + $0x5]] }
  0x55   :  { %s2526_s15 = sld [smem:[#allocation7 + $0x6]]  ;;  %s2528_s16 = sld [smem:[#allocation7 + $0x7]] }
  0x56   :  { %s2530_s17 = sld [smem:[#allocation8]]  ;;  %s2532_s18 = sld [smem:[#allocation8 + $0x1]] }
  0x57   :  { %s2534_s19 = sld [smem:[#allocation7 + $0x8]]  ;;  %s2536_s20 = sld [smem:[#allocation7 + $0x9]] }
  0x58   :  { %s2538_s21 = sld [smem:[#allocation8 + $0x2]]  ;;  %v168_v2 = vstv %s101_s5  ;;  %v176_v3 = vstv %s1995_s10  ;;  %s2544_s23 = sld [smem:[#allocation8 + $0x3]] }
  0x59   :  { %v184_v4 = vstv %s1996_s11  ;;  %v192_v5 = vstv %s1997_s12  ;;  %s2546_s24 = sld [smem:[#allocation7 + $0xa]]  ;;  %v169_v6 = vmul.f32 %v168_v2, %v2540_v0  ;;  %v170_v7 = vmul.f32 %v168_v2, %v2542_v1  ;;  %s2552_s25 = sld [smem:[#allocation7 + $0xb]] }
  0x5a   :  { %v177_v8 = vmul.f32 %v176_v3, %v2540_v0  ;;  %v200_v9 = vstv %s2522_s13  ;;  %s2554_s26 = sld [smem:[#allocation8 + $0x4]]  ;;  %v178_v10 = vmul.f32 %v176_v3, %v2542_v1  ;;  %v185_v11 = vmul.f32 %v184_v4, %v2540_v0  ;;  %s2560_s27 = sld [smem:[#allocation8 + $0x5]] }
  0x5b   :  { %v186_v12 = vmul.f32 %v184_v4, %v2542_v1  ;;  %v208_v13 = vstv %s2524_s14  ;;  %v193_v14 = vmul.f32 %v192_v5, %v2540_v0  ;;  %v194_v15 = vmul.f32 %v192_v5, %v2542_v1  ;;  %s2566_s28 = sld [smem:[#allocation8 + $0x6]]  ;;  %s2568_s29 = sld [smem:[#allocation8 + $0x7]] }
  0x5c   :  { %v216_v16 = vstv %s2526_s15  ;;  %v224_v17 = vstv %s2528_s16  ;;  %v171_v18 = vstv %s2530_s17  ;;  %v179_v19 = vstv %s2532_s18  ;;  %s2574_s30 = sld [smem:[#allocation8 + $0x8]]  ;;  %s2580_s8 = sld [smem:[#allocation8 + $0x9]] }
  0x5d   :  { %v201_v20 = vmul.f32 %v200_v9, %v2540_v0  ;;  %v202_v21 = vmul.f32 %v200_v9, %v2542_v1  ;;  %v209_v22 = vmul.f32 %v208_v13, %v2540_v0  ;;  %v210_v23 = vmul.f32 %v208_v13, %v2542_v1  ;;  %s2592_s9 = sld [smem:[#allocation8 + $0xa]]  ;;  %s2608_s0 = sld [smem:[#allocation8 + $0xb]] }
  0x5e   :  { %v232_v24 = vstv %s2534_s19  ;;  %v240_v25 = vstv %s2536_s20  ;;  %v187_v26 = vstv %s2538_s21  ;;  %v217_v27 = vmul.f32 %v216_v16, %v2540_v0  ;;  %s2615_s2 = sld [smem:[#allocation11]]  ;;  %s2620_s4 = sld [smem:[#allocation7 + $0xc]] }
  0x5f   :  { %v218_v28 = vmul.f32 %v216_v16, %v2542_v1  ;;  %v225_v29 = vmul.f32 %v224_v17, %v2540_v0  ;;  %v172_v30 = vadd.f32 %v171_v18, %v169_v6  ;;  %v173_v31 = vadd.f32 %v171_v18, %v170_v7  ;;  %s2622_s3 = sld [smem:[#allocation7 + $0xd]]  ;;  %s2626_s5 = sld [smem:[#allocation10]] }
  0x60   :  { %v180_v32 = vadd.f32 %v179_v19, %v177_v8  ;;  %v195_v33 = vstv %s2544_s23  ;;  %v181_v34 = vadd.f32 %v179_v19, %v178_v10  ;;  %v226_v35 = vmul.f32 %v224_v17, %v2542_v1  ;;  %s2628_s10 = sld [smem:[#allocation10 + $0x10]]  ;;  %s2630_s11 = sld [smem:[#allocation8 + $0xc]] }
  0x61   :  { %v233_v36 = vmul.f32 %v232_v24, %v2540_v0  ;;  %v234_v37 = vmul.f32 %v232_v24, %v2542_v1  ;;  %v188_v38 = vadd.f32 %v187_v26, %v185_v11  ;;  %v189_v39 = vadd.f32 %v187_v26, %v186_v12  ;;  %s2635_s12 = sld [smem:[#allocation10 + $0x20]]  ;;  %s2674_s17 = sld [smem:[#allocation7 + $0xe]] }
  0x62   :  { %v241_v40 = vmul.f32 %v240_v25, %v2540_v0  ;;  %v242_v41 = vmul.f32 %v240_v25, %v2542_v1  ;;  %v196_v42 = vadd.f32 %v195_v33, %v193_v14  ;;  %v203_v43 = vstv %s2554_s26  ;;  %s2643_s13 = sld [smem:[#allocation10 + $0x30]]  ;;  %s2680_s18 = sld [smem:[#allocation8 + $0xd]] }
  0x63   :  { %v248_v44 = vstv %s2546_s24  ;;  %v256_v45 = vstv %s2552_s25  ;;  %v2597_v46 = vmax.f32 %v172_v30, 0.0  ;;  %v2599_v47 = vmax.f32 %v173_v31, 0.0  ;;  %s2645_s14 = sld [smem:[#allocation10 + $0x40]]  ;;  %s2705_s23 = sld [smem:[#allocation10 + $0x1]] }
  0x64   :  { %v2601_v48 = vmax.f32 %v180_v32, 0.0  ;;  %v211_v49 = vstv %s2560_s27  ;;  %v2604_v50 = vmax.f32 %v181_v34, 0.0  ;;  %v197_v51 = vadd.f32 %v195_v33, %v194_v15  ;;  %s2662_s15 = sld [smem:[#allocation10 + $0x50]]  ;;  %s2711_s24 = sld [smem:[#allocation10 + $0x11]] }
  0x65   :  { %v219_v52 = vstv %s2566_s28  ;;  %v227_v53 = vstv %s2568_s29  ;;  %v2610_v54 = vmax.f32 %v188_v38, 0.0  ;;  %v2612_v55 = vmax.f32 %v189_v39, 0.0  ;;  %s2672_s16 = sld [smem:[#allocation10 + $0x60]]  ;;  %s2713_s25 = sld [smem:[#allocation10 + $0x21]] }
  0x66   :  { %v204_v56 = vadd.f32 %v203_v43, %v201_v20  ;;  %v235_v57 = vstv %s2574_s30  ;;  %v2617_v58 = vmax.f32 %v196_v42, 0.0  ;;  %v205_v59 = vadd.f32 %v203_v43, %v202_v21  ;;  %s2685_s19 = sld [smem:[#allocation10 + $0x70]]  ;;  %s2715_s26 = sld [smem:[#allocation11 + $0x1]] }
  0x67   :  { %4433 = vst [vmem:[#allocation20_spill] sm:$0xff] %v2612_v55  ;;  %v212_v60 = vadd.f32 %v211_v49, %v209_v22  ;;  %v243_v61 = vstv %s2580_s8  ;;  %v213_v62 = vadd.f32 %v211_v49, %v210_v23  ;;  %v220_v63 = vadd.f32 %v219_v52, %v217_v27  ;;  %s2693_s20 = sld [smem:[#allocation10 + $0x80]]  ;;  %s2733_s28 = sld [smem:[#allocation10 + $0x31]] }
  0x68   :  { %v221_v2 = vadd.f32 %v219_v52, %v218_v28  ;;  %v228_v3 = vadd.f32 %v227_v53, %v225_v29  ;;  %v2624_v4 = vmax.f32 %v197_v51, 0.0  ;;  %v229_v5 = vadd.f32 %v227_v53, %v226_v35  ;;  %s2703_s21 = sld [smem:[#allocation10 + $0x90]]  ;;  %s2737_s29 = sld [smem:[#allocation10 + $0x41]] }
  0x69   :  { %v236_v6 = vadd.f32 %v235_v57, %v233_v36  ;;  %v237_v7 = vadd.f32 %v235_v57, %v234_v37  ;;  %v2632_v8 = vmax.f32 %v204_v56, 0.0  ;;  %v244_v9 = vadd.f32 %v243_v61, %v241_v40  ;;  %s2724_s27 = sld [smem:[#allocation10 + $0xa0]]  ;;  %s2739_s30 = sld [smem:[#allocation8 + $0xe]] }
  0x6a   :  { %v245_v10 = vadd.f32 %v243_v61, %v242_v41  ;;  %v249_v11 = vmul.f32 %v248_v44, %v2540_v0  ;;  %v2637_v12 = vmax.f32 %v205_v59, 0.0  ;;  %v2639_v13 = vmax.f32 %v212_v60, 0.0  ;;  %s2746_s8 = sld [smem:[#allocation7 + $0xf]] }
  0x6b   :  { %v250_v14 = vmul.f32 %v248_v44, %v2542_v1  ;;  %v251_v15 = vstv %s2592_s9  ;;  %v2647_v16 = vmax.f32 %v213_v62, 0.0  ;;  %v2649_v17 = vmax.f32 %v220_v63, 0.0  ;;  %s2751_s9 = sld [smem:[#allocation10 + $0xb0]] }
  0x6c   :  { %v2651_v18 = vmax.f32 %v221_v2, 0.0  ;;  %v2653_v19 = vmax.f32 %v228_v3, 0.0  ;;  %v2655_v20 = vmax.f32 %v229_v5, 0.0  ;;  %v2657_v21 = vmax.f32 %v236_v6, 0.0 }
  0x6d   :  { %v2659_v22 = vmax.f32 %v237_v7, 0.0  ;;  %v257_v23 = vmul.f32 %v256_v45, %v2540_v0  ;;  %v2664_v24 = vmax.f32 %v244_v9, 0.0  ;;  %v2666_v25 = vmax.f32 %v245_v10, 0.0 }
  0x6e   :  { %v252_v26 = vadd.f32 %v251_v15, %v249_v11  ;;  %v259_v27 = vstv %s2608_s0  ;;  %v253_v28 = vadd.f32 %v251_v15, %v250_v14  ;;  %v258_v29 = vmul.f32 %v256_v45, %v2542_v1  ;;  %s2759_s0 = sld [smem:[#allocation10 + $0x51]] }
  0x6f   :  { %4434 = vst [vmem:[#allocation21_spill] sm:$0xff] %v2666_v25  ;;  %v297_v30 = vstv %s2626_s5  ;;  %v300_v31 = vstv %s2615_s2  ;;  %v304_v34 = vstv %s2628_s10  ;;  %v310_v35 = vstv %s2635_s12  ;;  %s2765_s2 = sld [smem:[#allocation8 + $0xf]]  ;;  %s2784_s5 = sld [smem:[#allocation10 + $0xd0]] }
  0x70   :  { %v298_v32 = vmul.f32 %v297_v30, %v2597_v46  ;;  %v299_v33 = vmul.f32 %v297_v30, %v2599_v47  ;;  %v260_v36 = vadd.f32 %v259_v27, %v257_v23  ;;  %v264_v37 = vstv %s2620_s4  ;;  %s2769_s4 = sld [smem:[#allocation10 + $0xc0]]  ;;  %s2792_s10 = sld [smem:[#allocation10 + $0x71]] }
  0x71   :  { %v305_v38 = vmul.f32 %v304_v34, %v2601_v48  ;;  %v306_v39 = vmul.f32 %v304_v34, %v2604_v50  ;;  %v311_v42 = vmul.f32 %v310_v35, %v2610_v54  ;;  %v312_v43 = vmul.f32 %v310_v35, %v2612_v55  ;;  %s2798_s12 = sld [smem:[#allocation10 + $0xe0]] }
  0x72   :  { %v301_v40 = vadd.f32 %v300_v31, %v298_v32  ;;  %v302_v41 = vadd.f32 %v300_v31, %v299_v33  ;;  %v267_v44 = vstv %s2630_s11  ;;  %v272_v45 = vstv %s2622_s3  ;;  %s2777_s3 = sld [smem:[#allocation10 + $0x61]]  ;;  %s2794_s11 = sld [smem:[#allocation13]] }
  0x73   :  { %v316_v49 = vstv %s2643_s13  ;;  %v322_v51 = vstv %s2645_s14  ;;  %v2697_v59 = vmax.f32 %v252_v26, 0.0  ;;  %v261_v60 = vadd.f32 %v259_v27, %v258_v29  ;;  %s2803_s13 = sld [smem:[#allocation10 + $0xf0]]  ;;  %s2805_s14 = sld [smem:[#allocation10 + $0x81]] }
  0x74   :  { %v307_v52 = vadd.f32 %v305_v38, %v301_v40  ;;  %v308_v53 = vadd.f32 %v306_v39, %v302_v41  ;;  %v317_v56 = vmul.f32 %v316_v49, %v2617_v58  ;;  %v318_v57 = vmul.f32 %v316_v49, %v2624_v4 }
  0x75   :  { %4435 = vst [vmem:[#allocation22_spill] sm:$0xff] %v2697_v59  ;;  %v265_v61 = vmul.f32 %v264_v37, %v2540_v0  ;;  %v328_v62 = vstv %s2662_s15  ;;  %v323_v3 = vmul.f32 %v322_v51, %v2632_v8  ;;  %v324_v5 = vmul.f32 %v322_v51, %v2637_v12  ;;  %s2817_s15 = sld [smem:[#allocation11 + $0x2]] }
  0x76   :  { %v313_v63 = vadd.f32 %v311_v42, %v307_v52  ;;  %v314_v2 = vadd.f32 %v312_v43, %v308_v53  ;;  %v266_v6 = vmul.f32 %v264_v37, %v2542_v1  ;;  %v273_v7 = vmul.f32 %v272_v45, %v2540_v0 }
  0x77   :  { %v274_v9 = vmul.f32 %v272_v45, %v2542_v1  ;;  %v334_v10 = vstv %s2672_s16  ;;  %v329_v15 = vmul.f32 %v328_v62, %v2639_v13  ;;  %v330_v23 = vmul.f32 %v328_v62, %v2647_v16  ;;  %s2823_s16 = sld [smem:[#allocation10 + $0x2]] }
  0x78   :  { %v319_v11 = vadd.f32 %v317_v56, %v313_v63  ;;  %v320_v14 = vadd.f32 %v318_v57, %v314_v2  ;;  %v268_v26 = vadd.f32 %v267_v44, %v265_v61  ;;  %v275_v27 = vstv %s2680_s18  ;;  %s2833_s18 = sld [smem:[#allocation10 + $0x12]] }
  0x79   :  { %v280_v29 = vstv %s2674_s17  ;;  %v340_v30 = vstv %s2685_s19  ;;  %v335_v33 = vmul.f32 %v334_v10, %v2649_v17  ;;  %v336_v34 = vmul.f32 %v334_v10, %v2651_v18  ;;  %s2827_s17 = sld [smem:[#allocation10 + $0x91]]  ;;  %s2835_s19 = sld [smem:[#allocation10 + $0x22]] }
  0x7a   :  { %v325_v31 = vadd.f32 %v323_v3, %v319_v11  ;;  %v326_v32 = vadd.f32 %v324_v5, %v320_v14  ;;  %v2726_v35 = vmax.f32 %v253_v28, 0.0  ;;  %v2728_v37 = vmax.f32 %v260_v36, 0.0 }
  0x7b   :  { %v2730_v38 = vmax.f32 %v261_v60, 0.0  ;;  %v346_v39 = vstv %s2693_s20  ;;  %v341_v42 = vmul.f32 %v340_v30, %v2653_v19  ;;  %v342_v43 = vmul.f32 %v340_v30, %v2655_v20  ;;  %s2843_s20 = sld [smem:[#allocation10 + $0xa1]] }
  0x7c   :  { %4436 = vst [vmem:[#allocation23_spill] sm:$0xff] %v2726_v35  ;;  %4437 = vst [vmem:[#allocation24_spill] sm:$0xff] %v2728_v37  ;;  %v331_v40 = vadd.f32 %v329_v15, %v325_v31  ;;  %v332_v41 = vadd.f32 %v330_v23, %v326_v32  ;;  %v269_v28 = vadd.f32 %v267_v44, %v266_v6  ;;  %v2748_v51 = vmax.f32 %v268_v26, 0.0 }
  0x7d   :  { %4438 = vst [vmem:[#allocation25_spill] sm:$0xff] %v2730_v38  ;;  %v2741_v36 = vadd.f32 %v275_v27, %v273_v7  ;;  %v2743_v45 = vadd.f32 %v275_v27, %v274_v9  ;;  %v281_v49 = vmul.f32 %v280_v29, %v2540_v0  ;;  %v347_v56 = vmul.f32 %v346_v39, %v2657_v21 }
  0x7e   :  { %4439 = vst [vmem:[#allocation26_spill] sm:$0xff] %v2748_v51  ;;  %v337_v52 = vadd.f32 %v335_v33, %v331_v40  ;;  %v338_v53 = vadd.f32 %v336_v34, %v332_v41  ;;  %v352_v57 = vstv %s2703_s21  ;;  %v399_v44 = vstv %s2705_s23  ;;  %s2845_s21 = sld [smem:[#allocation10 + $0x32]] }
  0x7f   :  { %v406_v60 = vstv %s2711_s24  ;;  %v412_v61 = vstv %s2713_s25  ;;  %v348_v2 = vmul.f32 %v346_v39, %v2659_v22  ;;  %v402_v3 = vstv %s2715_s26  ;;  %s2852_s23 = sld [smem:[#allocation10 + $0x42]]  ;;  %s2870_s25 = sld [smem:[#allocation10 + $0xb1]] }
  0x80   :  { %v343_v62 = vadd.f32 %v341_v42, %v337_v52  ;;  %v344_v63 = vadd.f32 %v342_v43, %v338_v53  ;;  %v400_v5 = vmul.f32 %v399_v44, %v2597_v46  ;;  %v401_v6 = vmul.f32 %v399_v44, %v2599_v47  ;;  %s2865_s24 = sld [smem:[#allocation10 + $0x52]] }
  0x81   :  { %v407_v7 = vmul.f32 %v406_v60, %v2601_v48  ;;  %v408_v9 = vmul.f32 %v406_v60, %v2604_v50  ;;  %v353_v11 = vmul.f32 %v352_v57, %v2664_v24  ;;  %v358_v14 = vstv %s2724_s27  ;;  %s2874_s26 = sld [smem:[#allocation10 + $0x62]]  ;;  %s2880_s27 = sld [smem:[#allocation10 + $0xc1]] }
  0x82   :  { %v349_v10 = vadd.f32 %v347_v56, %v343_v62  ;;  %v413_v15 = vmul.f32 %v412_v61, %v2610_v54  ;;  %v403_v23 = vadd.f32 %v402_v3, %v400_v5  ;;  %v404_v26 = vadd.f32 %v402_v3, %v401_v6 }
  0x83   :  { %v414_v27 = vmul.f32 %v412_v61, %v2612_v55  ;;  %v418_v30 = vstv %s2733_s28  ;;  %v282_v31 = vmul.f32 %v280_v29, %v2542_v1  ;;  %v350_v32 = vadd.f32 %v348_v2, %v344_v63  ;;  %s2883_s28 = sld [smem:[#allocation10 + $0x72]] }
  0x84   :  { %v354_v33 = vmul.f32 %v352_v57, %v2666_v25  ;;  %v424_v34 = vstv %s2737_s29  ;;  %v283_v39 = vstv %s2739_s30  ;;  %v409_v40 = vadd.f32 %v407_v7, %v403_v23  ;;  %s2891_s29 = sld [smem:[#allocation10 + $0x82]]  ;;  %s2897_s30 = sld [smem:[#allocation10 + $0xd1]] }
  0x85   :  { %v410_v41 = vadd.f32 %v408_v9, %v404_v26  ;;  %v419_v42 = vmul.f32 %v418_v30, %v2617_v58  ;;  %v288_v43 = vstv %s2746_s8  ;;  %v355_v52 = vadd.f32 %v353_v11, %v349_v10  ;;  %s2900_s8 = sld [smem:[#allocation10 + $0xe1]] }
  0x86   :  { %v359_v53 = vmul.f32 %v358_v14, %v2697_v59  ;;  %v364_v56 = vstv %s2751_s9  ;;  %v415_v29 = vadd.f32 %v413_v15, %v409_v40  ;;  %v420_v57 = vmul.f32 %v418_v30, %v2624_v4  ;;  %s2906_s9 = sld [smem:[#allocation10 + $0x92]] }
  0x87   :  { %v416_v44 = vadd.f32 %v414_v27, %v410_v41  ;;  %v425_v60 = vmul.f32 %v424_v34, %v2632_v8  ;;  %v2788_v61 = vmax.f32 %v269_v28, 0.0  ;;  %v356_v62 = vadd.f32 %v354_v33, %v350_v32 }
  0x88   :  { %v360_v63 = vmul.f32 %v358_v14, %v2726_v35  ;;  %v430_v2 = vstv %s2759_s0  ;;  %v284_v3 = vadd.f32 %v283_v39, %v281_v49  ;;  %v289_v5 = vmul.f32 %v288_v43, %v2540_v0  ;;  %s2915_s0 = sld [smem:[#allocation10 + $0xa2]] }
  0x89   :  { %4440 = vst [vmem:[#allocation27_spill] sm:$0xff] %v2788_v61  ;;  %v290_v6 = vmul.f32 %v288_v43, %v2542_v1  ;;  %v421_v7 = vadd.f32 %v419_v42, %v415_v29  ;;  %v291_v9 = vstv %s2765_s2  ;;  %v361_v28 = vadd.f32 %v359_v53, %v355_v52  ;;  %s2917_s2 = sld [smem:[#allocation11 + $0x3]] }
  0x8a   :  { %v365_v10 = vmul.f32 %v364_v56, %v2728_v37  ;;  %v370_v11 = vstv %s2769_s4  ;;  %v422_v14 = vadd.f32 %v420_v57, %v416_v44  ;;  %v426_v49 = vmul.f32 %v424_v34, %v2637_v12  ;;  %s2921_s4 = sld [smem:[#allocation10 + $0x3]] }
  0x8b   :  { %v427_v0 = vadd.f32 %v425_v60, %v421_v7  ;;  %v431_v1 = vmul.f32 %v430_v2, %v2639_v13  ;;  %v285_v15 = vadd.f32 %v283_v39, %v282_v31  ;;  %v362_v23 = vadd.f32 %v360_v63, %v356_v62 }
  0x8c   :  { %v366_v26 = vmul.f32 %v364_v56, %v2730_v38  ;;  %v436_v27 = vstv %s2777_s3  ;;  %v2812_v30 = vmax.f32 %v2741_v36, 0.0  ;;  %v2815_v32 = vmax.f32 %v2743_v45, 0.0  ;;  %s2925_s3 = sld [smem:[#allocation10 + $0xb2]] }
  0x8d   :  { %v292_v33 = vadd.f32 %v291_v9, %v289_v5  ;;  %v293_v40 = vadd.f32 %v291_v9, %v290_v6  ;;  %v2819_v34 = vmax.f32 %v284_v3, 0.0  ;;  %v367_v41 = vadd.f32 %v365_v10, %v361_v28 }
  0x8e   :  { %v371_v31 = vmul.f32 %v370_v11, %v2748_v51  ;;  %v376_v39 = vstv %s2784_s5  ;;  %v428_v36 = vadd.f32 %v426_v49, %v422_v14  ;;  %v432_v42 = vmul.f32 %v430_v2, %v2647_v16  ;;  %s2935_s5 = sld [smem:[#allocation10 + $0x13]] }
  0x8f   :  { %v433_v45 = vadd.f32 %v431_v1, %v427_v0  ;;  %v437_v43 = vmul.f32 %v436_v27, %v2649_v17  ;;  %v2829_v52 = vmax.f32 %v285_v15, 0.0  ;;  %v368_v53 = vadd.f32 %v366_v26, %v362_v23 }
  0x90   :  { %v372_v56 = vmul.f32 %v370_v11, %v2788_v61  ;;  %v442_v29 = vstv %s2792_s10  ;;  %v2837_v44 = vmax.f32 %v292_v33, 0.0  ;;  %v2839_v57 = vmax.f32 %v293_v40, 0.0  ;;  %s2937_s10 = sld [smem:[#allocation10 + $0x23]] }
  0x91   :  { %v382_v60 = vstv %s2798_s12  ;;  %v373_v63 = vadd.f32 %v371_v31, %v367_v41  ;;  %v377_v2 = vmul.f32 %v376_v39, %v2812_v30  ;;  %v388_v3 = vstv %s2803_s13  ;;  %s2941_s12 = sld [smem:[#allocation10 + $0x33]] }
  0x92   :  { %4441 = vst [vmem:[#allocation28_spill] sm:$0xff] %v2837_v44  ;;  %4442 = vst [vmem:[#allocation29_spill] sm:$0xff] %v2839_v57  ;;  %v448_v5 = vstv %s2805_s14  ;;  %v434_v6 = vadd.f32 %v432_v42, %v428_v36  ;;  %v438_v7 = vmul.f32 %v436_v27, %v2651_v18  ;;  %v439_v9 = vadd.f32 %v437_v43, %v433_v45  ;;  %s2947_s13 = sld [smem:[#allocation10 + $0x43]]  ;;  %s2960_s14 = sld [smem:[#allocation10 + $0xc2]] }
  0x93   :  { %v443_v28 = vmul.f32 %v442_v29, %v2653_v19  ;;  %v374_v10 = vadd.f32 %v372_v56, %v368_v53  ;;  %v378_v11 = vmul.f32 %v376_v39, %v2815_v32  ;;  %v383_v14 = vmul.f32 %v382_v60, %v2819_v34 }
  0x94   :  { %v384_v49 = vmul.f32 %v382_v60, %v2829_v52  ;;  %v2858_v0 = vmul.f32 %v388_v3, %v2837_v44  ;;  %v2861_v1 = vmul.f32 %v388_v3, %v2839_v57  ;;  %v444_v15 = vmul.f32 %v442_v29, %v2655_v20 }
  0x95   :  { %v449_v23 = vmul.f32 %v448_v5, %v2657_v21  ;;  %v379_v26 = vadd.f32 %v377_v2, %v373_v63  ;;  %v450_v27 = vmul.f32 %v448_v5, %v2659_v22  ;;  %v501_v33 = vstv %s2823_s16  ;;  %s2966_s16 = sld [smem:[#allocation10 + $0xf1]] }
  0x96   :  { %v504_v40 = vstv %s2817_s15  ;;  %v440_v41 = vadd.f32 %v438_v7, %v434_v6  ;;  %v445_v31 = vadd.f32 %v443_v28, %v439_v9  ;;  %v502_v39 = vmul.f32 %v501_v33, %v2597_v46  ;;  %s2962_s15 = sld [smem:[#allocation10 + $0x53]] }
  0x97   :  { %v503_v36 = vmul.f32 %v501_v33, %v2599_v47  ;;  %v380_v42 = vadd.f32 %v378_v11, %v374_v10  ;;  %v454_v45 = vstv %s2827_s17  ;;  %v508_v43 = vstv %s2833_s18  ;;  %s2971_s17 = sld [smem:[#allocation10 + $0x63]] }
  0x98   :  { %v514_v53 = vstv %s2835_s19  ;;  %v460_v56 = vstv %s2843_s20  ;;  %v505_v29 = vadd.f32 %v504_v40, %v502_v39  ;;  %v520_v63 = vstv %s2845_s21  ;;  %s2978_s18 = sld [smem:[#allocation10 + $0x73]]  ;;  %s2985_s19 = sld [smem:[#allocation10 + $0xd2]] }
  0x99   :  { %v506_v60 = vadd.f32 %v504_v40, %v503_v36  ;;  %v509_v2 = vmul.f32 %v508_v43, %v2601_v48  ;;  %v510_v3 = vmul.f32 %v508_v43, %v2604_v50  ;;  %v515_v5 = vmul.f32 %v514_v53, %v2610_v54  ;;  %s2993_s20 = sld [smem:[#allocation10 + $0x83]]  ;;  %s2999_s21 = sld [smem:[#allocation10 + $0xe2]] }
  0x9a   :  { %v516_v6 = vmul.f32 %v514_v53, %v2612_v55  ;;  %v446_v7 = vadd.f32 %v444_v15, %v440_v41  ;;  %v451_v9 = vadd.f32 %v449_v23, %v445_v31  ;;  %v455_v28 = vmul.f32 %v454_v45, %v2664_v24 }
  0x9b   :  { %v526_v10 = vstv %s2852_s23  ;;  %v511_v11 = vadd.f32 %v509_v2, %v505_v29  ;;  %v512_v33 = vadd.f32 %v510_v3, %v506_v60  ;;  %v521_v40 = vmul.f32 %v520_v63, %v2617_v58  ;;  %s3002_s23 = sld [smem:[#allocation10 + $0xf2]] }
  0x9c   :  { %v522_v39 = vmul.f32 %v520_v63, %v2624_v4  ;;  %v385_v36 = vadd.f32 %v383_v14, %v379_v26  ;;  %v456_v43 = vmul.f32 %v454_v45, %v2666_v25  ;;  %v461_v53 = vmul.f32 %v460_v56, %v2697_v59 }
  0x9d   :  { %v532_v15 = vstv %s2865_s24  ;;  %v517_v23 = vadd.f32 %v515_v5, %v511_v11  ;;  %v518_v41 = vadd.f32 %v516_v6, %v512_v33  ;;  %v527_v31 = vmul.f32 %v526_v10, %v2632_v8  ;;  %s3006_s24 = sld [smem:[#allocation13 + $0x1]] }
  0x9e   :  { %v528_v29 = vmul.f32 %v526_v10, %v2637_v12  ;;  %v452_v60 = vadd.f32 %v450_v27, %v446_v7  ;;  %v457_v63 = vadd.f32 %v455_v28, %v451_v9  ;;  %v466_v14 = vstv %s2870_s25  ;;  %s3010_s25 = sld [smem:[#allocation10 + $0x93]] }
  0x9f   :  { %v538_v26 = vstv %s2874_s26  ;;  %v523_v45 = vadd.f32 %v521_v40, %v517_v23  ;;  %v524_v2 = vadd.f32 %v522_v39, %v518_v41  ;;  %v533_v3 = vmul.f32 %v532_v15, %v2639_v13  ;;  %s3017_s26 = sld [smem:[#allocation11 + $0x4]] }
  0xa0   :  { %v534_v62 = vmul.f32 %v532_v15, %v2647_v16  ;;  %v386_v5 = vadd.f32 %v384_v49, %v380_v42  ;;  %v462_v6 = vmul.f32 %v460_v56, %v2726_v35  ;;  %v472_v11 = vstv %s2880_s27  ;;  %s3020_s27 = sld [smem:[#allocation10 + $0x4]] }
  0xa1   :  { %v544_v33 = vstv %s2883_s28  ;;  %v529_v57 = vadd.f32 %v527_v31, %v523_v45  ;;  %v530_v10 = vadd.f32 %v528_v29, %v524_v2  ;;  %v539_v27 = vmul.f32 %v538_v26, %v2649_v17  ;;  %s3026_s28 = sld [smem:[#allocation10 + $0x14]] }
  0xa2   :  { %v540_v7 = vmul.f32 %v538_v26, %v2651_v18  ;;  %v458_v9 = vadd.f32 %v456_v43, %v452_v60  ;;  %v463_v28 = vadd.f32 %v461_v53, %v457_v63  ;;  %v467_v49 = vmul.f32 %v466_v14, %v2728_v37 }
  0xa3   :  { %v550_v42 = vstv %s2891_s29  ;;  %v535_v56 = vadd.f32 %v533_v3, %v529_v57  ;;  %v536_v40 = vadd.f32 %v534_v62, %v530_v10  ;;  %v545_v39 = vmul.f32 %v544_v33, %v2653_v19  ;;  %s3028_s29 = sld [smem:[#allocation10 + $0x24]] }
  0xa4   :  { %v546_v15 = vmul.f32 %v544_v33, %v2655_v20  ;;  %v2928_v23 = vadd.f32 %v2858_v0, %v385_v36  ;;  %v2931_v43 = vadd.f32 %v2861_v1, %v386_v5  ;;  %v468_v53 = vmul.f32 %v466_v14, %v2730_v38 }
  0xa5   :  { %v478_v41 = vstv %s2897_s30  ;;  %v484_v57 = vstv %s2900_s8  ;;  %v541_v62 = vadd.f32 %v539_v27, %v535_v56  ;;  %v542_v31 = vadd.f32 %v540_v7, %v536_v40  ;;  %s3032_s30 = sld [smem:[#allocation10 + $0xa3]]  ;;  %s3051_s8 = sld [smem:[#allocation10 + $0x34]] }
  0xa6   :  { %v551_v29 = vmul.f32 %v550_v42, %v2657_v21  ;;  %v464_v60 = vadd.f32 %v462_v6, %v458_v9  ;;  %v469_v0 = vadd.f32 %v467_v49, %v463_v28  ;;  %v473_v1 = vmul.f32 %v472_v11, %v2748_v51 }
  0xa7   :  { %v556_v36 = vstv %s2906_s9  ;;  %v474_v63 = vmul.f32 %v472_v11, %v2788_v61  ;;  %v547_v14 = vadd.f32 %v545_v39, %v541_v62  ;;  %v548_v26 = vadd.f32 %v546_v15, %v542_v31  ;;  %s3053_s9 = sld [smem:[#allocation10 + $0x44]] }
  0xa8   :  { %v552_v45 = vmul.f32 %v550_v42, %v2659_v22  ;;  %v479_v3 = vmul.f32 %v478_v41, %v2812_v30  ;;  %v480_v5 = vmul.f32 %v478_v41, %v2815_v32  ;;  %v2953_v6 = vmul.f32 %v484_v57, %v2819_v34 }
  0xa9   :  { %v2956_v33 = vmul.f32 %v484_v57, %v2829_v52  ;;  %v553_v11 = vadd.f32 %v551_v29, %v547_v14  ;;  %v557_v10 = vmul.f32 %v556_v36, %v2664_v24  ;;  %v562_v27 = vstv %s2915_s0  ;;  %s3067_s0 = sld [smem:[#allocation10 + $0x54]] }
  0xaa   :  { %v470_v7 = vadd.f32 %v468_v53, %v464_v60  ;;  %v475_v9 = vadd.f32 %v473_v1, %v469_v0  ;;  %v605_v28 = vstv %s2921_s4  ;;  %v608_v49 = vstv %s2917_s2  ;;  %s3073_s2 = sld [smem:[#allocation10 + $0xc3]]  ;;  %s3079_s4 = sld [smem:[#allocation10 + $0x64]] }
  0xab   :  { %v554_v42 = vadd.f32 %v552_v45, %v548_v26  ;;  %v558_v56 = vmul.f32 %v556_v36, %v2666_v25  ;;  %v606_v40 = vmul.f32 %v605_v28, %v2597_v46  ;;  %v607_v39 = vmul.f32 %v605_v28, %v2599_v47 }
  0xac   :  { %v563_v15 = vmul.f32 %v562_v27, %v2697_v59  ;;  %v568_v41 = vstv %s2925_s3  ;;  %v612_v53 = vstv %s2935_s5  ;;  %v618_v57 = vstv %s2937_s10  ;;  %s3089_s3 = sld [smem:[#allocation10 + $0x74]]  ;;  %s3094_s5 = sld [smem:[#allocation10 + $0xd3]] }
  0xad   :  { %v559_v62 = vadd.f32 %v557_v10, %v553_v11  ;;  %v609_v31 = vadd.f32 %v608_v49, %v606_v40  ;;  %v610_v29 = vadd.f32 %v608_v49, %v607_v39  ;;  %v624_v60 = vstv %s2941_s12  ;;  %s3098_s10 = sld [smem:[#allocation10 + $0x84]]  ;;  %s3109_s12 = sld [smem:[#allocation10 + $0xe3]] }
  0xae   :  { %v613_v0 = vmul.f32 %v612_v53, %v2601_v48  ;;  %v614_v1 = vmul.f32 %v612_v53, %v2604_v50  ;;  %v619_v36 = vmul.f32 %v618_v57, %v2610_v54  ;;  %v620_v14 = vmul.f32 %v618_v57, %v2612_v55 }
  0xaf   :  { %v476_v26 = vadd.f32 %v474_v63, %v470_v7  ;;  %v560_v45 = vadd.f32 %v558_v56, %v554_v42  ;;  %v564_v28 = vmul.f32 %v562_v27, %v2726_v35  ;;  %v630_v11 = vstv %s2947_s13  ;;  %s3114_s13 = sld [smem:[#allocation10 + $0x94]] }
  0xb0   :  { %v615_v10 = vadd.f32 %v613_v0, %v609_v31  ;;  %v616_v49 = vadd.f32 %v614_v1, %v610_v29  ;;  %v625_v40 = vmul.f32 %v624_v60, %v2617_v58  ;;  %v626_v39 = vmul.f32 %v624_v60, %v2624_v4 }
  0xb1   :  { %v565_v53 = vadd.f32 %v563_v15, %v559_v62  ;;  %v569_v2 = vmul.f32 %v568_v41, %v2728_v37  ;;  %v574_v59 = vstv %s2960_s14  ;;  %v636_v57 = vstv %s2962_s15  ;;  %s3116_s14 = sld [smem:[#allocation13 + $0x2]]  ;;  %s3119_s15 = sld [smem:[#allocation10 + $0xf3]] }
  0xb2   :  { %v621_v63 = vadd.f32 %v619_v36, %v615_v10  ;;  %v622_v27 = vadd.f32 %v620_v14, %v616_v49  ;;  %v631_v7 = vmul.f32 %v630_v11, %v2632_v8  ;;  %v632_v42 = vmul.f32 %v630_v11, %v2637_v12 }
  0xb3   :  { %v490_v56 = vstv %s2966_s16  ;;  %v566_v31 = vadd.f32 %v564_v28, %v560_v45  ;;  %v570_v29 = vmul.f32 %v568_v41, %v2730_v38  ;;  %v642_v15 = vstv %s2971_s17  ;;  %s3127_s16 = sld [smem:[#allocation10 + $0xa4]]  ;;  %s3129_s17 = sld [smem:[#allocation11 + $0x5]] }
  0xb4   :  { %v627_v62 = vadd.f32 %v625_v40, %v621_v63  ;;  %v628_v60 = vadd.f32 %v626_v39, %v622_v27  ;;  %v637_v0 = vmul.f32 %v636_v57, %v2639_v13  ;;  %v638_v1 = vmul.f32 %v636_v57, %v2647_v16 }
  0xb5   :  { %v481_v36 = vadd.f32 %v479_v3, %v475_v9  ;;  %v482_v14 = vadd.f32 %v480_v5, %v476_v26  ;;  %v575_v45 = vmul.f32 %v574_v59, %v2748_v51  ;;  %v648_v28 = vstv %s2978_s18  ;;  %s3133_s18 = sld [smem:[#allocation10 + $0x5]] }
  0xb6   :  { %v571_v41 = vadd.f32 %v569_v2, %v565_v53  ;;  %v633_v11 = vadd.f32 %v631_v7, %v627_v62  ;;  %v634_v10 = vadd.f32 %v632_v42, %v628_v60  ;;  %v643_v49 = vmul.f32 %v642_v15, %v2649_v17  ;;  %v4443_v53 = vld [vmem:[#allocation29_spill] sm:$0xff] }
  0xb7   :  { %v394_v40 = vmax.f32 %v2931_v43, 0.0  ;;  %v576_v39 = vmul.f32 %v574_v59, %v2788_v61  ;;  %v580_v57 = vstv %s2985_s19  ;;  %v644_v63 = vmul.f32 %v642_v15, %v2651_v18  ;;  %s3144_s19 = sld [smem:[#allocation10 + $0x15]] }
  0xb8   :  { %v572_v3 = vadd.f32 %v570_v29, %v566_v31  ;;  %v639_v5 = vadd.f32 %v637_v0, %v633_v11  ;;  %v640_v9 = vadd.f32 %v638_v1, %v634_v10  ;;  %v649_v2 = vmul.f32 %v648_v28, %v2653_v19 }
  0xb9   :  { %v487_v26 = vadd.f32 %v2953_v6, %v481_v36  ;;  %v491_v43 = vmul.f32 %v490_v56, %v2837_v44  ;;  %v492_v59 = vmul.f32 %v490_v56, %v4443_v53  ;;  %v654_v27 = vstv %s2993_s20  ;;  %s3146_s20 = sld [smem:[#allocation10 + $0x25]] }
  0xba   :  { %v488_v7 = vadd.f32 %v2956_v33, %v482_v14  ;;  %v577_v42 = vadd.f32 %v575_v45, %v571_v41  ;;  %v581_v31 = vmul.f32 %v580_v57, %v2812_v30  ;;  %v645_v6 = vadd.f32 %v643_v49, %v639_v5 }
  0xbb   :  { %v582_v29 = vmul.f32 %v580_v57, %v2815_v32  ;;  %v586_v56 = vstv %s2999_s21  ;;  %v646_v15 = vadd.f32 %v644_v63, %v640_v9  ;;  %v650_v62 = vmul.f32 %v648_v28, %v2655_v20  ;;  %s3152_s21 = sld [smem:[#allocation10 + $0xb4]] }
  0xbc   :  { %v578_v60 = vadd.f32 %v576_v39, %v572_v3  ;;  %v592_v0 = vstv %s3002_s23  ;;  %v651_v1 = vadd.f32 %v649_v2, %v645_v6  ;;  %v655_v36 = vmul.f32 %v654_v27, %v2657_v21  ;;  %s3163_s23 = sld [smem:[#allocation10 + $0x35]] }
  0xbd   :  { %v4444_v33 = vmax.f32 %v2928_v23, 0.0  ;;  %v4445_v14 = vstv %s2794_s11  ;;  %v660_v49 = vstv %s3010_s25  ;;  %v3055_v28 = vadd.f32 %v491_v43, %v487_v26  ;;  %s3060_s11 = sld [smem:[#allocation10 + $0xb3]]  ;;  %s3165_s25 = sld [smem:[#allocation10 + $0x45]] }
  0xbe   :  { %v4447_v41 = vmov %v4445_v14  ;;  %v3057_v39 = vadd.f32 %v492_v59, %v488_v7  ;;  %v583_v23 = vadd.f32 %v581_v31, %v577_v42  ;;  %v587_v57 = vmul.f32 %v586_v56, %v2819_v34 }
  0xbf   :  { %v3043_v45 = vmul.f32 %v4445_v14, %v4444_v33  ;;  %v3047_v11 = vmul.f32 %v4447_v41, %v394_v40  ;;  %v588_v40 = vmul.f32 %v586_v56, %v2829_v52  ;;  %v3064_v63 = vmul.f32 %v592_v0, %v2837_v44 }
  0xc0   :  { %v652_v3 = vadd.f32 %v650_v62, %v646_v15  ;;  %v656_v5 = vmul.f32 %v654_v27, %v2659_v22  ;;  %v584_v9 = vadd.f32 %v582_v29, %v578_v60  ;;  %v3070_v2 = vmul.f32 %v592_v0, %v4443_v53 }
  0xc1   :  { %4446 = vst [vmem:[#allocation30_spill] sm:$0xff] %v3043_v45  ;;  %4448 = vst [vmem:[#allocation31_spill] sm:$0xff] %v3047_v11  ;;  %v657_v26 = vadd.f32 %v655_v36, %v651_v1  ;;  %v661_v43 = vmul.f32 %v660_v49, %v2664_v24  ;;  %v709_v59 = vstv %s3020_s27  ;;  %v712_v7 = vstv %s3017_s26  ;;  %s3170_s26 = sld [smem:[#allocation10 + $0xc4]]  ;;  %s3175_s27 = sld [smem:[#allocation10 + $0x55]] }
  0xc2   :  { %v716_v42 = vstv %s3026_s28  ;;  %v722_v31 = vstv %s3028_s29  ;;  %v3081_v6 = vadd.f32 %v587_v57, %v583_v23  ;;  %v666_v27 = vstv %s3032_s30  ;;  %v4449_v23 = vld [vmem:[#allocation22_spill] sm:$0xff]  ;;  %s3185_s28 = sld [smem:[#allocation10 + $0x65]]  ;;  %s3198_s30 = sld [smem:[#allocation10 + $0xd4]] }
  0xc3   :  { %v710_v29 = vmul.f32 %v709_v59, %v2597_v46  ;;  %v711_v56 = vmul.f32 %v709_v59, %v2599_v47  ;;  %v658_v15 = vadd.f32 %v656_v5, %v652_v3  ;;  %v662_v62 = vmul.f32 %v660_v49, %v2666_v25  ;;  %s3193_s29 = sld [smem:[#allocation10 + $0x75]] }
  0xc4   :  { %v717_v60 = vmul.f32 %v716_v42, %v2601_v48  ;;  %v718_v0 = vmul.f32 %v716_v42, %v2604_v50  ;;  %v723_v33 = vmul.f32 %v722_v31, %v2610_v54  ;;  %v724_v14 = vmul.f32 %v722_v31, %v2612_v55 }
  0xc5   :  { %v713_v1 = vadd.f32 %v712_v7, %v710_v29  ;;  %v714_v36 = vadd.f32 %v712_v7, %v711_v56  ;;  %v663_v41 = vadd.f32 %v661_v43, %v657_v26  ;;  %v667_v57 = vmul.f32 %v666_v27, %v4449_v23 }
  0xc6   :  { %v728_v3 = vstv %s3051_s8  ;;  %v734_v49 = vstv %s3053_s9  ;;  %v668_v5 = vmul.f32 %v666_v27, %v2726_v35  ;;  %v672_v59 = vstv %s3060_s11  ;;  %s3207_s8 = sld [smem:[#allocation10 + $0x85]]  ;;  %s3213_s9 = sld [smem:[#allocation10 + $0xe4]] }
  0xc7   :  { %v719_v7 = vadd.f32 %v717_v60, %v713_v1  ;;  %v720_v42 = vadd.f32 %v718_v0, %v714_v36  ;;  %v664_v29 = vadd.f32 %v662_v62, %v658_v15  ;;  %v729_v56 = vmul.f32 %v728_v3, %v2617_v58  ;;  %s3216_s11 = sld [smem:[#allocation10 + $0xf4]] }
  0xc8   :  { %v730_v26 = vmul.f32 %v728_v3, %v2624_v4  ;;  %v740_v43 = vstv %s3067_s0  ;;  %v735_v11 = vmul.f32 %v734_v49, %v2632_v8  ;;  %v736_v45 = vmul.f32 %v734_v49, %v2637_v12  ;;  %s3220_s0 = sld [smem:[#allocation13 + $0x3]] }
  0xc9   :  { %v725_v31 = vadd.f32 %v723_v33, %v719_v7  ;;  %v726_v10 = vadd.f32 %v724_v14, %v720_v42  ;;  %v669_v53 = vadd.f32 %v667_v57, %v663_v41  ;;  %v673_v27 = vmul.f32 %v672_v59, %v2728_v37 }
  0xca   :  { %v678_v35 = vstv %s3073_s2  ;;  %v746_v60 = vstv %s3079_s4  ;;  %v741_v0 = vmul.f32 %v740_v43, %v2639_v13  ;;  %v742_v1 = vmul.f32 %v740_v43, %v2647_v16  ;;  %s3224_s2 = sld [smem:[#allocation10 + $0x95]]  ;;  %s3236_s4 = sld [smem:[#allocation11 + $0x6]] }
  0xcb   :  { %v731_v15 = vadd.f32 %v729_v56, %v725_v31  ;;  %v732_v62 = vadd.f32 %v730_v26, %v726_v10  ;;  %v590_v36 = vadd.f32 %v588_v40, %v584_v9  ;;  %v670_v33 = vadd.f32 %v668_v5, %v664_v29 }
  0xcc   :  { %v674_v14 = vmul.f32 %v672_v59, %v2730_v38  ;;  %v752_v41 = vstv %s3089_s3  ;;  %v747_v10 = vmul.f32 %v746_v60, %v2649_v17  ;;  %v748_v49 = vmul.f32 %v746_v60, %v2651_v18  ;;  %s3239_s3 = sld [smem:[#allocation10 + $0x6]] }
  0xcd   :  { %v737_v57 = vadd.f32 %v735_v11, %v731_v15  ;;  %v738_v3 = vadd.f32 %v736_v45, %v732_v62  ;;  %v675_v7 = vadd.f32 %v673_v27, %v669_v53  ;;  %v679_v42 = vmul.f32 %v678_v35, %v2748_v51 }
  0xce   :  { %v684_v56 = vstv %s3094_s5  ;;  %v758_v26 = vstv %s3098_s10  ;;  %v753_v5 = vmul.f32 %v752_v41, %v2653_v19  ;;  %v754_v45 = vmul.f32 %v752_v41, %v2655_v20  ;;  %s3255_s5 = sld [smem:[#allocation10 + $0x26]]  ;;  %s3260_s10 = sld [smem:[#allocation10 + $0xa5]] }
  0xcf   :  { %v743_v40 = vadd.f32 %v741_v0, %v737_v57  ;;  %v744_v9 = vadd.f32 %v742_v1, %v738_v3  ;;  %v495_v11 = vmax.f32 %v3055_v28, 0.0  ;;  %v3139_v59 = vadd.f32 %v3064_v63, %v3081_v6 }
  0xd0   :  { %v3142_v29 = vadd.f32 %v3070_v2, %v590_v36  ;;  %v676_v43 = vadd.f32 %v674_v14, %v670_v33  ;;  %v680_v28 = vmul.f32 %v678_v35, %v2788_v61  ;;  %v681_v60 = vadd.f32 %v679_v42, %v675_v7  ;;  %v4452_v14 = vld [vmem:[#allocation23_spill] sm:$0xff] }
  0xd1   :  { %v749_v31 = vadd.f32 %v747_v10, %v743_v40  ;;  %v750_v27 = vadd.f32 %v748_v49, %v744_v9  ;;  %v685_v63 = vmul.f32 %v684_v56, %v2812_v30  ;;  %v690_v6 = vstv %s3109_s12  ;;  %s3275_s12 = sld [smem:[#allocation10 + $0x36]] }
  0xd2   :  { %v759_v15 = vmul.f32 %v758_v26, %v2657_v21  ;;  %v760_v0 = vmul.f32 %v758_v26, %v2659_v22  ;;  %v764_v1 = vstv %s3114_s13  ;;  %v4450_v36 = vstv %s3006_s24  ;;  %s3277_s13 = sld [smem:[#allocation10 + $0x46]] }
  0xd3   :  { %v755_v2 = vadd.f32 %v753_v5, %v749_v31  ;;  %v756_v62 = vadd.f32 %v754_v45, %v750_v27  ;;  %v3158_v33 = vmul.f32 %v4450_v36, %v495_v11  ;;  %v696_v41 = vstv %s3119_s15  ;;  %s3289_s15 = sld [smem:[#allocation10 + $0x56]] }
  0xd4   :  { %v682_v3 = vadd.f32 %v680_v28, %v676_v43  ;;  %v686_v10 = vmul.f32 %v684_v56, %v2815_v32  ;;  %v691_v49 = vmul.f32 %v690_v6, %v2819_v34  ;;  %v692_v7 = vmul.f32 %v690_v6, %v2829_v52 }
  0xd5   :  { %4451 = vst [vmem:[#allocation32_spill] sm:$0xff] %v3158_v33  ;;  %v761_v42 = vadd.f32 %v759_v15, %v755_v2  ;;  %v765_v26 = vmul.f32 %v764_v1, %v2664_v24  ;;  %v770_v40 = vstv %s3127_s16  ;;  %v687_v9 = vadd.f32 %v685_v63, %v681_v60  ;;  %s3295_s16 = sld [smem:[#allocation10 + $0xc5]] }
  0xd6   :  { %v3178_v5 = vmul.f32 %v696_v41, %v2837_v44  ;;  %v762_v45 = vadd.f32 %v760_v0, %v756_v62  ;;  %v766_v56 = vmul.f32 %v764_v1, %v2666_v25  ;;  %v813_v11 = vstv %s3133_s18  ;;  %s3309_s18 = sld [smem:[#allocation10 + $0x76]] }
  0xd7   :  { %v816_v43 = vstv %s3129_s17  ;;  %v820_v28 = vstv %s3144_s19  ;;  %v826_v31 = vstv %s3146_s20  ;;  %v688_v27 = vadd.f32 %v686_v10, %v682_v3  ;;  %s3301_s17 = sld [smem:[#allocation10 + $0x66]]  ;;  %s3314_s19 = sld [smem:[#allocation10 + $0xd5]] }
  0xd8   :  { %v771_v6 = vmul.f32 %v770_v40, %v4449_v23  ;;  %v814_v15 = vmul.f32 %v813_v11, %v2597_v46  ;;  %v815_v60 = vmul.f32 %v813_v11, %v2599_v47  ;;  %v767_v63 = vadd.f32 %v765_v26, %v761_v42  ;;  %s3318_s20 = sld [smem:[#allocation10 + $0x86]] }
  0xd9   :  { %v776_v2 = vstv %s3152_s21  ;;  %v821_v62 = vmul.f32 %v820_v28, %v2601_v48  ;;  %v822_v0 = vmul.f32 %v820_v28, %v2604_v50  ;;  %v827_v3 = vmul.f32 %v826_v31, %v2610_v54  ;;  %s3325_s21 = sld [smem:[#allocation10 + $0x96]] }
  0xda   :  { %v817_v1 = vadd.f32 %v816_v43, %v814_v15  ;;  %v818_v36 = vadd.f32 %v816_v43, %v815_v60  ;;  %v828_v10 = vmul.f32 %v826_v31, %v2612_v55  ;;  %v768_v57 = vadd.f32 %v766_v56, %v762_v45 }
  0xdb   :  { %v772_v35 = vmul.f32 %v770_v40, %v4452_v14  ;;  %v832_v42 = vstv %s3163_s23  ;;  %v838_v26 = vstv %s3165_s25  ;;  %v777_v11 = vmul.f32 %v776_v2, %v2728_v37  ;;  %v4453_v37 = vld [vmem:[#allocation29_spill] sm:$0xff]  ;;  %s3331_s23 = sld [smem:[#allocation10 + $0xe5]]  ;;  %s3336_s25 = sld [smem:[#allocation13 + $0x4]] }
  0xdc   :  { %v782_v53 = vstv %s3170_s26  ;;  %v823_v28 = vadd.f32 %v821_v62, %v817_v1  ;;  %v824_v33 = vadd.f32 %v822_v0, %v818_v36  ;;  %v773_v15 = vadd.f32 %v771_v6, %v767_v63  ;;  %s3340_s26 = sld [smem:[#allocation10 + $0xa6]] }
  0xdd   :  { %v833_v43 = vmul.f32 %v832_v42, %v2617_v58  ;;  %v834_v60 = vmul.f32 %v832_v42, %v2624_v4  ;;  %v844_v23 = vstv %s3175_s27  ;;  %v839_v56 = vmul.f32 %v838_v26, %v2632_v8  ;;  %s3344_s27 = sld [smem:[#allocation11 + $0x7]] }
  0xde   :  { %v829_v45 = vadd.f32 %v827_v3, %v823_v28  ;;  %v830_v40 = vadd.f32 %v828_v10, %v824_v33  ;;  %v840_v31 = vmul.f32 %v838_v26, %v2637_v12  ;;  %v698_v14 = vmul.f32 %v696_v41, %v4453_v37 }
  0xdf   :  { %v774_v55 = vadd.f32 %v772_v35, %v768_v57  ;;  %v778_v62 = vmul.f32 %v776_v2, %v2730_v38  ;;  %v850_v6 = vstv %s3185_s28  ;;  %v845_v33 = vmul.f32 %v844_v23, %v2639_v13  ;;  %s3349_s28 = sld [smem:[#allocation10 + $0xf5]] }
  0xe0   :  { %v835_v63 = vadd.f32 %v833_v43, %v829_v45  ;;  %v836_v0 = vadd.f32 %v834_v60, %v830_v40  ;;  %v846_v1 = vmul.f32 %v844_v23, %v2647_v16  ;;  %v693_v36 = vadd.f32 %v691_v49, %v687_v9 }
  0xe1   :  { %v694_v41 = vadd.f32 %v692_v7, %v688_v27  ;;  %v783_v35 = vmul.f32 %v782_v53, %v2748_v51  ;;  %v856_v57 = vstv %s3193_s29  ;;  %v779_v2 = vadd.f32 %v777_v11, %v773_v15  ;;  %s3353_s29 = sld [smem:[#allocation10 + $0x7]] }
  0xe2   :  { %v841_v3 = vadd.f32 %v839_v56, %v835_v63  ;;  %v842_v10 = vadd.f32 %v840_v31, %v836_v0  ;;  %v851_v42 = vmul.f32 %v850_v6, %v2649_v17  ;;  %v4454_v26 = vmax.f32 %v3057_v39, 0.0 }
  0xe3   :  { %v4455_v23 = vstv %s3006_s24  ;;  %v784_v49 = vmul.f32 %v782_v53, %v2788_v61  ;;  %v788_v7 = vstv %s3198_s30  ;;  %v852_v9 = vmul.f32 %v850_v6, %v2651_v18  ;;  %s3253_s24 = sld [smem:[#allocation10 + $0x16]]  ;;  %s3363_s30 = sld [smem:[#allocation10 + $0x17]] }
  0xe4   :  { %v3231_v28 = vmul.f32 %v4455_v23, %v4454_v26  ;;  %v780_v27 = vadd.f32 %v778_v62, %v774_v55  ;;  %v847_v43 = vadd.f32 %v845_v33, %v841_v3  ;;  %v848_v11 = vadd.f32 %v846_v1, %v842_v10 }
  0xe5   :  { %v857_v15 = vmul.f32 %v856_v57, %v2653_v19  ;;  %v4457_v39 = vmax.f32 %v3139_v59, 0.0  ;;  %v4458_v60 = vstv %s3116_s14  ;;  %v4459_v40 = vmax.f32 %v3142_v29, 0.0  ;;  %s3282_s14 = sld [smem:[#allocation10 + $0xb5]] }
  0xe6   :  { %4456 = vst [vmem:[#allocation33_spill] sm:$0xff] %v3231_v28  ;;  %v4460_v53 = vmov %v4458_v60  ;;  %v3250_v31 = vadd.f32 %v3178_v5, %v693_v36  ;;  %v862_v55 = vstv %s3207_s8  ;;  %v3257_v62 = vadd.f32 %v698_v14, %v694_v41  ;;  %v4461_v14 = vld [vmem:[#allocation30_spill] sm:$0xff]  ;;  %v4468_v28 = vld [vmem:[#allocation24_spill] sm:$0xff]  ;;  %s3365_s8 = sld [smem:[#allocation10 + $0x27]] }
  0xe7   :  { %v600_v45 = vmul.f32 %v4458_v60, %v4457_v39  ;;  %v601_v56 = vmul.f32 %v4460_v53, %v4459_v40  ;;  %v785_v59 = vadd.f32 %v783_v35, %v779_v2  ;;  %v789_v6 = vmul.f32 %v788_v7, %v2812_v30  ;;  %v4463_v35 = vld [vmem:[#allocation31_spill] sm:$0xff] }
  0xe8   :  { %v853_v63 = vadd.f32 %v851_v42, %v847_v43  ;;  %v790_v29 = vmul.f32 %v788_v7, %v2815_v32  ;;  %v794_v0 = vstv %s3213_s9  ;;  %v854_v5 = vadd.f32 %v852_v9, %v848_v11  ;;  %s3368_s9 = sld [smem:[#allocation10 + $0xb6]] }
  0xe9   :  { %v858_v33 = vmul.f32 %v856_v57, %v2655_v20  ;;  %v786_v1 = vadd.f32 %v784_v49, %v780_v27  ;;  %v800_v36 = vstv %s3216_s11  ;;  %v863_v10 = vmul.f32 %v862_v55, %v2657_v21  ;;  %s3389_s11 = sld [smem:[#allocation10 + $0x37]] }
  0xea   :  { %v859_v3 = vadd.f32 %v857_v15, %v853_v63  ;;  %v3268_v41 = vadd.f32 %v600_v45, %v4461_v14  ;;  %v3271_v2 = vadd.f32 %v601_v56, %v4463_v35  ;;  %v868_v26 = vstv %s3224_s2  ;;  %v4465_v14 = vld [vmem:[#allocation20_spill] sm:$0xff]  ;;  %s3391_s2 = sld [smem:[#allocation10 + $0x47]] }
  0xeb   :  { %v791_v49 = vadd.f32 %v789_v6, %v785_v59  ;;  %v795_v7 = vmul.f32 %v794_v0, %v2819_v34  ;;  %v796_v9 = vmul.f32 %v794_v0, %v2829_v52  ;;  %v3286_v27 = vmul.f32 %v800_v36, %v2837_v44 }
  0xec   :  { %4462 = vst [vmem:[#allocation30_spill] sm:$0xff] %v3268_v41  ;;  %4464 = vst [vmem:[#allocation31_spill] sm:$0xff] %v3271_v2  ;;  %v860_v43 = vadd.f32 %v858_v33, %v854_v5  ;;  %v864_v11 = vmul.f32 %v862_v55, %v2659_v22  ;;  %v792_v15 = vadd.f32 %v790_v29, %v786_v1  ;;  %v917_v40 = vstv %s3239_s3  ;;  %s3404_s3 = sld [smem:[#allocation10 + $0xd6]] }
  0xed   :  { %v3292_v39 = vmul.f32 %v800_v36, %v4453_v37  ;;  %v865_v60 = vadd.f32 %v863_v10, %v859_v3  ;;  %v869_v45 = vmul.f32 %v868_v26, %v2664_v24  ;;  %v920_v53 = vstv %s3236_s4  ;;  %s3400_s4 = sld [smem:[#allocation10 + $0x57]] }
  0xee   :  { %v924_v56 = vstv %s3253_s24  ;;  %v930_v59 = vstv %s3255_s5  ;;  %v797_v6 = vadd.f32 %v795_v7, %v791_v49  ;;  %v874_v55 = vstv %s3260_s10  ;;  %v4466_v7 = vld [vmem:[#allocation22_spill] sm:$0xff]  ;;  %s3410_s24 = sld [smem:[#allocation10 + $0x67]]  ;;  %s3421_s5 = sld [smem:[#allocation10 + $0xe6]] }
  0xef   :  { %v918_v63 = vmul.f32 %v917_v40, %v2597_v46  ;;  %v919_v29 = vmul.f32 %v917_v40, %v2599_v47  ;;  %v866_v0 = vadd.f32 %v864_v11, %v860_v43  ;;  %v870_v5 = vmul.f32 %v868_v26, %v2666_v25  ;;  %v4467_v11 = vld [vmem:[#allocation23_spill] sm:$0xff]  ;;  %s3427_s10 = sld [smem:[#allocation10 + $0x77]] }
  0xf0   :  { %v925_v33 = vmul.f32 %v924_v56, %v2601_v48  ;;  %v926_v1 = vmul.f32 %v924_v56, %v2604_v50  ;;  %v931_v10 = vmul.f32 %v930_v59, %v2610_v54  ;;  %v932_v35 = vmul.f32 %v930_v59, %v4465_v14 }
  0xf1   :  { %v921_v36 = vadd.f32 %v920_v53, %v918_v63  ;;  %v922_v3 = vadd.f32 %v920_v53, %v919_v29  ;;  %v871_v49 = vadd.f32 %v869_v45, %v865_v60  ;;  %v875_v40 = vmul.f32 %v874_v55, %v4466_v7 }
  0xf2   :  { %v936_v43 = vstv %s3275_s12  ;;  %v942_v26 = vstv %s3277_s13  ;;  %v876_v56 = vmul.f32 %v874_v55, %v4467_v11  ;;  %v880_v23 = vstv %s3282_s14  ;;  %s3436_s12 = sld [smem:[#allocation10 + $0xf6]]  ;;  %s3441_s13 = sld [smem:[#allocation10 + $0x87]] }
  0xf3   :  { %v927_v53 = vadd.f32 %v925_v33, %v921_v36  ;;  %v928_v63 = vadd.f32 %v926_v1, %v922_v3  ;;  %v872_v29 = vadd.f32 %v870_v5, %v866_v0  ;;  %v937_v42 = vmul.f32 %v936_v43, %v2617_v58  ;;  %s3443_s14 = sld [smem:[#allocation13 + $0x5]] }
  0xf4   :  { %v938_v60 = vmul.f32 %v936_v43, %v2624_v4  ;;  %v948_v45 = vstv %s3289_s15  ;;  %v943_v2 = vmul.f32 %v942_v26, %v2632_v8  ;;  %v944_v41 = vmul.f32 %v942_v26, %v2637_v12  ;;  %s3447_s15 = sld [smem:[#allocation13 + $0x6]] }
  0xf5   :  { %v933_v59 = vadd.f32 %v931_v10, %v927_v53  ;;  %v934_v57 = vadd.f32 %v932_v35, %v928_v63  ;;  %v877_v55 = vadd.f32 %v875_v40, %v871_v49  ;;  %v881_v37 = vmul.f32 %v880_v23, %v4468_v28 }
  0xf6   :  { %v886_v33 = vstv %s3295_s16  ;;  %v954_v0 = vstv %s3301_s17  ;;  %v949_v36 = vmul.f32 %v948_v45, %v2639_v13  ;;  %v950_v3 = vmul.f32 %v948_v45, %v2647_v16  ;;  %s3450_s16 = sld [smem:[#allocation11 + $0x8]]  ;;  %s3457_s17 = sld [smem:[#allocation10 + $0x97]] }
  0xf7   :  { %v939_v5 = vadd.f32 %v937_v42, %v933_v59  ;;  %v940_v1 = vadd.f32 %v938_v60, %v934_v57  ;;  %v798_v10 = vadd.f32 %v796_v9, %v792_v15  ;;  %v878_v35 = vadd.f32 %v876_v56, %v872_v29 }
  0xf8   :  { %v882_v49 = vmul.f32 %v880_v23, %v2730_v38  ;;  %v960_v40 = vstv %s3309_s18  ;;  %v955_v42 = vmul.f32 %v954_v0, %v2649_v17  ;;  %v956_v57 = vmul.f32 %v954_v0, %v2651_v18  ;;  %s3459_s18 = sld [smem:[#allocation10 + $0x8]] }
  0xf9   :  { %v945_v43 = vadd.f32 %v943_v2, %v939_v5  ;;  %v946_v26 = vadd.f32 %v944_v41, %v940_v1  ;;  %v883_v53 = vadd.f32 %v881_v37, %v877_v55  ;;  %v887_v63 = vmul.f32 %v886_v33, %v2748_v51 }
  0xfa   :  { %v892_v60 = vstv %s3314_s19  ;;  %v966_v9 = vstv %s3318_s20  ;;  %v961_v2 = vmul.f32 %v960_v40, %v2653_v19  ;;  %v962_v41 = vmul.f32 %v960_v40, %v2655_v20  ;;  %s3475_s19 = sld [smem:[#allocation10 + $0x18]] }
  0xfb   :  { %v951_v23 = vadd.f32 %v949_v36, %v945_v43  ;;  %v952_v15 = vadd.f32 %v950_v3, %v946_v26  ;;  %v3356_v56 = vadd.f32 %v3286_v27, %v797_v6  ;;  %v3359_v37 = vadd.f32 %v3292_v39, %v798_v10  ;;  %s3477_s20 = sld [smem:[#allocation10 + $0x28]] }
  0xfc   :  { %v888_v29 = vmul.f32 %v886_v33, %v2788_v61  ;;  %v972_v45 = vstv %s3325_s21  ;;  %v884_v59 = vadd.f32 %v882_v49, %v878_v35  ;;  %v967_v5 = vmul.f32 %v966_v9, %v2657_v21  ;;  %s3486_s21 = sld [smem:[#allocation10 + $0xa7]] }
  0xfd   :  { %v957_v55 = vadd.f32 %v955_v42, %v951_v23  ;;  %v958_v0 = vadd.f32 %v956_v57, %v952_v15  ;;  %v4469_v27 = vmax.f32 %v3250_v31, 0.0  ;;  %v4470_v39 = vstv %s3220_s0  ;;  %s3395_s0 = sld [smem:[#allocation10 + $0xc6]] }
  0xfe   :  { %v893_v33 = vmul.f32 %v892_v60, %v2812_v30  ;;  %v898_v1 = vstv %s3331_s23  ;;  %v968_v36 = vmul.f32 %v966_v9, %v2659_v22  ;;  %v889_v3 = vadd.f32 %v887_v63, %v883_v53  ;;  %s3501_s23 = sld [smem:[#allocation10 + $0x38]] }
  0xff   :  { %v3374_v6 = vmul.f32 %v4470_v39, %v4469_v27  ;;  %v963_v10 = vadd.f32 %v961_v2, %v957_v55  ;;  %v964_v35 = vadd.f32 %v962_v41, %v958_v0  ;;  %v973_v49 = vmul.f32 %v972_v45, %v2664_v24 }
 0x100   :  { %v4471_v40 = vmax.f32 %v3257_v62, 0.0  ;;  %v4472_v43 = vmov %v4470_v39  ;;  %v978_v57 = vstv %s3340_s26  ;;  %v890_v63 = vadd.f32 %v888_v29, %v884_v59  ;;  %s3508_s26 = sld [smem:[#allocation10 + $0xb7]] }
 0x101   :  { %v894_v62 = vmul.f32 %v892_v60, %v2815_v32  ;;  %v969_v9 = vadd.f32 %v967_v5, %v963_v10  ;;  %v899_v23 = vmul.f32 %v898_v1, %v2819_v34  ;;  %v900_v15 = vmul.f32 %v898_v1, %v2829_v52 }
 0x102   :  { %v3384_v26 = vmul.f32 %v4472_v43, %v4471_v40  ;;  %v970_v2 = vadd.f32 %v968_v36, %v964_v35  ;;  %v974_v41 = vmul.f32 %v972_v45, %v2666_v25  ;;  %v895_v55 = vadd.f32 %v893_v33, %v889_v3 }
 0x103   :  { %v904_v0 = vstv %s3349_s28  ;;  %v975_v29 = vadd.f32 %v973_v49, %v969_v9  ;;  %v979_v59 = vmul.f32 %v978_v57, %v4466_v7  ;;  %v1021_v60 = vstv %s3353_s29  ;;  %s3523_s28 = sld [smem:[#allocation10 + $0x68]]  ;;  %s3529_s29 = sld [smem:[#allocation10 + $0xc7]] }
 0x104   :  { %v1024_v5 = vstv %s3344_s27  ;;  %v1028_v27 = vstv %s3363_s30  ;;  %v1034_v39 = vstv %s3365_s8  ;;  %v896_v1 = vadd.f32 %v894_v62, %v890_v63  ;;  %s3515_s27 = sld [smem:[#allocation10 + $0x58]] }
 0x105   :  { %v984_v36 = vstv %s3368_s9  ;;  %v1022_v45 = vmul.f32 %v1021_v60, %v2597_v46  ;;  %v1023_v33 = vmul.f32 %v1021_v60, %v2599_v47  ;;  %v976_v3 = vadd.f32 %v974_v41, %v970_v2  ;;  %s3533_s30 = sld [smem:[#allocation10 + $0x78]]  ;;  %s3544_s9 = sld [smem:[#allocation10 + $0xd7]] }
 0x106   :  { %v980_v10 = vmul.f32 %v978_v57, %v4467_v11  ;;  %v1029_v35 = vmul.f32 %v1028_v27, %v2601_v48  ;;  %v1030_v49 = vmul.f32 %v1028_v27, %v2604_v50  ;;  %v1035_v9 = vmul.f32 %v1034_v39, %v2610_v54  ;;  %s3540_s8 = sld [smem:[#allocation10 + $0x88]] }
 0x107   :  { %v1025_v40 = vadd.f32 %v1024_v5, %v1022_v45  ;;  %v1026_v43 = vadd.f32 %v1024_v5, %v1023_v33  ;;  %v1036_v63 = vmul.f32 %v1034_v39, %v4465_v14  ;;  %v981_v62 = vadd.f32 %v979_v59, %v975_v29 }
 0x108   :  { %v985_v53 = vmul.f32 %v984_v36, %v4468_v28  ;;  %v1040_v60 = vstv %s3389_s11  ;;  %v1046_v2 = vstv %s3391_s2  ;;  %v986_v57 = vmul.f32 %v984_v36, %v2730_v38  ;;  %s3549_s11 = sld [smem:[#allocation10 + $0x98]]  ;;  %s3556_s2 = sld [smem:[#allocation10 + $0xe7]] }
 0x109   :  { %v990_v41 = vstv %s3395_s0  ;;  %v1031_v27 = vadd.f32 %v1029_v35, %v1025_v40  ;;  %v1032_v45 = vadd.f32 %v1030_v49, %v1026_v43  ;;  %v982_v5 = vadd.f32 %v980_v10, %v976_v3  ;;  %s3559_s0 = sld [smem:[#allocation10 + $0xa8]] }
 0x10a   :  { %v1041_v33 = vmul.f32 %v1040_v60, %v2617_v58  ;;  %v1042_v29 = vmul.f32 %v1040_v60, %v2624_v4  ;;  %v1052_v59 = vstv %s3400_s4  ;;  %v1047_v31 = vmul.f32 %v1046_v2, %v2632_v8  ;;  %s3568_s4 = sld [smem:[#allocation11 + $0x9]] }
 0x10b   :  { %v1037_v39 = vadd.f32 %v1035_v9, %v1031_v27  ;;  %v1038_v42 = vadd.f32 %v1036_v63, %v1032_v45  ;;  %v1048_v28 = vmul.f32 %v1046_v2, %v2637_v12  ;;  %v987_v11 = vadd.f32 %v985_v53, %v981_v62  ;;  %v4473_v63 = vld [vmem:[#allocation29_spill] sm:$0xff] }
 0x10c   :  { %v991_v36 = vmul.f32 %v990_v41, %v2748_v51  ;;  %v996_v38 = vstv %s3404_s3  ;;  %v1058_v35 = vstv %s3410_s24  ;;  %v1053_v10 = vmul.f32 %v1052_v59, %v2639_v13  ;;  %s3574_s3 = sld [smem:[#allocation10 + $0xf7]]  ;;  %s3579_s24 = sld [smem:[#allocation10 + $0xb8]] }
 0x10d   :  { %v1043_v49 = vadd.f32 %v1041_v33, %v1037_v39  ;;  %v1044_v3 = vadd.f32 %v1042_v29, %v1038_v42  ;;  %v1054_v40 = vmul.f32 %v1052_v59, %v2647_v16  ;;  %v901_v43 = vadd.f32 %v899_v23, %v895_v55 }
 0x10e   :  { %v902_v9 = vadd.f32 %v900_v15, %v896_v1  ;;  %v905_v53 = vmul.f32 %v904_v0, %v2837_v44  ;;  %v906_v62 = vmul.f32 %v904_v0, %v4473_v63  ;;  %v988_v60 = vadd.f32 %v986_v57, %v982_v5 }
 0x10f   :  { %v992_v42 = vmul.f32 %v990_v41, %v2788_v61  ;;  %v1049_v2 = vadd.f32 %v1047_v31, %v1043_v49  ;;  %v1050_v27 = vadd.f32 %v1048_v28, %v1044_v3  ;;  %v993_v45 = vadd.f32 %v991_v36, %v987_v11  ;;  %v4474_v31 = vld [vmem:[#allocation32_spill] sm:$0xff] }
 0x110   :  { %v997_v23 = vmul.f32 %v996_v38, %v2812_v30  ;;  %v1002_v15 = vstv %s3421_s5  ;;  %v1059_v55 = vmul.f32 %v1058_v35, %v2649_v17  ;;  %v1060_v0 = vmul.f32 %v1058_v35, %v2651_v18  ;;  %v4479_v35 = vld [vmem:[#allocation33_spill] sm:$0xff]  ;;  %s3581_s5 = sld [smem:[#allocation10 + $0x9]] }
 0x111   :  { %v1055_v1 = vadd.f32 %v1053_v10, %v1049_v2  ;;  %v1056_v33 = vadd.f32 %v1054_v40, %v1050_v27  ;;  %v1064_v57 = vstv %s3427_s10  ;;  %v3463_v28 = vadd.f32 %v3374_v6, %v4474_v31  ;;  %v4480_v31 = vld [vmem:[#allocation30_spill] sm:$0xff]  ;;  %s3586_s10 = sld [smem:[#allocation10 + $0x19]] }
 0x112   :  { %v4475_v11 = vmax.f32 %v3356_v56, 0.0  ;;  %v4476_v41 = vstv %s3336_s25  ;;  %v4477_v29 = vmax.f32 %v3359_v37, 0.0  ;;  %v3473_v36 = vadd.f32 %v905_v53, %v901_v43  ;;  %s3503_s25 = sld [smem:[#allocation10 + $0x48]] }
 0x113   :  { %v4478_v59 = vmov %v4476_v41  ;;  %v3481_v49 = vadd.f32 %v3384_v26, %v4479_v35  ;;  %v3483_v6 = vadd.f32 %v906_v62, %v902_v9  ;;  %v994_v56 = vadd.f32 %v992_v42, %v988_v60  ;;  %v4482_v62 = vld [vmem:[#allocation31_spill] sm:$0xff] }
 0x114   :  { %v808_v5 = vmul.f32 %v4476_v41, %v4475_v11  ;;  %v809_v39 = vmul.f32 %v4478_v59, %v4477_v29  ;;  %v998_v3 = vmul.f32 %v996_v38, %v2815_v32  ;;  %v1003_v37 = vmul.f32 %v1002_v15, %v2819_v34 }
 0x115   :  { %v1008_v10 = vstv %s3436_s12  ;;  %v1061_v40 = vadd.f32 %v1059_v55, %v1055_v1  ;;  %v1065_v43 = vmul.f32 %v1064_v57, %v2653_v19  ;;  %v999_v53 = vadd.f32 %v997_v23, %v993_v45  ;;  %s3588_s12 = sld [smem:[#allocation10 + $0x29]] }
 0x116   :  { %v1062_v2 = vadd.f32 %v1060_v0, %v1056_v33  ;;  %v1066_v26 = vmul.f32 %v1064_v57, %v2655_v20  ;;  %v1070_v27 = vstv %s3441_s13  ;;  %v3494_v9 = vadd.f32 %v808_v5, %v4480_v31  ;;  %s3592_s13 = sld [smem:[#allocation10 + $0xc8]] }
 0x117   :  { %v3497_v60 = vadd.f32 %v809_v39, %v4482_v62  ;;  %v1000_v23 = vadd.f32 %v998_v3, %v994_v56  ;;  %v1004_v55 = vmul.f32 %v1002_v15, %v2829_v52  ;;  %v1009_v33 = vmul.f32 %v1008_v10, %v2837_v44 }
 0x118   :  { %4481 = vst [vmem:[#allocation20_spill] sm:$0xff] %v3494_v9  ;;  %v3512_v0 = vmul.f32 %v1008_v10, %v4473_v63  ;;  %v1067_v57 = vadd.f32 %v1065_v43, %v1061_v40  ;;  %v1071_v11 = vmul.f32 %v1070_v27, %v2657_v21  ;;  %v1005_v41 = vadd.f32 %v1003_v37, %v999_v53 }
 0x119   :  { %4483 = vst [vmem:[#allocation32_spill] sm:$0xff] %v3497_v60  ;;  %v1068_v5 = vadd.f32 %v1066_v26, %v1062_v2  ;;  %v1072_v29 = vmul.f32 %v1070_v27, %v2659_v22  ;;  %v1076_v59 = vstv %s3457_s17  ;;  %v1125_v15 = vstv %s3459_s18  ;;  %s3605_s17 = sld [smem:[#allocation10 + $0x49]] }
 0x11a   :  { %v1128_v39 = vstv %s3450_s16  ;;  %v1132_v35 = vstv %s3475_s19  ;;  %v1138_v56 = vstv %s3477_s20  ;;  %v1006_v3 = vadd.f32 %v1004_v55, %v1000_v23  ;;  %s3603_s16 = sld [smem:[#allocation10 + $0x39]]  ;;  %s3615_s19 = sld [smem:[#allocation10 + $0xd8]] }
 0x11b   :  { %v1082_v10 = vstv %s3486_s21  ;;  %v1126_v40 = vmul.f32 %v1125_v15, %v2597_v46  ;;  %v1127_v43 = vmul.f32 %v1125_v15, %v2599_v47  ;;  %v1073_v31 = vadd.f32 %v1071_v11, %v1067_v57  ;;  %s3611_s18 = sld [smem:[#allocation10 + $0x59]]  ;;  %s3632_s21 = sld [smem:[#allocation10 + $0xe8]] }
 0x11c   :  { %v1077_v37 = vmul.f32 %v1076_v59, %v2664_v24  ;;  %v1133_v53 = vmul.f32 %v1132_v35, %v2601_v48  ;;  %v1134_v2 = vmul.f32 %v1132_v35, %v2604_v50  ;;  %v1139_v62 = vmul.f32 %v1138_v56, %v2610_v54  ;;  %s3621_s20 = sld [smem:[#allocation10 + $0x69]] }
 0x11d   :  { %v1129_v26 = vadd.f32 %v1128_v39, %v1126_v40  ;;  %v1130_v27 = vadd.f32 %v1128_v39, %v1127_v43  ;;  %v1140_v23 = vmul.f32 %v1138_v56, %v4465_v14  ;;  %v1074_v55 = vadd.f32 %v1072_v29, %v1068_v5 }
 0x11e   :  { %v1078_v57 = vmul.f32 %v1076_v59, %v2666_v25  ;;  %v1144_v11 = vstv %s3501_s23  ;;  %v1150_v15 = vstv %s3503_s25  ;;  %v1083_v1 = vmul.f32 %v1082_v10, %v4466_v7  ;;  %s3637_s23 = sld [smem:[#allocation10 + $0x79]]  ;;  %s3646_s25 = sld [smem:[#allocation10 + $0xf8]] }
 0x11f   :  { %v1088_v45 = vstv %s3508_s26  ;;  %v1135_v35 = vadd.f32 %v1133_v53, %v1129_v26  ;;  %v1136_v42 = vadd.f32 %v1134_v2, %v1130_v27  ;;  %v1079_v40 = vadd.f32 %v1077_v37, %v1073_v31  ;;  %v4484_v37 = vld [vmem:[#allocation23_spill] sm:$0xff]  ;;  %s3651_s26 = sld [smem:[#allocation10 + $0x89]] }
 0x120   :  { %v1145_v39 = vmul.f32 %v1144_v11, %v2617_v58  ;;  %v1146_v56 = vmul.f32 %v1144_v11, %v2624_v4  ;;  %v1156_v5 = vstv %s3515_s27  ;;  %v1151_v43 = vmul.f32 %v1150_v15, %v2632_v8  ;;  %s3655_s27 = sld [smem:[#allocation13 + $0x7]] }
 0x121   :  { %v1141_v29 = vadd.f32 %v1139_v62, %v1135_v35  ;;  %v1142_v59 = vadd.f32 %v1140_v23, %v1136_v42  ;;  %v1152_v53 = vmul.f32 %v1150_v15, %v2637_v12  ;;  %v3553_v26 = vadd.f32 %v1009_v33, %v1005_v41  ;;  %v4485_v35 = vld [vmem:[#allocation24_spill] sm:$0xff] }
 0x122   :  { %v1080_v31 = vadd.f32 %v1078_v57, %v1074_v55  ;;  %v1084_v2 = vmul.f32 %v1082_v10, %v4484_v37  ;;  %v1162_v27 = vstv %s3523_s28  ;;  %v1157_v42 = vmul.f32 %v1156_v5, %v2639_v13  ;;  %s3658_s28 = sld [smem:[#allocation11 + $0xa]] }
 0x123   :  { %v1147_v11 = vadd.f32 %v1145_v39, %v1141_v29  ;;  %v1148_v38 = vadd.f32 %v1146_v56, %v1142_v59  ;;  %v1158_v62 = vmul.f32 %v1156_v5, %v2647_v16  ;;  %v1085_v23 = vadd.f32 %v1083_v1, %v1079_v40  ;;  %v4486_v5 = vld [vmem:[#allocation25_spill] sm:$0xff] }
 0x124   :  { %v1089_v15 = vmul.f32 %v1088_v45, %v4485_v35  ;;  %v1094_v33 = vstv %s3529_s29  ;;  %v1168_v41 = vstv %s3533_s30  ;;  %v1163_v10 = vmul.f32 %v1162_v27, %v2649_v17  ;;  %s3665_s29 = sld [smem:[#allocation10 + $0x99]]  ;;  %s3667_s30 = sld [smem:[#allocation10 + $0xa]] }
 0x125   :  { %v1153_v55 = vadd.f32 %v1151_v43, %v1147_v11  ;;  %v1154_v57 = vadd.f32 %v1152_v53, %v1148_v38  ;;  %v1164_v60 = vmul.f32 %v1162_v27, %v2651_v18  ;;  %v3571_v39 = vadd.f32 %v3512_v0, %v1006_v3 }
 0x126   :  { %v1086_v56 = vadd.f32 %v1084_v2, %v1080_v31  ;;  %v1090_v1 = vmul.f32 %v1088_v45, %v4486_v5  ;;  %v1174_v40 = vstv %s3540_s8  ;;  %v1169_v38 = vmul.f32 %v1168_v41, %v2653_v19  ;;  %s3685_s8 = sld [smem:[#allocation10 + $0x1a]] }
 0x127   :  { %v1159_v29 = vadd.f32 %v1157_v42, %v1153_v55  ;;  %v1160_v59 = vadd.f32 %v1158_v62, %v1154_v57  ;;  %v1170_v43 = vmul.f32 %v1168_v41, %v2655_v20  ;;  %v1091_v0 = vadd.f32 %v1089_v15, %v1085_v23 }
 0x128   :  { %v1095_v3 = vmul.f32 %v1094_v33, %v2748_v51  ;;  %v1100_v53 = vstv %s3544_s9  ;;  %v1180_v45 = vstv %s3549_s11  ;;  %v1175_v27 = vmul.f32 %v1174_v40, %v2657_v21  ;;  %s3687_s9 = sld [smem:[#allocation10 + $0x2a]] }
 0x129   :  { %v1165_v31 = vadd.f32 %v1163_v10, %v1159_v29  ;;  %v1166_v2 = vadd.f32 %v1164_v60, %v1160_v59  ;;  %v1176_v11 = vmul.f32 %v1174_v40, %v2659_v22  ;;  %v1092_v42 = vadd.f32 %v1090_v1, %v1086_v56  ;;  %s3715_s11 = sld [smem:[#allocation10 + $0x4a]] }
 0x12a   :  { %v1096_v62 = vmul.f32 %v1094_v33, %v2788_v61  ;;  %v1106_v23 = vstv %s3556_s2  ;;  %v1186_v15 = vstv %s3559_s0  ;;  %v1181_v57 = vmul.f32 %v1180_v45, %v2664_v24  ;;  %s3723_s2 = sld [smem:[#allocation10 + $0x5a]]  ;;  %s3727_s0 = sld [smem:[#allocation10 + $0xb9]] }
 0x12b   :  { %v1171_v41 = vadd.f32 %v1169_v38, %v1165_v31  ;;  %v1172_v55 = vadd.f32 %v1170_v43, %v1166_v2  ;;  %v1182_v9 = vmul.f32 %v1180_v45, %v2666_v25  ;;  %v1101_v40 = vmul.f32 %v1100_v53, %v2812_v30 }
 0x12c   :  { %v1102_v56 = vmul.f32 %v1100_v53, %v2815_v32  ;;  %v1097_v33 = vadd.f32 %v1095_v3, %v1091_v0  ;;  %v1107_v1 = vmul.f32 %v1106_v23, %v2819_v34  ;;  %v1098_v38 = vadd.f32 %v1096_v62, %v1092_v42 }
 0x12d   :  { %v1177_v29 = vadd.f32 %v1175_v27, %v1171_v41  ;;  %v1178_v59 = vadd.f32 %v1176_v11, %v1172_v55  ;;  %v1108_v43 = vmul.f32 %v1106_v23, %v2829_v52  ;;  %v1112_v45 = vstv %s3574_s3  ;;  %s3740_s3 = sld [smem:[#allocation13 + $0x8]] }
 0x12e   :  { %v1187_v53 = vmul.f32 %v1186_v15, %v4466_v7  ;;  %v1188_v10 = vmul.f32 %v1186_v15, %v4484_v37  ;;  %v1192_v0 = vstv %s3579_s24  ;;  %v1229_v3 = vstv %s3581_s5  ;;  %s3748_s24 = sld [smem:[#allocation10 + $0xc9]]  ;;  %s3753_s5 = sld [smem:[#allocation10 + $0x7a]] }
 0x12f   :  { %v1183_v31 = vadd.f32 %v1181_v57, %v1177_v29  ;;  %v1184_v2 = vadd.f32 %v1182_v9, %v1178_v59  ;;  %v1232_v60 = vstv %s3568_s4  ;;  %v1236_v27 = vstv %s3586_s10  ;;  %s3733_s4 = sld [smem:[#allocation10 + $0x6a]]  ;;  %s3758_s10 = sld [smem:[#allocation10 + $0xd9]] }
 0x130   :  { %v1242_v11 = vstv %s3588_s12  ;;  %v1103_v42 = vadd.f32 %v1101_v40, %v1097_v33  ;;  %v1198_v62 = vstv %s3592_s13  ;;  %v1230_v23 = vmul.f32 %v1229_v3, %v2597_v46  ;;  %s3760_s12 = sld [smem:[#allocation10 + $0xe9]] }
 0x131   :  { %v1231_v41 = vmul.f32 %v1229_v3, %v2599_v47  ;;  %v1189_v9 = vadd.f32 %v1187_v53, %v1183_v31  ;;  %v1193_v15 = vmul.f32 %v1192_v0, %v4485_v35  ;;  %v1237_v55 = vmul.f32 %v1236_v27, %v2601_v48  ;;  %s3766_s13 = sld [smem:[#allocation10 + $0xf9]] }
 0x132   :  { %v1238_v57 = vmul.f32 %v1236_v27, %v2604_v50  ;;  %v1233_v29 = vadd.f32 %v1232_v60, %v1230_v23  ;;  %v1243_v37 = vmul.f32 %v1242_v11, %v2610_v54  ;;  %v1244_v40 = vmul.f32 %v1242_v11, %v4465_v14 }
 0x133   :  { %v1234_v59 = vadd.f32 %v1232_v60, %v1231_v41  ;;  %v1190_v33 = vadd.f32 %v1188_v10, %v1184_v2  ;;  %v1194_v7 = vmul.f32 %v1192_v0, %v4486_v5  ;;  %v1248_v3 = vstv %s3603_s16  ;;  %s3771_s16 = sld [smem:[#allocation10 + $0x8a]] }
 0x134   :  { %v1254_v53 = vstv %s3605_s17  ;;  %v1104_v31 = vadd.f32 %v1102_v56, %v1098_v38  ;;  %v1199_v35 = vmul.f32 %v1198_v62, %v2748_v51  ;;  %v1239_v27 = vadd.f32 %v1237_v55, %v1233_v29  ;;  %s3778_s17 = sld [smem:[#allocation11 + $0xb]] }
 0x135   :  { %v1240_v23 = vadd.f32 %v1238_v57, %v1234_v59  ;;  %v1195_v60 = vadd.f32 %v1193_v15, %v1189_v9  ;;  %v1249_v41 = vmul.f32 %v1248_v3, %v2617_v58  ;;  %v1250_v10 = vmul.f32 %v1248_v3, %v2624_v4 }
 0x136   :  { %v1260_v2 = vstv %s3611_s18  ;;  %v1245_v0 = vadd.f32 %v1243_v37, %v1239_v27  ;;  %v1255_v5 = vmul.f32 %v1254_v53, %v2632_v8  ;;  %v1256_v25 = vmul.f32 %v1254_v53, %v2637_v12  ;;  %s3780_s18 = sld [smem:[#allocation13 + $0x9]] }
 0x137   :  { %v1246_v11 = vadd.f32 %v1244_v40, %v1240_v23  ;;  %v1196_v56 = vadd.f32 %v1194_v7, %v1190_v33  ;;  %v1200_v38 = vmul.f32 %v1198_v62, %v2788_v61  ;;  %v1204_v51 = vstv %s3615_s19  ;;  %s3787_s19 = sld [smem:[#allocation10 + $0x9a]] }
 0x138   :  { %v1266_v55 = vstv %s3621_s20  ;;  %v1251_v57 = vadd.f32 %v1249_v41, %v1245_v0  ;;  %v1261_v15 = vmul.f32 %v1260_v2, %v2639_v13  ;;  %v1262_v29 = vmul.f32 %v1260_v2, %v2647_v16  ;;  %s3789_s20 = sld [smem:[#allocation10 + $0xb]] }
 0x139   :  { %v1252_v9 = vadd.f32 %v1250_v10, %v1246_v11  ;;  %v1109_v37 = vadd.f32 %v1107_v1, %v1103_v42  ;;  %v1110_v59 = vadd.f32 %v1108_v43, %v1104_v31  ;;  %v1113_v7 = vmul.f32 %v1112_v45, %v2837_v44 }
 0x13a   :  { %v1114_v62 = vmul.f32 %v1112_v45, %v4473_v63  ;;  %v1201_v40 = vadd.f32 %v1199_v35, %v1195_v60  ;;  %v1205_v33 = vmul.f32 %v1204_v51, %v2812_v30  ;;  %v1257_v3 = vadd.f32 %v1255_v5, %v1251_v57 }
 0x13b   :  { %v1258_v53 = vadd.f32 %v1256_v25, %v1252_v9  ;;  %v1202_v1 = vadd.f32 %v1200_v38, %v1196_v56  ;;  %v1206_v43 = vmul.f32 %v1204_v51, %v2815_v32  ;;  %v1210_v42 = vstv %s3632_s21  ;;  %s3798_s21 = sld [smem:[#allocation10 + $0x1b]] }
 0x13c   :  { %v1267_v31 = vmul.f32 %v1266_v55, %v2649_v17  ;;  %v1263_v45 = vadd.f32 %v1261_v15, %v1257_v3  ;;  %v1268_v23 = vmul.f32 %v1266_v55, %v2651_v18  ;;  %v1272_v35 = vstv %s3637_s23  ;;  %s3800_s23 = sld [smem:[#allocation10 + $0x2b]] }
 0x13d   :  { %v1264_v27 = vadd.f32 %v1262_v29, %v1258_v53  ;;  %v4487_v25 = vmax.f32 %v3473_v36, 0.0  ;;  %v4488_v5 = vstv %s3443_s14  ;;  %v4489_v41 = vmax.f32 %v3483_v6, 0.0  ;;  %s3694_s14 = sld [smem:[#allocation10 + $0xa9]] }
 0x13e   :  { %v4490_v51 = vmov %v4488_v5  ;;  %v4491_v2 = vmax.f32 %v3553_v26, 0.0  ;;  %v4492_v0 = vstv %s3447_s15  ;;  %v4493_v56 = vmax.f32 %v3571_v39, 0.0  ;;  %s3713_s15 = sld [smem:[#allocation10 + $0x3a]] }
 0x13f   :  { %v912_v60 = vmul.f32 %v4488_v5, %v4487_v25  ;;  %v913_v10 = vmul.f32 %v4490_v51, %v4489_v41  ;;  %v4494_v38 = vmov %v4492_v0  ;;  %v3689_v36 = vadd.f32 %v1113_v7, %v1109_v37 }
 0x140   :  { %v1016_v11 = vmul.f32 %v4492_v0, %v4491_v2  ;;  %v1017_v55 = vmul.f32 %v4494_v38, %v4493_v56  ;;  %v3691_v57 = vadd.f32 %v1114_v62, %v1110_v59  ;;  %v1207_v6 = vadd.f32 %v1205_v33, %v1201_v40  ;;  %v4495_v62 = vld [vmem:[#allocation20_spill] sm:$0xff] }
 0x141   :  { %v1211_v9 = vmul.f32 %v1210_v42, %v2819_v34  ;;  %v1212_v26 = vmul.f32 %v1210_v42, %v2829_v52  ;;  %v1216_v39 = vstv %s3646_s25  ;;  %v1269_v15 = vadd.f32 %v1267_v31, %v1263_v45  ;;  %v4496_v33 = vld [vmem:[#allocation32_spill] sm:$0xff]  ;;  %s3805_s25 = sld [smem:[#allocation10 + $0xaa]] }
 0x142   :  { %v1273_v29 = vmul.f32 %v1272_v35, %v2653_v19  ;;  %v1208_v3 = vadd.f32 %v1206_v43, %v1202_v1  ;;  %v1270_v53 = vadd.f32 %v1268_v23, %v1264_v27  ;;  %v1274_v25 = vmul.f32 %v1272_v35, %v2655_v20 }
 0x143   :  { %v1278_v37 = vstv %s3651_s26  ;;  %v3702_v59 = vadd.f32 %v912_v60, %v3463_v28  ;;  %v3705_v7 = vadd.f32 %v913_v10, %v3481_v49  ;;  %v3708_v40 = vadd.f32 %v1016_v11, %v4495_v62  ;;  %s3822_s26 = sld [smem:[#allocation10 + $0x3b]] }
 0x144   :  { %v3711_v42 = vadd.f32 %v1017_v55, %v4496_v33  ;;  %v1117_v1 = vmax.f32 %v3689_v36, 0.0  ;;  %v1119_v28 = vstv %s3655_s27  ;;  %v1213_v49 = vadd.f32 %v1211_v9, %v1207_v6  ;;  %s3824_s27 = sld [smem:[#allocation10 + $0x4b]] }
 0x145   :  { %v1217_v43 = vmul.f32 %v1216_v39, %v2837_v44  ;;  %v1118_v31 = vmax.f32 %v3691_v57, 0.0  ;;  %v1218_v45 = vmul.f32 %v1216_v39, %v4473_v63  ;;  %v1275_v27 = vadd.f32 %v1273_v29, %v1269_v15 }
 0x146   :  { %v1279_v23 = vmul.f32 %v1278_v37, %v2657_v21  ;;  %v1214_v35 = vadd.f32 %v1212_v26, %v1208_v3  ;;  %v1276_v5 = vadd.f32 %v1274_v25, %v1270_v53  ;;  %v1280_v60 = vmul.f32 %v1278_v37, %v2659_v22  ;;  %v4497_v25 = vld [vmem:[#allocation21_spill] sm:$0xff] }
 0x147   :  { %v1284_v41 = vstv %s3665_s29  ;;  %v1333_v51 = vstv %s3667_s30  ;;  %v1336_v10 = vstv %s3658_s28  ;;  %v1340_v2 = vstv %s3685_s8  ;;  %s3831_s28 = sld [smem:[#allocation10 + $0xba]]  ;;  %s3840_s29 = sld [smem:[#allocation10 + $0x5b]] }
 0x148   :  { %v1346_v0 = vstv %s3687_s9  ;;  %v3735_v11 = vadd.f32 %v1217_v43, %v1213_v49  ;;  %v1290_v56 = vstv %s3694_s14  ;;  %v1334_v38 = vmul.f32 %v1333_v51, %v2597_v46  ;;  %v4498_v43 = vld [vmem:[#allocation22_spill] sm:$0xff]  ;;  %s3848_s30 = sld [smem:[#allocation10 + $0x6b]]  ;;  %s3861_s9 = sld [smem:[#allocation10 + $0xca]] }
 0x149   :  { %v1335_v55 = vmul.f32 %v1333_v51, %v2599_v47  ;;  %v1281_v36 = vadd.f32 %v1279_v23, %v1275_v27  ;;  %v1285_v6 = vmul.f32 %v1284_v41, %v2664_v24  ;;  %v1341_v9 = vmul.f32 %v1340_v2, %v2601_v48  ;;  %s3856_s8 = sld [smem:[#allocation10 + $0x7b]]  ;;  %s3867_s14 = sld [smem:[#allocation10 + $0xda]] }
 0x14a   :  { %v1342_v26 = vmul.f32 %v1340_v2, %v2604_v50  ;;  %v1337_v39 = vadd.f32 %v1336_v10, %v1334_v38  ;;  %v1347_v29 = vmul.f32 %v1346_v0, %v2610_v54  ;;  %v1348_v3 = vmul.f32 %v1346_v0, %v4465_v14 }
 0x14b   :  { %v1338_v15 = vadd.f32 %v1336_v10, %v1335_v55  ;;  %v1282_v53 = vadd.f32 %v1280_v60, %v1276_v5  ;;  %v1286_v37 = vmul.f32 %v1284_v41, %v4497_v25  ;;  %v1352_v62 = vstv %s3713_s15  ;;  %v4499_v55 = vld [vmem:[#allocation23_spill] sm:$0xff]  ;;  %s3872_s15 = sld [smem:[#allocation10 + $0x8b]] }
 0x14c   :  { %v1358_v33 = vstv %s3715_s11  ;;  %v1220_v49 = vadd.f32 %v1218_v45, %v1214_v35  ;;  %v1291_v27 = vmul.f32 %v1290_v56, %v4498_v43  ;;  %v1343_v23 = vadd.f32 %v1341_v9, %v1337_v39  ;;  %s3877_s11 = sld [smem:[#allocation10 + $0xea]] }
 0x14d   :  { %v1344_v51 = vadd.f32 %v1342_v26, %v1338_v15  ;;  %v1287_v10 = vadd.f32 %v1285_v6, %v1281_v36  ;;  %v1353_v2 = vmul.f32 %v1352_v62, %v2617_v58  ;;  %v1354_v5 = vmul.f32 %v1352_v62, %v2624_v4 }
 0x14e   :  { %v1364_v60 = vstv %s3723_s2  ;;  %v1349_v45 = vadd.f32 %v1347_v29, %v1343_v23  ;;  %v1359_v41 = vmul.f32 %v1358_v33, %v2632_v8  ;;  %v1360_v0 = vmul.f32 %v1358_v33, %v2637_v12  ;;  %v4500_v33 = vld [vmem:[#allocation24_spill] sm:$0xff]  ;;  %s3879_s2 = sld [smem:[#allocation10 + $0xfa]] }
 0x14f   :  { %v1350_v35 = vadd.f32 %v1348_v3, %v1344_v51  ;;  %v1288_v38 = vadd.f32 %v1286_v37, %v1282_v53  ;;  %v1292_v36 = vmul.f32 %v1290_v56, %v4499_v55  ;;  %v1296_v6 = vstv %s3727_s0  ;;  %s3886_s0 = sld [smem:[#allocation10 + $0x9b]] }
 0x150   :  { %v1370_v9 = vstv %s3733_s4  ;;  %v1355_v26 = vadd.f32 %v1353_v2, %v1349_v45  ;;  %v1365_v15 = vmul.f32 %v1364_v60, %v2639_v13  ;;  %v1366_v29 = vmul.f32 %v1364_v60, %v2647_v16  ;;  %v4501_v60 = vld [vmem:[#allocation25_spill] sm:$0xff]  ;;  %s3895_s4 = sld [smem:[#allocation10 + $0xab]] }
 0x151   :  { %v1356_v39 = vadd.f32 %v1354_v5, %v1350_v35  ;;  %v1120_v3 = vmul.f32 %v1119_v28, %v1117_v1  ;;  %v1221_v62 = vmax.f32 %v3735_v11, 0.0  ;;  %v1222_v53 = vmax.f32 %v1220_v49, 0.0 }
 0x152   :  { %v1223_v56 = vstv %s3740_s3  ;;  %v1293_v37 = vadd.f32 %v1291_v27, %v1287_v10  ;;  %v1297_v23 = vmul.f32 %v1296_v6, %v4500_v33  ;;  %v1361_v51 = vadd.f32 %v1359_v41, %v1355_v26  ;;  %s3897_s3 = sld [smem:[#allocation11 + $0xc]] }
 0x153   :  { %v1362_v2 = vadd.f32 %v1360_v0, %v1356_v39  ;;  %v1294_v5 = vadd.f32 %v1292_v36, %v1288_v38  ;;  %v1298_v45 = vmul.f32 %v1296_v6, %v4501_v60  ;;  %v1302_v35 = vstv %s3748_s24  ;;  %s3901_s24 = sld [smem:[#allocation10 + $0xc]] }
 0x154   :  { %v1371_v1 = vmul.f32 %v1370_v9, %v2649_v17  ;;  %v1367_v11 = vadd.f32 %v1365_v15, %v1361_v51  ;;  %v1372_v27 = vmul.f32 %v1370_v9, %v2651_v18  ;;  %v1376_v10 = vstv %s3753_s5  ;;  %v4503_v9 = vld [vmem:[#allocation26_spill] sm:$0xff]  ;;  %s3909_s5 = sld [smem:[#allocation10 + $0x1c]] }
 0x155   :  { %v1368_v49 = vadd.f32 %v1366_v29, %v1362_v2  ;;  %v1121_v41 = vmul.f32 %v1119_v28, %v1118_v31  ;;  %v3796_v0 = vadd.f32 %v1120_v3, %v3702_v59  ;;  %v1224_v38 = vmul.f32 %v1223_v56, %v1221_v62 }
 0x156   :  { %v1225_v36 = vmul.f32 %v1223_v56, %v1222_v53  ;;  %v1299_v6 = vadd.f32 %v1297_v23, %v1293_v37  ;;  %v1303_v26 = vmul.f32 %v1302_v35, %v4503_v9  ;;  %v1308_v39 = vstv %s3758_s10  ;;  %s3911_s10 = sld [smem:[#allocation10 + $0x2c]] }
 0x157   :  { %4502 = vst [vmem:[#allocation33_spill] sm:$0xff] %v3796_v0  ;;  %v1314_v15 = vstv %s3760_s12  ;;  %v1304_v57 = vmul.f32 %v1302_v35, %v2788_v61  ;;  %v4426_v28 = vstv %s3766_s13  ;;  %v1373_v31 = vadd.f32 %v1371_v1, %v1367_v11  ;;  %s3917_s12 = sld [smem:[#allocation10 + $0xbb]] }
 0x158   :  { %v1377_v59 = vmul.f32 %v1376_v10, %v2653_v19  ;;  %v1300_v29 = vadd.f32 %v1298_v45, %v1294_v5  ;;  %v1374_v3 = vadd.f32 %v1372_v27, %v1368_v49  ;;  %v1378_v62 = vmul.f32 %v1376_v10, %v2655_v20 }
 0x159   :  { %v1382_v53 = vstv %s3771_s16  ;;  %v3813_v56 = vadd.f32 %v1121_v41, %v3705_v7  ;;  %v3816_v37 = vadd.f32 %v1224_v38, %v3708_v40  ;;  %v3819_v23 = vadd.f32 %v1225_v36, %v3711_v42  ;;  %s3928_s16 = sld [smem:[#allocation10 + $0x4c]] }
 0x15a   :  { %v1309_v51 = vmul.f32 %v1308_v39, %v2812_v30  ;;  %v1305_v2 = vadd.f32 %v1303_v26, %v1299_v6  ;;  %v1310_v7 = vmul.f32 %v1308_v39, %v2815_v32  ;;  %v1315_v40 = vmul.f32 %v1314_v15, %v2819_v34 }
 0x15b   :  { %4504 = vst [vmem:[#allocation30_spill] sm:$0xff] %v3813_v56  ;;  %4505 = vst [vmem:[#allocation31_spill] sm:$0xff] %v3816_v37  ;;  %v3829_v5 = vmul.f32 %v1314_v15, %v2829_v52  ;;  %v3836_v42 = vmul.f32 %v4426_v28, %v2837_v44  ;;  %v1379_v35 = vadd.f32 %v1377_v59, %v1373_v31  ;;  %v1388_v10 = vstv %s3787_s19  ;;  %s3944_s19 = sld [smem:[#allocation10 + $0x5c]] }
 0x15c   :  { %4506 = vst [vmem:[#allocation20_spill] sm:$0xff] %v3819_v23  ;;  %v1383_v1 = vmul.f32 %v1382_v53, %v2657_v21  ;;  %v1306_v11 = vadd.f32 %v1304_v57, %v1300_v29  ;;  %v1380_v49 = vadd.f32 %v1378_v62, %v1374_v3  ;;  %v1384_v27 = vmul.f32 %v1382_v53, %v2659_v22 }
 0x15d   :  { %v1437_v41 = vstv %s3789_s20  ;;  %v1440_v38 = vstv %s3778_s17  ;;  %v1444_v36 = vstv %s3798_s21  ;;  %v1450_v6 = vstv %s3800_s23  ;;  %s3935_s17 = sld [smem:[#allocation10 + $0xcb]]  ;;  %s3952_s20 = sld [smem:[#allocation10 + $0x6c]] }
 0x15e   :  { %v1311_v26 = vadd.f32 %v1309_v51, %v1305_v2  ;;  %v1394_v39 = vstv %s3805_s25  ;;  %v1438_v15 = vmul.f32 %v1437_v41, %v2597_v46  ;;  %v1439_v31 = vmul.f32 %v1437_v41, %v2599_v47  ;;  %s3959_s21 = sld [smem:[#allocation10 + $0xdb]]  ;;  %s3963_s23 = sld [smem:[#allocation10 + $0x7c]] }
 0x15f   :  { %v1385_v57 = vadd.f32 %v1383_v1, %v1379_v35  ;;  %v1389_v59 = vmul.f32 %v1388_v10, %v2664_v24  ;;  %v1445_v29 = vmul.f32 %v1444_v36, %v2601_v48  ;;  %v1446_v3 = vmul.f32 %v1444_v36, %v2604_v50  ;;  %s3969_s25 = sld [smem:[#allocation10 + $0x8c]] }
 0x160   :  { %v1441_v62 = vadd.f32 %v1440_v38, %v1438_v15  ;;  %v1442_v53 = vadd.f32 %v1440_v38, %v1439_v31  ;;  %v1451_v51 = vmul.f32 %v1450_v6, %v2610_v54  ;;  %v1452_v2 = vmul.f32 %v1450_v6, %v4465_v14 }
 0x161   :  { %v1386_v45 = vadd.f32 %v1384_v27, %v1380_v49  ;;  %v1390_v41 = vmul.f32 %v1388_v10, %v4497_v25  ;;  %v1456_v35 = vstv %s3822_s26  ;;  %v1462_v1 = vstv %s3824_s27  ;;  %s3973_s26 = sld [smem:[#allocation10 + $0xeb]]  ;;  %s3978_s27 = sld [smem:[#allocation10 + $0x9c]] }
 0x162   :  { %v1395_v28 = vmul.f32 %v1394_v39, %v4498_v43  ;;  %v1400_v23 = vstv %s3831_s28  ;;  %v1447_v36 = vadd.f32 %v1445_v29, %v1441_v62  ;;  %v1448_v37 = vadd.f32 %v1446_v3, %v1442_v53  ;;  %s3984_s28 = sld [smem:[#allocation10 + $0xac]] }
 0x163   :  { %v1391_v15 = vadd.f32 %v1389_v59, %v1385_v57  ;;  %v1457_v38 = vmul.f32 %v1456_v35, %v2617_v58  ;;  %v1458_v6 = vmul.f32 %v1456_v35, %v2624_v4  ;;  %v1468_v49 = vstv %s3840_s29  ;;  %s3991_s29 = sld [smem:[#allocation10 + $0xfb]] }
 0x164   :  { %v1453_v27 = vadd.f32 %v1451_v51, %v1447_v36  ;;  %v1454_v10 = vadd.f32 %v1452_v2, %v1448_v37  ;;  %v1463_v31 = vmul.f32 %v1462_v1, %v2632_v8  ;;  %v1464_v56 = vmul.f32 %v1462_v1, %v2637_v12 }
 0x165   :  { %v1312_v29 = vadd.f32 %v1310_v7, %v1306_v11  ;;  %v1392_v3 = vadd.f32 %v1390_v41, %v1386_v45  ;;  %v1396_v57 = vmul.f32 %v1394_v39, %v4499_v55  ;;  %v1474_v59 = vstv %s3848_s30  ;;  %s3995_s30 = sld [smem:[#allocation11 + $0xd]] }
 0x166   :  { %v1459_v62 = vadd.f32 %v1457_v38, %v1453_v27  ;;  %v1460_v53 = vadd.f32 %v1458_v6, %v1454_v10  ;;  %v1469_v37 = vmul.f32 %v1468_v49, %v2639_v13  ;;  %v1470_v51 = vmul.f32 %v1468_v49, %v2647_v16 }
 0x167   :  { %v1317_v2 = vadd.f32 %v1315_v40, %v1311_v26  ;;  %v1397_v35 = vadd.f32 %v1395_v28, %v1391_v15  ;;  %v1401_v7 = vmul.f32 %v1400_v23, %v4500_v33  ;;  %v1480_v45 = vstv %s3856_s8  ;;  %s3999_s8 = sld [smem:[#allocation10 + $0xbc]] }
 0x168   :  { %v1465_v11 = vadd.f32 %v1463_v31, %v1459_v62  ;;  %v1466_v39 = vadd.f32 %v1464_v56, %v1460_v53  ;;  %v1475_v41 = vmul.f32 %v1474_v59, %v2649_v17  ;;  %v1476_v1 = vmul.f32 %v1474_v59, %v2651_v18 }
 0x169   :  { %v4507_v36 = vstv %s3766_s13  ;;  %v1398_v6 = vadd.f32 %v1396_v57, %v1392_v3  ;;  %v1402_v40 = vmul.f32 %v1400_v23, %v4501_v60  ;;  %v1406_v28 = vstv %s3861_s9  ;;  %s3926_s13 = sld [smem:[#allocation10 + $0x3c]] }
 0x16a   :  { %v1322_v38 = vmul.f32 %v4507_v36, %v4473_v63  ;;  %v1471_v26 = vadd.f32 %v1469_v37, %v1465_v11  ;;  %v1472_v15 = vadd.f32 %v1470_v51, %v1466_v39  ;;  %v1481_v56 = vmul.f32 %v1480_v45, %v2653_v19  ;;  %s4003_s9 = sld [smem:[#allocation10 + $0xcc]] }
 0x16b   :  { %v1482_v49 = vmul.f32 %v1480_v45, %v2655_v20  ;;  %v1318_v27 = vadd.f32 %v3829_v5, %v1312_v29  ;;  %v3905_v10 = vadd.f32 %v3836_v42, %v1317_v2  ;;  %v1412_v23 = vstv %s3867_s14  ;;  %s4005_s14 = sld [smem:[#allocation10 + $0xd]] }
 0x16c   :  { %v1486_v31 = vstv %s3872_s15  ;;  %v1403_v3 = vadd.f32 %v1401_v7, %v1397_v35  ;;  %v1407_v57 = vmul.f32 %v1406_v28, %v4503_v9  ;;  %v1477_v59 = vadd.f32 %v1475_v41, %v1471_v26  ;;  %s4011_s15 = sld [smem:[#allocation10 + $0x1d]] }
 0x16d   :  { %4508 = vst [vmem:[#allocation32_spill] sm:$0xff] %v3905_v10  ;;  %v1478_v62 = vadd.f32 %v1476_v1, %v1472_v15  ;;  %v1404_v53 = vadd.f32 %v1402_v40, %v1398_v6  ;;  %v1408_v37 = vmul.f32 %v1406_v28, %v2788_v61  ;;  %v1418_v51 = vstv %s3877_s11  ;;  %s4013_s11 = sld [smem:[#allocation10 + $0x2d]] }
 0x16e   :  { %v1424_v5 = vstv %s3879_s2  ;;  %v1483_v42 = vadd.f32 %v1481_v56, %v1477_v59  ;;  %v1487_v2 = vmul.f32 %v1486_v31, %v2657_v21  ;;  %v1488_v45 = vmul.f32 %v1486_v31, %v2659_v22  ;;  %s4029_s2 = sld [smem:[#allocation10 + $0x3d]] }
 0x16f   :  { %v1484_v29 = vadd.f32 %v1482_v49, %v1478_v62  ;;  %v3921_v35 = vadd.f32 %v1322_v38, %v1318_v27  ;;  %v1413_v11 = vmul.f32 %v1412_v23, %v2812_v30  ;;  %v1492_v39 = vstv %s3886_s0  ;;  %s4033_s0 = sld [smem:[#allocation10 + $0x4d]] }
 0x170   :  { %v1409_v41 = vadd.f32 %v1407_v57, %v1403_v3  ;;  %v1414_v1 = vmul.f32 %v1412_v23, %v2815_v32  ;;  %v1419_v36 = vmul.f32 %v1418_v51, %v2819_v34  ;;  %v3933_v38 = vmul.f32 %v1418_v51, %v2829_v52 }
 0x171   :  { %v1410_v6 = vadd.f32 %v1408_v37, %v1404_v53  ;;  %v3938_v40 = vmul.f32 %v1424_v5, %v2837_v44  ;;  %v3941_v28 = vmul.f32 %v1424_v5, %v4473_v63  ;;  %v1498_v26 = vstv %s3895_s4  ;;  %s4039_s4 = sld [smem:[#allocation10 + $0xdc]] }
 0x172   :  { %v1489_v15 = vadd.f32 %v1487_v2, %v1483_v42  ;;  %v1490_v56 = vadd.f32 %v1488_v45, %v1484_v29  ;;  %v1493_v49 = vmul.f32 %v1492_v39, %v2664_v24  ;;  %v1494_v27 = vmul.f32 %v1492_v39, %v4497_v25 }
 0x173   :  { %v1541_v23 = vstv %s3901_s24  ;;  %v1544_v31 = vstv %s3897_s3  ;;  %v1548_v3 = vstv %s3909_s5  ;;  %v1554_v57 = vstv %s3911_s10  ;;  %s4049_s3 = sld [smem:[#allocation10 + $0x5d]]  ;;  %s4051_s24 = sld [smem:[#allocation13 + $0xa]] }
 0x174   :  { %v1415_v59 = vadd.f32 %v1413_v11, %v1409_v41  ;;  %v1499_v62 = vmul.f32 %v1498_v26, %v4498_v43  ;;  %v1542_v53 = vmul.f32 %v1541_v23, %v2597_v46  ;;  %v1543_v37 = vmul.f32 %v1541_v23, %v2599_v47  ;;  %s4059_s5 = sld [smem:[#allocation10 + $0xec]]  ;;  %s4063_s10 = sld [smem:[#allocation10 + $0x6d]] }
 0x175   :  { %v1500_v51 = vmul.f32 %v1498_v26, %v4499_v55  ;;  %v1504_v5 = vstv %s3917_s12  ;;  %v1549_v42 = vmul.f32 %v1548_v3, %v2601_v48  ;;  %v1550_v29 = vmul.f32 %v1548_v3, %v2604_v50  ;;  %s4065_s12 = sld [smem:[#allocation13 + $0xb]] }
 0x176   :  { %v1545_v2 = vadd.f32 %v1544_v31, %v1542_v53  ;;  %v1546_v45 = vadd.f32 %v1544_v31, %v1543_v37  ;;  %v1555_v11 = vmul.f32 %v1554_v57, %v2610_v54  ;;  %v1556_v39 = vmul.f32 %v1554_v57, %v4465_v14 }
 0x177   :  { %v1495_v41 = vadd.f32 %v1493_v49, %v1489_v15  ;;  %v1496_v23 = vadd.f32 %v1494_v27, %v1490_v56  ;;  %v1560_v26 = vstv %s3926_s13  ;;  %v1566_v7 = vstv %s3928_s16  ;;  %s4077_s13 = sld [smem:[#allocation10 + $0xfc]]  ;;  %s4082_s16 = sld [smem:[#allocation10 + $0x7d]] }
 0x178   :  { %v1416_v0 = vadd.f32 %v1414_v1, %v1410_v6  ;;  %v1510_v10 = vstv %s3935_s17  ;;  %v1551_v63 = vadd.f32 %v1549_v42, %v1545_v2  ;;  %v1552_v3 = vadd.f32 %v1550_v29, %v1546_v45  ;;  %s4086_s17 = sld [smem:[#allocation11 + $0xe]] }
 0x179   :  { %v1505_v44 = vmul.f32 %v1504_v5, %v4500_v33  ;;  %v1561_v31 = vmul.f32 %v1560_v26, %v2617_v58  ;;  %v1562_v53 = vmul.f32 %v1560_v26, %v2624_v4  ;;  %v1572_v57 = vstv %s3944_s19  ;;  %s4088_s19 = sld [smem:[#allocation13 + $0xc]] }
 0x17a   :  { %v1557_v15 = vadd.f32 %v1555_v11, %v1551_v63  ;;  %v1558_v56 = vadd.f32 %v1556_v39, %v1552_v3  ;;  %v1567_v1 = vmul.f32 %v1566_v7, %v2632_v8  ;;  %v1568_v6 = vmul.f32 %v1566_v7, %v2637_v12 }
 0x17b   :  { %v1501_v49 = vadd.f32 %v1499_v62, %v1495_v41  ;;  %v1502_v27 = vadd.f32 %v1500_v51, %v1496_v23  ;;  %v1506_v37 = vmul.f32 %v1504_v5, %v4501_v60  ;;  %v1578_v42 = vstv %s3952_s20  ;;  %s4098_s20 = sld [smem:[#allocation10 + $0x8d]] }
 0x17c   :  { %v1563_v29 = vadd.f32 %v1561_v31, %v1557_v15  ;;  %v1564_v2 = vadd.f32 %v1562_v53, %v1558_v56  ;;  %v1573_v45 = vmul.f32 %v1572_v57, %v2639_v13  ;;  %v1574_v63 = vmul.f32 %v1572_v57, %v2647_v16 }
 0x17d   :  { %v1421_v11 = vadd.f32 %v1419_v36, %v1415_v59  ;;  %v1511_v39 = vmul.f32 %v1510_v10, %v4503_v9  ;;  %v1516_v26 = vstv %s3959_s21  ;;  %v1584_v3 = vstv %s3963_s23  ;;  %s4100_s21 = sld [smem:[#allocation10 + $0xe]]  ;;  %s4104_s23 = sld [smem:[#allocation10 + $0x9d]] }
 0x17e   :  { %v1569_v7 = vadd.f32 %v1567_v1, %v1563_v29  ;;  %v1570_v62 = vadd.f32 %v1568_v6, %v1564_v2  ;;  %v1579_v51 = vmul.f32 %v1578_v42, %v2649_v17  ;;  %v1580_v5 = vmul.f32 %v1578_v42, %v2651_v18 }
 0x17f   :  { %v1507_v41 = vadd.f32 %v1505_v44, %v1501_v49  ;;  %v1508_v23 = vadd.f32 %v1506_v37, %v1502_v27  ;;  %v1512_v36 = vmul.f32 %v1510_v10, %v2788_v61  ;;  %v1590_v59 = vstv %s3969_s25  ;;  %s4106_s25 = sld [smem:[#allocation10 + $0xad]] }
 0x180   :  { %v1575_v31 = vadd.f32 %v1573_v45, %v1569_v7  ;;  %v1576_v53 = vadd.f32 %v1574_v63, %v1570_v62  ;;  %v1585_v57 = vmul.f32 %v1584_v3, %v2653_v19  ;;  %v1586_v15 = vmul.f32 %v1584_v3, %v2655_v20 }
 0x181   :  { %v1422_v56 = vadd.f32 %v3933_v38, %v1416_v0  ;;  %v1517_v44 = vmul.f32 %v1516_v26, %v2812_v30  ;;  %v1522_v1 = vstv %s3973_s26  ;;  %v1596_v10 = vstv %s3978_s27  ;;  %s4111_s26 = sld [smem:[#allocation10 + $0x2e]] }
 0x182   :  { %v1581_v6 = vadd.f32 %v1579_v51, %v1575_v31  ;;  %v1582_v49 = vadd.f32 %v1580_v5, %v1576_v53  ;;  %v1591_v27 = vmul.f32 %v1590_v59, %v2657_v21  ;;  %v1592_v37 = vmul.f32 %v1590_v59, %v2659_v22  ;;  %s4135_s27 = sld [smem:[#allocation10 + $0x3e]] }
 0x183   :  { %v1513_v42 = vadd.f32 %v1511_v39, %v1507_v41  ;;  %v1514_v29 = vadd.f32 %v1512_v36, %v1508_v23  ;;  %v1518_v2 = vmul.f32 %v1516_v26, %v2815_v32  ;;  %v1602_v0 = vstv %s3984_s28  ;;  %s4137_s28 = sld [smem:[#allocation10 + $0x4e]] }
 0x184   :  { %v1587_v38 = vadd.f32 %v1585_v57, %v1581_v6  ;;  %v1588_v45 = vadd.f32 %v1586_v15, %v1582_v49  ;;  %v1597_v63 = vmul.f32 %v1596_v10, %v2664_v24  ;;  %v1598_v3 = vmul.f32 %v1596_v10, %v4497_v25 }
 0x185   :  { %v4023_v62 = vadd.f32 %v3938_v40, %v1421_v11  ;;  %v4026_v51 = vadd.f32 %v3941_v28, %v1422_v56  ;;  %v1523_v39 = vmul.f32 %v1522_v1, %v2819_v34  ;;  %v1524_v26 = vmul.f32 %v1522_v1, %v2829_v52 }
 0x186   :  { %v1528_v5 = vstv %s3991_s29  ;;  %v1593_v41 = vadd.f32 %v1591_v27, %v1587_v38  ;;  %v1594_v23 = vadd.f32 %v1592_v37, %v1588_v45  ;;  %v1519_v40 = vadd.f32 %v1517_v44, %v1513_v42  ;;  %s4144_s29 = sld [smem:[#allocation10 + $0x5e]] }
 0x187   :  { %v1603_v11 = vmul.f32 %v1602_v0, %v4498_v43  ;;  %v1604_v28 = vmul.f32 %v1602_v0, %v4499_v55  ;;  %v1608_v36 = vstv %s3999_s8  ;;  %v1520_v59 = vadd.f32 %v1518_v2, %v1514_v29  ;;  %s4159_s8 = sld [smem:[#allocation10 + $0xbd]] }
 0x188   :  { %v1599_v31 = vadd.f32 %v1597_v63, %v1593_v41  ;;  %v1600_v53 = vadd.f32 %v1598_v3, %v1594_v23  ;;  %v1614_v57 = vstv %s4003_s9  ;;  %v1645_v15 = vstv %s4005_s14  ;;  %v4509_v41 = vld [vmem:[#allocation28_spill] sm:$0xff]  ;;  %s4164_s9 = sld [smem:[#allocation10 + $0xcd]]  ;;  %s4168_s14 = sld [smem:[#allocation10 + $0x7e]] }
 0x189   :  { %v1648_v56 = vstv %s3995_s30  ;;  %v1652_v1 = vstv %s4011_s15  ;;  %v1658_v10 = vstv %s4013_s11  ;;  %v1609_v6 = vmul.f32 %v1608_v36, %v4500_v33  ;;  %s4153_s30 = sld [smem:[#allocation10 + $0x6e]]  ;;  %s4170_s15 = sld [smem:[#allocation10 + $0xdd]] }
 0x18a   :  { %v1610_v49 = vmul.f32 %v1608_v36, %v4501_v60  ;;  %v1646_v44 = vmul.f32 %v1645_v15, %v2597_v46  ;;  %v1647_v27 = vmul.f32 %v1645_v15, %v2599_v47  ;;  %v1605_v37 = vadd.f32 %v1603_v11, %v1599_v31  ;;  %v4510_v36 = vld [vmem:[#allocation29_spill] sm:$0xff]  ;;  %s4175_s11 = sld [smem:[#allocation10 + $0xed]] }
 0x18b   :  { %v1606_v42 = vadd.f32 %v1604_v28, %v1600_v53  ;;  %v1653_v29 = vmul.f32 %v1652_v1, %v2601_v48  ;;  %v1654_v2 = vmul.f32 %v1652_v1, %v2604_v50  ;;  %v1659_v45 = vmul.f32 %v1658_v10, %v2610_v54 }
 0x18c   :  { %v1649_v0 = vadd.f32 %v1648_v56, %v1646_v44  ;;  %v1650_v38 = vadd.f32 %v1648_v56, %v1647_v27  ;;  %v1660_v63 = vmul.f32 %v1658_v10, %v4465_v14  ;;  %v1525_v3 = vadd.f32 %v1523_v39, %v1519_v40  ;;  %v4511_v27 = vld [vmem:[#allocation32_spill] sm:$0xff] }
 0x18d   :  { %v1529_v23 = vmul.f32 %v1528_v5, %v4509_v41  ;;  %v1530_v15 = vmul.f32 %v1528_v5, %v4510_v36  ;;  %v1664_v11 = vstv %s4029_s2  ;;  %v1526_v28 = vadd.f32 %v1524_v26, %v1520_v59  ;;  %s4179_s2 = sld [smem:[#allocation10 + $0x8e]] }
 0x18e   :  { %v1655_v31 = vadd.f32 %v1653_v29, %v1649_v0  ;;  %v1656_v53 = vadd.f32 %v1654_v2, %v1650_v38  ;;  %v1670_v1 = vstv %s4033_s0  ;;  %v1615_v56 = vmul.f32 %v1614_v57, %v4503_v9  ;;  %s4186_s0 = sld [smem:[#allocation10 + $0x9e]] }
 0x18f   :  { %v1616_v39 = vmul.f32 %v1614_v57, %v2788_v61  ;;  %v1665_v5 = vmul.f32 %v1664_v11, %v2617_v58  ;;  %v1666_v40 = vmul.f32 %v1664_v11, %v2624_v4  ;;  %v1611_v10 = vadd.f32 %v1609_v6, %v1605_v37 }
 0x190   :  { %v1612_v26 = vadd.f32 %v1610_v49, %v1606_v42  ;;  %v1661_v59 = vadd.f32 %v1659_v45, %v1655_v31  ;;  %v1662_v44 = vadd.f32 %v1660_v63, %v1656_v53  ;;  %v4512_v29 = vmax.f32 %v4511_v27, 0.0 }
 0x191   :  { %v4513_v2 = vstv %s3780_s18  ;;  %v1429_v38 = vmax.f32 %v4023_v62, 0.0  ;;  %v1620_v7 = vstv %s4039_s4  ;;  %v1671_v57 = vmul.f32 %v1670_v1, %v2632_v8  ;;  %s4109_s18 = sld [smem:[#allocation10 + $0x1e]]  ;;  %s4192_s4 = sld [smem:[#allocation10 + $0xfd]] }
 0x192   :  { %v1328_v0 = vmul.f32 %v4513_v2, %v4512_v29  ;;  %v1667_v61 = vadd.f32 %v1665_v5, %v1661_v59  ;;  %v1668_v11 = vadd.f32 %v1666_v40, %v1662_v44  ;;  %v1672_v6 = vmul.f32 %v1670_v1, %v2637_v12 }
 0x193   :  { %v1676_v49 = vstv %s4049_s3  ;;  %v1430_v37 = vmax.f32 %v4026_v51, 0.0  ;;  %v1431_v42 = vstv %s4051_s24  ;;  %v1531_v45 = vadd.f32 %v1529_v23, %v1525_v3  ;;  %s4195_s3 = sld [smem:[#allocation10 + $0xae]]  ;;  %s4204_s24 = sld [smem:[#allocation11 + $0xf]] }
 0x194   :  { %v1532_v63 = vadd.f32 %v1530_v15, %v1526_v28  ;;  %v1617_v62 = vadd.f32 %v1615_v56, %v1611_v10  ;;  %v1618_v31 = vadd.f32 %v1616_v39, %v1612_v26  ;;  %v1621_v53 = vmul.f32 %v1620_v7, %v2812_v30 }
 0x195   :  { %v1622_v5 = vmul.f32 %v1620_v7, %v2815_v32  ;;  %v4514_v1 = vmax.f32 %v3921_v35, 0.0  ;;  %v4515_v40 = vmov %v4513_v2  ;;  %v1626_v51 = vstv %s4059_s5  ;;  %v4516_v2 = vld [vmem:[#allocation33_spill] sm:$0xff]  ;;  %s4211_s5 = sld [smem:[#allocation10 + $0xbe]] }
 0x196   :  { %v1673_v44 = vadd.f32 %v1671_v57, %v1667_v61  ;;  %v1677_v3 = vmul.f32 %v1676_v49, %v2639_v13  ;;  %v1432_v23 = vmul.f32 %v1431_v42, %v1429_v38  ;;  %v1674_v15 = vadd.f32 %v1672_v6, %v1668_v11 }
 0x197   :  { %v1329_v59 = vmul.f32 %v4515_v40, %v4514_v1  ;;  %v1678_v28 = vmul.f32 %v1676_v49, %v2647_v16  ;;  %v1682_v56 = vstv %s4063_s10  ;;  %v1433_v35 = vmul.f32 %v1431_v42, %v1430_v37  ;;  %v4518_v49 = vld [vmem:[#allocation30_spill] sm:$0xff]  ;;  %s4213_s10 = sld [smem:[#allocation10 + $0xf]] }
 0x198   :  { %v1533_v7 = vmax.f32 %v1531_v45, 0.0  ;;  %v1534_v61 = vmax.f32 %v1532_v63, 0.0  ;;  %v1535_v39 = vstv %s4065_s12  ;;  %v1623_v10 = vadd.f32 %v1621_v53, %v1617_v62  ;;  %v4520_v62 = vld [vmem:[#allocation31_spill] sm:$0xff]  ;;  %v4522_v53 = vld [vmem:[#allocation20_spill] sm:$0xff]  ;;  %s4218_s12 = sld [smem:[#allocation10 + $0x1f]] }
 0x199   :  { %v1624_v26 = vadd.f32 %v1622_v5, %v1618_v31  ;;  %v1627_v27 = vmul.f32 %v1626_v51, %v2819_v34  ;;  %v1628_v29 = vmul.f32 %v1626_v51, %v2829_v52  ;;  %v4116_v38 = vadd.f32 %v1328_v0, %v4516_v2 }
 0x19a   :  { %v1632_v57 = vstv %s4077_s13  ;;  %v1679_v11 = vadd.f32 %v1677_v3, %v1673_v44  ;;  %v1683_v6 = vmul.f32 %v1682_v56, %v2649_v17  ;;  %v4121_v37 = vadd.f32 %v1329_v59, %v4518_v49  ;;  %s4220_s13 = sld [smem:[#allocation10 + $0x2f]] }
 0x19b   :  { %4517 = vst [vmem:[#allocation21_spill] sm:$0xff] %v4116_v38  ;;  %v1680_v42 = vadd.f32 %v1678_v28, %v1674_v15  ;;  %v1684_v45 = vmul.f32 %v1682_v56, %v2651_v18  ;;  %v1688_v63 = vstv %s4082_s16  ;;  %v4126_v31 = vadd.f32 %v1432_v23, %v4520_v62  ;;  %s4224_s16 = sld [smem:[#allocation10 + $0xce]] }
 0x19c   :  { %4519 = vst [vmem:[#allocation22_spill] sm:$0xff] %v4121_v37  ;;  %v4129_v5 = vadd.f32 %v1433_v35, %v4522_v53  ;;  %v4131_v0 = vmul.f32 %v1535_v39, %v1533_v7  ;;  %v4133_v1 = vmul.f32 %v1535_v39, %v1534_v61  ;;  %v1629_v40 = vadd.f32 %v1627_v27, %v1623_v10  ;;  %v4527_v37 = vld [vmem:[#allocation27_spill] sm:$0xff] }
 0x19d   :  { %4521 = vst [vmem:[#allocation23_spill] sm:$0xff] %v4126_v31  ;;  %v1630_v59 = vadd.f32 %v1628_v29, %v1624_v26  ;;  %v1633_v51 = vmul.f32 %v1632_v57, %v4509_v41  ;;  %v1634_v44 = vmul.f32 %v1632_v57, %v4510_v36  ;;  %v1685_v23 = vadd.f32 %v1683_v6, %v1679_v11 }
 0x19e   :  { %4523 = vst [vmem:[#allocation24_spill] sm:$0xff] %v4129_v5  ;;  %4524 = vst [vmem:[#allocation25_spill] sm:$0xff] %v4131_v0  ;;  %v1689_v15 = vmul.f32 %v1688_v63, %v2653_v19  ;;  %v1694_v28 = vstv %s4098_s20  ;;  %v1686_v56 = vadd.f32 %v1684_v45, %v1680_v42  ;;  %v1690_v35 = vmul.f32 %v1688_v63, %v2655_v20  ;;  %s4243_s20 = sld [smem:[#allocation10 + $0x4f]] }
 0x19f   :  { %4525 = vst [vmem:[#allocation26_spill] sm:$0xff] %v4133_v1  ;;  %v1700_v7 = vstv %s4104_s23  ;;  %v1706_v61 = vstv %s4106_s25  ;;  %v1749_v39 = vstv %s4100_s21  ;;  %v1752_v10 = vstv %s4086_s17  ;;  %s4241_s17 = sld [smem:[#allocation10 + $0x3f]]  ;;  %s4248_s21 = sld [smem:[#allocation10 + $0xde]] }
 0x1a0   :  { %v1756_v27 = vstv %s4109_s18  ;;  %v1762_v26 = vstv %s4111_s26  ;;  %v4155_v29 = vadd.f32 %v1633_v51, %v1629_v40  ;;  %v4157_v2 = vadd.f32 %v1634_v44, %v1630_v59  ;;  %s4257_s23 = sld [smem:[#allocation10 + $0x5f]]  ;;  %s4272_s18 = sld [smem:[#allocation10 + $0xee]] }
 0x1a1   :  { %v1750_v57 = vmul.f32 %v1749_v39, %v2597_v46  ;;  %v1751_v11 = vmul.f32 %v1749_v39, %v2599_v47  ;;  %v1691_v6 = vadd.f32 %v1689_v15, %v1685_v23  ;;  %v1695_v49 = vmul.f32 %v1694_v28, %v2657_v21  ;;  %s4265_s25 = sld [smem:[#allocation10 + $0x6f]] }
 0x1a2   :  { %4526 = vst [vmem:[#allocation28_spill] sm:$0xff] %v4157_v2  ;;  %v1757_v42 = vmul.f32 %v1756_v27, %v2601_v48  ;;  %v1758_v45 = vmul.f32 %v1756_v27, %v2604_v50  ;;  %v1763_v53 = vmul.f32 %v1762_v26, %v2610_v54  ;;  %v1764_v40 = vmul.f32 %v1762_v26, %v4465_v14  ;;  %s4276_s26 = sld [smem:[#allocation10 + $0x7f]] }
 0x1a3   :  { %v1753_v63 = vadd.f32 %v1752_v10, %v1750_v57  ;;  %v1754_v62 = vadd.f32 %v1752_v10, %v1751_v11  ;;  %v1692_v59 = vadd.f32 %v1690_v35, %v1686_v56  ;;  %v1696_v51 = vmul.f32 %v1694_v28, %v2659_v22 }
 0x1a4   :  { %v1768_v44 = vstv %s4135_s27  ;;  %v1774_v23 = vstv %s4137_s28  ;;  %v1701_v15 = vmul.f32 %v1700_v7, %v2664_v24  ;;  %v1702_v39 = vmul.f32 %v1700_v7, %v4497_v25  ;;  %s4282_s27 = sld [smem:[#allocation10 + $0x8f]]  ;;  %s4286_s28 = sld [smem:[#allocation10 + $0xfe]] }
 0x1a5   :  { %v1759_v10 = vadd.f32 %v1757_v42, %v1753_v63  ;;  %v1760_v27 = vadd.f32 %v1758_v45, %v1754_v62  ;;  %v1697_v57 = vadd.f32 %v1695_v49, %v1691_v6  ;;  %v1769_v11 = vmul.f32 %v1768_v44, %v2617_v58 }
 0x1a6   :  { %v1770_v56 = vmul.f32 %v1768_v44, %v2624_v4  ;;  %v1780_v35 = vstv %s4144_s29  ;;  %v1775_v3 = vmul.f32 %v1774_v23, %v2632_v8  ;;  %v1776_v7 = vmul.f32 %v1774_v23, %v2637_v12  ;;  %s4291_s29 = sld [smem:[#allocation10 + $0x9f]] }
 0x1a7   :  { %v1765_v28 = vadd.f32 %v1763_v53, %v1759_v10  ;;  %v1766_v26 = vadd.f32 %v1764_v40, %v1760_v27  ;;  %v1698_v5 = vadd.f32 %v1696_v51, %v1692_v59  ;;  %v1707_v42 = vmul.f32 %v1706_v61, %v4498_v43 }
 0x1a8   :  { %v1708_v6 = vmul.f32 %v1706_v61, %v4499_v55  ;;  %v1786_v49 = vstv %s4153_s30  ;;  %v1781_v62 = vmul.f32 %v1780_v35, %v2639_v13  ;;  %v1782_v53 = vmul.f32 %v1780_v35, %v2647_v16  ;;  %s4297_s30 = sld [smem:[#allocation10 + $0xaf]] }
 0x1a9   :  { %v1771_v45 = vadd.f32 %v1769_v11, %v1765_v28  ;;  %v1772_v63 = vadd.f32 %v1770_v56, %v1766_v26  ;;  %v1703_v40 = vadd.f32 %v1701_v15, %v1697_v57  ;;  %v1712_v59 = vstv %s4159_s8  ;;  %s4305_s8 = sld [smem:[#allocation10 + $0xbf]] }
 0x1aa   :  { %v1718_v51 = vstv %s4164_s9  ;;  %v1792_v44 = vstv %s4168_s14  ;;  %v1787_v10 = vmul.f32 %v1786_v49, %v2649_v17  ;;  %v1788_v27 = vmul.f32 %v1786_v49, %v2651_v18  ;;  %s4311_s9 = sld [smem:[#allocation10 + $0xcf]] }
 0x1ab   :  { %v1777_v23 = vadd.f32 %v1775_v3, %v1771_v45  ;;  %v1778_v61 = vadd.f32 %v1776_v7, %v1772_v63  ;;  %v1704_v11 = vadd.f32 %v1702_v39, %v1698_v5  ;;  %v1724_v28 = vstv %s4170_s15  ;;  %s4319_s14 = sld [smem:[#allocation10 + $0xdf]] }
 0x1ac   :  { %v1730_v56 = vstv %s4175_s11  ;;  %v1798_v26 = vstv %s4179_s2  ;;  %v1793_v15 = vmul.f32 %v1792_v44, %v2653_v19  ;;  %v1794_v57 = vmul.f32 %v1792_v44, %v2655_v20  ;;  %s4325_s15 = sld [smem:[#allocation10 + $0xef]]  ;;  %s4337_s2 = sld [smem:[#allocation13 + $0xd]] }
 0x1ad   :  { %v1783_v31 = vadd.f32 %v1781_v62, %v1777_v23  ;;  %v1784_v1 = vadd.f32 %v1782_v53, %v1778_v61  ;;  %v1709_v3 = vadd.f32 %v1707_v42, %v1703_v40  ;;  %v1713_v35 = vmul.f32 %v1712_v59, %v4500_v33  ;;  %s4333_s11 = sld [smem:[#allocation10 + $0xff]] }
 0x1ae   :  { %v1714_v5 = vmul.f32 %v1712_v59, %v4501_v60  ;;  %v1804_v39 = vstv %s4186_s0  ;;  %v1799_v45 = vmul.f32 %v1798_v26, %v2657_v21  ;;  %v1800_v63 = vmul.f32 %v1798_v26, %v2659_v22  ;;  %s4343_s0 = sld [smem:[#allocation13 + $0xe]] }
 0x1af   :  { %v1789_v7 = vadd.f32 %v1787_v10, %v1783_v31  ;;  %v1790_v49 = vadd.f32 %v1788_v27, %v1784_v1  ;;  %v1710_v62 = vadd.f32 %v1708_v6, %v1704_v11  ;;  %v1719_v42 = vmul.f32 %v1718_v51, %v4503_v9 }
 0x1b0   :  { %v1736_v53 = vstv %s4192_s4  ;;  %v1810_v40 = vstv %s4195_s3  ;;  %v1805_v23 = vmul.f32 %v1804_v39, %v2664_v24  ;;  %v1806_v61 = vmul.f32 %v1804_v39, %v4497_v25  ;;  %s4355_s4 = sld [smem:[#allocation13 + $0xf]] }
 0x1b1   :  { %v1795_v44 = vadd.f32 %v1793_v15, %v1789_v7  ;;  %v1796_v59 = vadd.f32 %v1794_v57, %v1790_v49  ;;  %v1720_v31 = vmul.f32 %v1718_v51, %v4527_v37  ;;  %v4233_v1 = vmul.f32 %v1724_v28, %v2812_v30 }
 0x1b2   :  { %v4236_v10 = vmul.f32 %v1724_v28, %v2815_v32  ;;  %v4239_v6 = vmul.f32 %v1730_v56, %v2819_v34  ;;  %v1715_v27 = vadd.f32 %v1713_v35, %v1709_v3  ;;  %v4246_v51 = vmul.f32 %v1730_v56, %v2829_v52 }
 0x1b3   :  { %v1801_v11 = vadd.f32 %v1799_v45, %v1795_v44  ;;  %v1802_v26 = vadd.f32 %v1800_v63, %v1796_v59  ;;  %v1716_v28 = vadd.f32 %v1714_v5, %v1710_v62  ;;  %v4251_v15 = vmul.f32 %v1736_v53, %v4509_v41 }
 0x1b4   :  { %v4254_v57 = vmul.f32 %v1736_v53, %v4510_v36  ;;  %v1811_v39 = vmul.f32 %v1810_v40, %v4498_v43  ;;  %v1812_v35 = vmul.f32 %v1810_v40, %v4499_v55  ;;  %v1816_v7 = vstv %s4211_s5 }
 0x1b5   :  { %v1807_v3 = vadd.f32 %v1805_v23, %v1801_v11  ;;  %v1808_v56 = vadd.f32 %v1806_v61, %v1802_v26  ;;  %v1853_v49 = vstv %s4213_s10  ;;  %v1856_v45 = vstv %s4204_s24  ;;  %s2451_s24 = smov [#allocation14]  }
 0x1b6   :  { %v1860_v63 = vstv %s4218_s12  ;;  %v1866_v44 = vstv %s4220_s13  ;;  %v1721_v5 = vadd.f32 %v1719_v42, %v1715_v27  ;;  %v1822_v62 = vstv %s4224_s16  ;;  %s1980_s5 = sshll.u32 %s2451_s24, 4  ;;  %s1981_s5 = int_to_ptr.vmem [resolvable:$true] %s1980_s5 }
 0x1b7   :  { %v1854_v53 = vmul.f32 %v1853_v49, %v2597_v46  ;;  %v1855_v59 = vmul.f32 %v1853_v49, %v2599_v47  ;;  %v1817_v23 = vmul.f32 %v1816_v7, %v4500_v33  ;;  %v1818_v40 = vmul.f32 %v1816_v7, %v4501_v60  ;;  %p2416_p6 = scmp.lt.s32.totalorder %s1981_s5, %s1981_s5 }
 0x1b8   :  { %v1861_v61 = vmul.f32 %v1860_v63, %v2601_v48  ;;  %v1862_v11 = vmul.f32 %v1860_v63, %v2604_v50  ;;  %v1867_v46 = vmul.f32 %v1866_v44, %v2610_v54  ;;  %v1868_v47 = vmul.f32 %v1866_v44, %v4465_v14 }
 0x1b9   :  { %v1857_v42 = vadd.f32 %v1856_v45, %v1854_v53  ;;  %v1858_v27 = vadd.f32 %v1856_v45, %v1855_v59  ;;  %v1813_v26 = vadd.f32 %v1811_v39, %v1807_v3  ;;  %v1814_v49 = vadd.f32 %v1812_v35, %v1808_v56 }
 0x1ba   :  { %v1872_v0 = vstv %s4241_s17  ;;  %v1878_v38 = vstv %s4243_s20  ;;  %v1722_v7 = vadd.f32 %v1720_v31, %v1716_v28  ;;  %v1828_v2 = vstv %s4248_s21 }
 0x1bb   :  { %v1863_v48 = vadd.f32 %v1861_v61, %v1857_v42  ;;  %v1864_v50 = vadd.f32 %v1862_v11, %v1858_v27  ;;  %v1823_v63 = vmul.f32 %v1822_v62, %v4503_v9  ;;  %v1873_v45 = vmul.f32 %v1872_v0, %v2617_v58 }
 0x1bc   :  { %v1874_v54 = vmul.f32 %v1872_v0, %v2624_v4  ;;  %v1884_v14 = vstv %s4257_s23  ;;  %v1879_v31 = vmul.f32 %v1878_v38, %v2632_v8  ;;  %v1880_v28 = vmul.f32 %v1878_v38, %v2637_v12 }
 0x1bd   :  { %v1869_v39 = vadd.f32 %v1867_v46, %v1863_v48  ;;  %v1870_v3 = vadd.f32 %v1868_v47, %v1864_v50  ;;  %v1819_v56 = vadd.f32 %v1817_v23, %v1813_v26  ;;  %v1820_v35 = vadd.f32 %v1818_v40, %v1814_v49 }
 0x1be   :  { %v1824_v44 = vmul.f32 %v1822_v62, %v4527_v37  ;;  %v1890_v53 = vstv %s4265_s25  ;;  %v1885_v0 = vmul.f32 %v1884_v14, %v2639_v13  ;;  %v1886_v59 = vmul.f32 %v1884_v14, %v2647_v16 }
 0x1bf   :  { %v1875_v58 = vadd.f32 %v1873_v45, %v1869_v39  ;;  %v1876_v4 = vadd.f32 %v1874_v54, %v1870_v3  ;;  %v1727_v61 = vadd.f32 %v4233_v1, %v1721_v5  ;;  %v1829_v8 = vmul.f32 %v1828_v2, %v2812_v30 }
 0x1c0   :  { %v1834_v11 = vstv %s4272_s18  ;;  %v1896_v12 = vstv %s4276_s26  ;;  %v1891_v23 = vmul.f32 %v1890_v53, %v2649_v17  ;;  %v1892_v40 = vmul.f32 %v1890_v53, %v2651_v18 }
 0x1c1   :  { %v1881_v38 = vadd.f32 %v1879_v31, %v1875_v58  ;;  %v1882_v62 = vadd.f32 %v1880_v28, %v1876_v4  ;;  %v1825_v42 = vadd.f32 %v1823_v63, %v1819_v56  ;;  %v1826_v13 = vadd.f32 %v1824_v44, %v1820_v35 }
 0x1c2   :  { %v1830_v16 = vmul.f32 %v1828_v2, %v2815_v32  ;;  %v1902_v27 = vstv %s4282_s27  ;;  %v1897_v46 = vmul.f32 %v1896_v12, %v2653_v19  ;;  %v1898_v47 = vmul.f32 %v1896_v12, %v2655_v20 }
 0x1c3   :  { %v1887_v1 = vadd.f32 %v1885_v0, %v1881_v38  ;;  %v1888_v5 = vadd.f32 %v1886_v59, %v1882_v62  ;;  %v1728_v26 = vadd.f32 %v4236_v10, %v1722_v7  ;;  %v1835_v17 = vmul.f32 %v1834_v11, %v2819_v34 }
 0x1c4   :  { %v1840_v49 = vstv %s4286_s28  ;;  %v1908_v18 = vstv %s4291_s29  ;;  %v1903_v50 = vmul.f32 %v1902_v27, %v2657_v21  ;;  %v1904_v63 = vmul.f32 %v1902_v27, %v2659_v22 }
 0x1c5   :  { %v1893_v48 = vadd.f32 %v1891_v23, %v1887_v1  ;;  %v1894_v2 = vadd.f32 %v1892_v40, %v1888_v5  ;;  %v1831_v45 = vadd.f32 %v1829_v8, %v1825_v42  ;;  %v1832_v54 = vadd.f32 %v1830_v16, %v1826_v13 }
 0x1c6   :  { %v1836_v19 = vmul.f32 %v1834_v11, %v2829_v52  ;;  %v1914_v20 = vstv %s4297_s30  ;;  %v1909_v14 = vmul.f32 %v1908_v18, %v2664_v24  ;;  %v1910_v39 = vmul.f32 %v1908_v18, %v4497_v25 }
 0x1c7   :  { %v1899_v10 = vadd.f32 %v1897_v46, %v1893_v48  ;;  %v1900_v7 = vadd.f32 %v1898_v47, %v1894_v2  ;;  %v1733_v3 = vadd.f32 %v4239_v6, %v1727_v61  ;;  %v1734_v21 = vadd.f32 %v4246_v51, %v1728_v26 }
 0x1c8   :  { %v1841_v22 = vmul.f32 %v1840_v49, %v4509_v41  ;;  %v1920_v31 = vstv %s4305_s8  ;;  %v1915_v35 = vmul.f32 %v1914_v20, %v4498_v43  ;;  %v1916_v44 = vmul.f32 %v1914_v20, %v4499_v55  ;;  %v4534_v20 = vld [vmem:[#allocation26_spill] sm:$0xff] }
 0x1c9   :  { %v1905_v28 = vadd.f32 %v1903_v50, %v1899_v10  ;;  %v1906_v56 = vadd.f32 %v1904_v63, %v1900_v7  ;;  %v1837_v24 = vadd.f32 %v1835_v17, %v1831_v45  ;;  %v1838_v25 = vadd.f32 %v1836_v19, %v1832_v54  ;;  %v4531_v63 = vld [vmem:[#allocation21_spill] sm:$0xff]  ;;  %v4533_v19 = vld [vmem:[#allocation22_spill] sm:$0xff] }
 0x1ca   :  { %v1842_v6 = vmul.f32 %v1840_v49, %v4510_v36  ;;  %v1926_v53 = vstv %s4311_s9  ;;  %v1921_v4 = vmul.f32 %v1920_v31, %v4500_v33  ;;  %v1922_v0 = vmul.f32 %v1920_v31, %v4501_v60  ;;  %v4528_v33 = vld [vmem:[#allocation28_spill] sm:$0xff]  ;;  %v4532_v45 = vld [vmem:[#allocation25_spill] sm:$0xff] }
 0x1cb   :  { %v1911_v51 = vadd.f32 %v1909_v14, %v1905_v28  ;;  %v1912_v58 = vadd.f32 %v1910_v39, %v1906_v56  ;;  %v1637_v43 = vmax.f32 %v4155_v29, 0.0  ;;  %v1739_v55 = vadd.f32 %v4251_v15, %v1733_v3  ;;  %v4535_v3 = vld [vmem:[#allocation23_spill] sm:$0xff] }
 0x1cc   :  { %v1740_v59 = vadd.f32 %v4254_v57, %v1734_v21  ;;  %v1932_v61 = vstv %s4319_s14  ;;  %v1927_v12 = vmul.f32 %v1926_v53, %v4503_v9  ;;  %v1928_v38 = vmul.f32 %v1926_v53, %v4527_v37 }
 0x1cd   :  { %v1917_v8 = vadd.f32 %v1915_v35, %v1911_v51  ;;  %v1918_v11 = vadd.f32 %v1916_v44, %v1912_v58  ;;  %v1638_v62 = vmax.f32 %v4528_v33, 0.0  ;;  %v1843_v60 = vadd.f32 %v1841_v22, %v1837_v24  ;;  %v4536_v22 = vld [vmem:[#allocation24_spill] sm:$0xff] }
 0x1ce   :  { %v1844_v23 = vadd.f32 %v1842_v6, %v1838_v25  ;;  %v1938_v29 = vstv %s4325_s15  ;;  %v1933_v42 = vmul.f32 %v1932_v61, %v2812_v30  ;;  %v1934_v57 = vmul.f32 %v1932_v61, %v2815_v32 }
 0x1cf   :  { %v1923_v40 = vadd.f32 %v1921_v4, %v1917_v8  ;;  %v1924_v15 = vadd.f32 %v1922_v0, %v1918_v11  ;;  %v4529_v13 = vstv %s4088_s19  ;;  %v1741_v9 = vmax.f32 %v1739_v55, 0.0 }
 0x1d0   :  { %v1640_v16 = vmul.f32 %v4529_v13, %v1637_v43  ;;  %v1742_v27 = vmax.f32 %v1740_v59, 0.0  ;;  %v1944_v37 = vstv %s4333_s11  ;;  %v1939_v46 = vmul.f32 %v1938_v29, %v2819_v34 }
 0x1d1   :  { %v1929_v1 = vadd.f32 %v1927_v12, %v1923_v40  ;;  %v1930_v5 = vadd.f32 %v1928_v38, %v1924_v15  ;;  %v1940_v47 = vmul.f32 %v1938_v29, %v2829_v52  ;;  %v4530_v26 = vmov %v4529_v13 }
 0x1d2   :  { %v1641_v17 = vmul.f32 %v4530_v26, %v1638_v62  ;;  %v1743_v49 = vstv %s4337_s2  ;;  %v1845_v30 = vmax.f32 %v1843_v60, 0.0  ;;  %v1846_v18 = vmax.f32 %v1844_v23, 0.0 }
 0x1d3   :  { %v1935_v32 = vadd.f32 %v1933_v42, %v1929_v1  ;;  %v1936_v48 = vadd.f32 %v1934_v57, %v1930_v5  ;;  %v1945_v2 = vmul.f32 %v1944_v37, %v4509_v41  ;;  %v1946_v50 = vmul.f32 %v1944_v37, %v4510_v36 }
 0x1d4   :  { %v1538_v54 = vadd.f32 %v4532_v45, %v4531_v63  ;;  %v1539_v34 = vadd.f32 %v4534_v20, %v4533_v19  ;;  %v1847_v10 = vstv %s4343_s0  ;;  %v1744_v52 = vmul.f32 %v1743_v49, %v1741_v9 }
 0x1d5   :  { %v1745_v7 = vmul.f32 %v1743_v49, %v1742_v27  ;;  %v1941_v14 = vadd.f32 %v1939_v46, %v1935_v32  ;;  %v1942_v39 = vadd.f32 %v1940_v47, %v1936_v48  ;;  %v1642_v21 = vadd.f32 %v1640_v16, %v4535_v3 }
 0x1d6   :  { %v1643_v31 = vadd.f32 %v1641_v17, %v4536_v22  ;;  %v1848_v28 = vmul.f32 %v1847_v10, %v1845_v30  ;;  %v1849_v56 = vmul.f32 %v1847_v10, %v1846_v18  ;;  %v1951_v36 = vstv %s4355_s4 }
 0x1d7   :  { %v1947_v41 = vadd.f32 %v1945_v2, %v1941_v14  ;;  %v1948_v35 = vadd.f32 %v1946_v50, %v1942_v39  ;;  %v1746_v44 = vadd.f32 %v1744_v52, %v1538_v54  ;;  %v1747_v24 = vadd.f32 %v1745_v7, %v1539_v34 }
 0x1d8   :  { %v1850_v53 = vadd.f32 %v1848_v28, %v1642_v21  ;;  %v1851_v51 = vadd.f32 %v1849_v56, %v1643_v31  ;;  %v1958_v55 = vstv %s4399_s6  ;;  %s2411_s6 = scalar_lea.vmem %s1981_s5, 256 }
 0x1d9   :  { %v1949_v25 = vmax.f32 %v1947_v41, 0.0  ;;  %v1950_v6 = vmax.f32 %v1948_v35, 0.0  ;;  %p2412_p5 = scmp.ne.s32.totalorder %s1981_s5, %s2411_s6  ;;  %p2417_p7 = scmp.lt.s32.totalorder %s2411_s6, %s2411_s6 }
 0x1db   :  { %v1952_v58 = vmul.f32 %v1951_v36, %v1949_v25  ;;  %v1953_v4 = vmul.f32 %v1951_v36, %v1950_v6  ;;  %p2418_p8 = por %p2417_p7, %p2416_p6 }
 0x1dd   :  { %v1954_v0 = vadd.f32 %v1952_v58, %v1746_v44  ;;  %v1955_v43 = vadd.f32 %v1953_v4, %v1747_v24  ;;  %p2419_p9 = pnand %p2418_p8, %p2412_p5 }
 0x1df   :  { %v1956_v59 = vadd.f32 %v1954_v0, %v1850_v53  ;;  %v1957_v61 = vadd.f32 %v1955_v43, %v1851_v51 }
 0x1e1   :  { %v1959_v8 = vadd.f32 %v1958_v55, %v1956_v59  ;;  %v1960_v11 = vadd.f32 %v1958_v55, %v1957_v61 }
 0x1e3   :  { %v2310_v12 = vmul.f32 -1.442695, %v1959_v8  ;;  %v2311_v38 = vmul.f32 -1.442695, %v1960_v11 }
 0x1e5   :  { %2321 = vpow2.f32 %v2310_v12 }
 0x1e6   :  { %2323 = vpow2.f32 %v2311_v38 }
 0x1ef   :  { %v2322_v33 = vpop.eup %2321 }
 0x1f0   :  { %v2324_v62 = vpop.eup %2323  ;;  %v1967_v60 = vadd.f32 1.0, %v2322_v33 }
 0x1f1   :  { %v1968_v23 = vadd.f32 1.0, %v2324_v62 }
 0x1f2   :  { %2325 = vrcp.f32 %v1967_v60 }
 0x1f3   :  { %2327 = vrcp.f32 %v1968_v23 }
 0x1fc   :  { %v2326_v29 = vpop.eup %2325 }
 0x1fd   :  { %v2328_v40 = vpop.eup %2327  ;;  %1973 = vst [vmem:[#allocation14] sm:$0xff] %v2326_v29 }
 0x1fe   :  { %1974 = vst [vmem:[#allocation14 + $0x8] sm:$0xff] %v2328_v40 }
 0x1ff   :  { %2422 = shalt.err (!%p2419_p9)
}
 0x200   :  { %s2423_s13 = scalar_lea.hbm %s4400_s7, 256 }
 0x201   :  { %p2424_p10 = scmp.ne.s32.totalorder %s4400_s7, %s2423_s13  ;;  %p2427_p11 = scmp.lt.u32.totalorder %s2423_s13, %s4400_s7 }
 0x203   :  { %p2429_p12 = pnand %p2427_p11, %p2424_p10 }
 0x205   :  { %2432 = shalt.err (!%p2429_p12)
}
 0x206   :  { %1986 = dma.vmem_to_hbm [thread:$0]  %s1981_s5, 256, %s4400_s7, [#allocation5], %s2446_s1, %s2446_s1, %s2447_s22  }
 0x207   :  { %2441 = dma.done.wait [#allocation5], 256  }
 0x208   :  { %2442 = vsyncadd [#allocation5], 4294967040 }
 0x209   :  { %1990 = vsyncpa [#allocation4], 1 }
 0x20a   :  { %1991 = vsyncpa [#allocation5], 1 }
 0x20b   :  { %1992 = vsyncpa [#allocation6], 1 }
 0x20c   :  { %1993 = vsyncpa [#allocation9], 1 }
 0x20d   :  { %1994 = vsyncpa [#allocation12], 1 }

</bundles_post_ra>
